<compile_context>
chip_gen: v7x
topology: tpu7x:2x2x1
jax: 0.10.0
libtpu: 0.0.40
codegen_flags: <defaults>
</compile_context>

<pallas_src>
import functools

import jax
import jax.numpy as jnp
from jax import lax
from jax.experimental import pallas as pl
from jax.experimental.pallas import tpu as pltpu

_LN_EPS = 1e-5  # torch nn.LayerNorm default eps


def _erf(x):
    # Abramowitz & Stegun 7.1.26 polynomial (max abs err ~1.5e-7); exp + approx-reciprocal go
    # to the EUP slot, the rest is VALU-only, so it lowers cleanly on Mosaic.
    a1, a2, a3, a4, a5 = (0.254829592, -0.284496736, 1.421413741,
                          -1.453152027, 1.061405429)
    p = 0.3275911
    s = jnp.where(x >= 0.0, 1.0, -1.0)
    ax = jnp.abs(x)
    t = pl.reciprocal(1.0 + p * ax, approx=True)
    poly = ((((a5 * t + a4) * t + a3) * t + a2) * t + a1) * t
    return s * (1.0 - poly * jnp.exp(-ax * ax))


def _gelu_exact(x):
    # torch nn.GELU() default = exact erf GELU
    return 0.5 * x * (1.0 + _erf(x * (2.0 ** -0.5)))


def _layernorm(x, gamma, beta):
    mu = jnp.mean(x, axis=-1, keepdims=True)
    var = jnp.mean((x - mu) ** 2, axis=-1, keepdims=True)
    return (x - mu) * lax.rsqrt(var + _LN_EPS) * gamma + beta


def attention_layer_kernel(x_ref, g1_ref, be1_ref, wqkv_ref, wo_ref, bo_ref,
                           g2_ref, be2_ref, w1_ref, bm1_ref, w2_ref, bm2_ref,
                           o_ref, *, heads):
    H, W, C = x_ref.shape            # one whole image (batch dim squeezed)
    N = H * W
    dh = C // heads
    scale = dh ** -0.5

    # (H, W, C) -> (N, C): trailing dim unchanged, leading dims collapse -> free reshape.
    x = x_ref[...].reshape(N, C)     # fp32

    # ---- norm1 + fused QKV projection (bf16 MXU inputs, f32 accumulate) ----
    xn = _layernorm(x, g1_ref[...], be1_ref[...])
    wqkv = wqkv_ref[...]             # (C, 3C) bf16, columns laid out [q|k|v] x [head, dh]
    qkv = jnp.dot(xn.astype(wqkv.dtype), wqkv,
                  preferred_element_type=jnp.float32)          # (N, 3C) f32

    # ---- multi-head attention over the W axis, batched over the H rows ----
    wo = wo_ref[...]                 # (C, C) bf16
    proj = jnp.zeros((N, C), jnp.float32)
    for hd in range(heads):          # small static unroll over heads
        q = (qkv[:, hd * dh:(hd + 1) * dh] * scale).reshape(H, W, dh)
        k = qkv[:, C + hd * dh:C + (hd + 1) * dh].reshape(H, W, dh)
        v = qkv[:, 2 * C + hd * dh:2 * C + (hd + 1) * dh].reshape(H, W, dh)
        dots = jnp.einsum('hwd,hud->hwu', q, k,
                          preferred_element_type=jnp.float32)  # (H, W, W), scale folded in q
        dots = dots - jnp.max(dots, axis=-1, keepdims=True)
        e = jnp.exp(dots)
        attn = e * pl.reciprocal(jnp.sum(e, axis=-1, keepdims=True), approx=True)
        oh = jnp.einsum('hwu,hud->hwd', attn, v,
                        preferred_element_type=jnp.float32)    # (H, W, dh)
        # Accumulate this head's slice of the output projection.  Equivalent to
        # concat(head_outs) @ wo, but with no lane-wise concatenate.
        proj = proj + jnp.dot(oh.reshape(N, dh).astype(wo.dtype),
                              wo[hd * dh:(hd + 1) * dh, :],
                              preferred_element_type=jnp.float32)
    proj = proj + bo_ref[...]

    x1 = x + proj                    # residual 1 (drop_path / dropout = identity, p = 0)

    # ---- norm2 + MLP ----
    xn2 = _layernorm(x1, g2_ref[...], be2_ref[...])
    w1 = w1_ref[...]                 # (C, hidden) bf16
    hid = jnp.dot(xn2.astype(w1.dtype), w1,
                  preferred_element_type=jnp.float32) + bm1_ref[...]
    hid = _gelu_exact(hid)
    w2 = w2_ref[...]                 # (hidden, C) bf16
    mlp = jnp.dot(hid.astype(w2.dtype), w2,
                  preferred_element_type=jnp.float32) + bm2_ref[...]

    o_ref[...] = (x1 + mlp).reshape(H, W, C)   # residual 2


def attention_layer(x_nchw, params, heads):
    """x_nchw: (B, C, H, W) float32 -> (B, C, H, W) float32."""
    B, C, H, W = x_nchw.shape
    hidden = params["w1"].shape[1]

    # NCHW -> NHWC for the kernel.  (At realistic sizes the preferred fix is to accept NHWC at
    # the API boundary so x crosses HBM exactly once; kept here to match the torch interface.)
    x = jnp.transpose(x_nchw, (0, 2, 3, 1)).astype(jnp.float32)

    # MXU operands in bf16 (f32 accumulation inside the kernel); LN/bias params stay f32.
    mm = jnp.bfloat16
    wqkv = params["wqkv"].astype(mm)
    wo = params["wo"].astype(mm)
    w1 = params["w1"].astype(mm)
    w2 = params["w2"].astype(mm)

    def rep(shape):  # full-array block, replicated at every grid step
        return pl.BlockSpec(shape, lambda b: (0,) * len(shape))

    in_specs = [
        pl.BlockSpec((None, H, W, C), lambda b: (b, 0, 0, 0)),   # x: one whole image per step
        rep((1, C)), rep((1, C)),                                # norm1 gamma / beta
        rep((C, 3 * C)),                                         # to_qkv weight (no bias)
        rep((C, C)), rep((1, C)),                                # to_out weight / bias
        rep((1, C)), rep((1, C)),                                # norm2 gamma / beta
        rep((C, hidden)), rep((1, hidden)),                      # mlp fc1 weight / bias
        rep((hidden, C)), rep((1, C)),                           # mlp fc2 weight / bias
    ]

    out = pl.pallas_call(
        functools.partial(attention_layer_kernel, heads=heads),
        out_shape=jax.ShapeDtypeStruct((B, H, W, C), jnp.float32),
        grid=(B,),
        in_specs=in_specs,
        out_specs=pl.BlockSpec((None, H, W, C), lambda b: (b, 0, 0, 0)),
        compiler_params=pltpu.CompilerParams(
            dimension_semantics=("parallel",),          # >= 2 steps -> both v7x TCs busy
            vmem_limit_bytes=32 * 1024 * 1024),
    )(x, params["g1"], params["be1"], wqkv, wo, params["bo"],
      params["g2"], params["be2"], w1, params["bm1"], w2, params["bm2"])

    return jnp.transpose(out, (0, 3, 1, 2))  # back to NCHW


def attention_layer_ref(x_nchw, params, heads):
    """Pure-JAX f32 reference mirroring the torch forward exactly."""
    x = jnp.transpose(x_nchw, (0, 2, 3, 1))
    B, H, W, C = x.shape
    dh = C // heads
    scale = dh ** -0.5

    def ln(v, g, b):
        mu = jnp.mean(v, -1, keepdims=True)
        var = jnp.mean((v - mu) ** 2, -1, keepdims=True)
        return (v - mu) / jnp.sqrt(var + _LN_EPS) * g + b

    shortcut = x
    xn = ln(x, params["g1"], params["be1"])
    qkv = (xn @ params["wqkv"]).reshape(B, H, W, 3, heads, dh)
    qkv = jnp.transpose(qkv, (3, 0, 4, 1, 2, 5))         # (3, B, heads, H, W, dh)
    q, k, v = qkv[0], qkv[1], qkv[2]
    dots = jnp.einsum("bnhwd,bnhud->bnhwu", q, k) * scale
    attn = jax.nn.softmax(dots, axis=-1)
    out = jnp.einsum("bnhwu,bnhud->bnhwd", attn, v)
    out = jnp.transpose(out, (0, 2, 3, 1, 4)).reshape(B, H, W, C)
    out = out @ params["wo"] + params["bo"]
    x1 = shortcut + out
    xn2 = ln(x1, params["g2"], params["be2"])
    hid = jax.nn.gelu(xn2 @ params["w1"] + params["bm1"], approximate=False)
    y = hid @ params["w2"] + params["bm2"]
    return jnp.transpose(x1 + y, (0, 3, 1, 2))


if __name__ == "__main__":
    B, C, H, W = 2, 32, 8, 8
    heads = 4
    mlp_ratio = 4.0
    hidden = int(C * mlp_ratio)

    key = jax.random.PRNGKey(0)
    ks = jax.random.split(key, 8)
    x = jax.random.normal(ks[0], (B, C, H, W), jnp.float32)

    params = {
        # LayerNorms: fresh torch init (weight=1, bias=0)
        "g1": jnp.ones((1, C), jnp.float32), "be1": jnp.zeros((1, C), jnp.float32),
        "g2": jnp.ones((1, C), jnp.float32), "be2": jnp.zeros((1, C), jnp.float32),
        # Linear weights stored already transposed so the kernel computes x @ W;
        # to_qkv columns laid out [q|k|v] x [head, dh] (matches torch reshape(...,3,heads,dh)).
        "wqkv": 0.05 * jax.random.normal(ks[1], (C, 3 * C), jnp.float32),
        "wo":   0.05 * jax.random.normal(ks[2], (C, C), jnp.float32),
        "bo":   0.05 * jax.random.normal(ks[3], (1, C), jnp.float32),
        "w1":   0.05 * jax.random.normal(ks[4], (C, hidden), jnp.float32),
        "bm1":  0.05 * jax.random.normal(ks[5], (1, hidden), jnp.float32),
        "w2":   0.05 * jax.random.normal(ks[6], (hidden, C), jnp.float32),
        "bm2":  0.05 * jax.random.normal(ks[7], (1, C), jnp.float32),
    }

    y = attention_layer(x, params, heads)
    y = jax.block_until_ready(y)

    y_ref = attention_layer_ref(x, params, heads)
    assert y.shape == (B, C, H, W)
    # Tolerance loosened vs a pure-f32 kernel: matmul inputs are bf16 (f32 accumulation) and the
    # softmax/GELU divides use the EUP approximate reciprocal, per the performance review.
    assert jnp.allclose(y, y_ref, rtol=1e-2, atol=1e-2), (
        f"max abs err {jnp.max(jnp.abs(y - y_ref))}")

    print("KERNEL_OK")
</pallas_src>

<mosaic_0001>
module attributes {stable_mosaic.version = 11 : i64} {
  func.func @attention_layer_kernel(%arg0: i32, %arg1: memref<1x8x8x32xf32, #tpu.memory_space<vmem>>, %arg2: memref<1x32xf32, #tpu.memory_space<vmem>>, %arg3: memref<1x32xf32, #tpu.memory_space<vmem>>, %arg4: memref<32x96xbf16, #tpu.memory_space<vmem>>, %arg5: memref<32x32xbf16, #tpu.memory_space<vmem>>, %arg6: memref<1x32xf32, #tpu.memory_space<vmem>>, %arg7: memref<1x32xf32, #tpu.memory_space<vmem>>, %arg8: memref<1x32xf32, #tpu.memory_space<vmem>>, %arg9: memref<32x128xbf16, #tpu.memory_space<vmem>>, %arg10: memref<1x128xf32, #tpu.memory_space<vmem>>, %arg11: memref<128x32xbf16, #tpu.memory_space<vmem>>, %arg12: memref<1x32xf32, #tpu.memory_space<vmem>>, %arg13: memref<1x8x8x32xf32, #tpu.memory_space<vmem>>) attributes {dimension_semantics = [#tpu.dimension_semantics<parallel>], iteration_bounds = array<i64: 2>, scalar_prefetch = 0 : i64, scratch_operands = 0 : i64, tpu.core_type = #tpu.core_type<tc>, window_params = [{transform_indices = @transform_0, window_bounds = array<i64: 1, 8, 8, 32>}, {pipeline_mode = #tpu.pipeline_mode<synchronous>, transform_indices = @transform_1, window_bounds = array<i64: 1, 32>}, {pipeline_mode = #tpu.pipeline_mode<synchronous>, transform_indices = @transform_2, window_bounds = array<i64: 1, 32>}, {pipeline_mode = #tpu.pipeline_mode<synchronous>, transform_indices = @transform_3, window_bounds = array<i64: 32, 96>}, {pipeline_mode = #tpu.pipeline_mode<synchronous>, transform_indices = @transform_4, window_bounds = array<i64: 32, 32>}, {pipeline_mode = #tpu.pipeline_mode<synchronous>, transform_indices = @transform_5, window_bounds = array<i64: 1, 32>}, {pipeline_mode = #tpu.pipeline_mode<synchronous>, transform_indices = @transform_6, window_bounds = array<i64: 1, 32>}, {pipeline_mode = #tpu.pipeline_mode<synchronous>, transform_indices = @transform_7, window_bounds = array<i64: 1, 32>}, {pipeline_mode = #tpu.pipeline_mode<synchronous>, transform_indices = @transform_8, window_bounds = array<i64: 32, 128>}, {pipeline_mode = #tpu.pipeline_mode<synchronous>, transform_indices = @transform_9, window_bounds = array<i64: 1, 128>}, {pipeline_mode = #tpu.pipeline_mode<synchronous>, transform_indices = @transform_10, window_bounds = array<i64: 128, 32>}, {pipeline_mode = #tpu.pipeline_mode<synchronous>, transform_indices = @transform_11, window_bounds = array<i64: 1, 32>}, {transform_indices = @transform_12, window_bounds = array<i64: 1, 8, 8, 32>}]} {
    %c0 = arith.constant 0 : index
    %c0_0 = arith.constant 0 : index
    %c0_1 = arith.constant 0 : index
    %c0_2 = arith.constant 0 : index
    %0 = vector.load %arg1[%c0, %c0_0, %c0_1, %c0_2] : memref<1x8x8x32xf32, #tpu.memory_space<vmem>>, vector<1x8x8x32xf32>
    %1 = vector.shape_cast %0 : vector<1x8x8x32xf32> to vector<8x8x32xf32>
    %2 = vector.shape_cast %1 : vector<8x8x32xf32> to vector<64x32xf32>
    %c0_3 = arith.constant 0 : index
    %c0_4 = arith.constant 0 : index
    %3 = vector.load %arg2[%c0_3, %c0_4] : memref<1x32xf32, #tpu.memory_space<vmem>>, vector<1x32xf32>
    %c0_5 = arith.constant 0 : index
    %c0_6 = arith.constant 0 : index
    %4 = vector.load %arg3[%c0_5, %c0_6] : memref<1x32xf32, #tpu.memory_space<vmem>>, vector<1x32xf32>
    %cst = arith.constant dense<0.000000e+00> : vector<64xf32>
    %5 = vector.multi_reduction <add>, %2, %cst [1] : vector<64x32xf32> to vector<64xf32>
    %6 = vector.shape_cast %5 : vector<64xf32> to vector<64x1xf32>
    %cst_7 = arith.constant 3.200000e+01 : f32
    %7 = vector.broadcast %cst_7 : f32 to vector<64x1xf32>
    %8 = arith.divf %6, %7 : vector<64x1xf32>
    %9 = vector.broadcast %8 : vector<64x1xf32> to vector<64x32xf32>
    %10 = arith.subf %2, %9 : vector<64x32xf32>
    %11 = arith.mulf %10, %10 : vector<64x32xf32>
    %cst_8 = arith.constant dense<0.000000e+00> : vector<64xf32>
    %12 = vector.multi_reduction <add>, %11, %cst_8 [1] : vector<64x32xf32> to vector<64xf32>
    %13 = vector.shape_cast %12 : vector<64xf32> to vector<64x1xf32>
    %cst_9 = arith.constant 3.200000e+01 : f32
    %14 = vector.broadcast %cst_9 : f32 to vector<64x1xf32>
    %15 = arith.divf %13, %14 : vector<64x1xf32>
    %16 = vector.broadcast %8 : vector<64x1xf32> to vector<64x32xf32>
    %17 = arith.subf %2, %16 : vector<64x32xf32>
    %cst_10 = arith.constant 9.99999974E-6 : f32
    %18 = vector.broadcast %cst_10 : f32 to vector<64x1xf32>
    %19 = arith.addf %15, %18 : vector<64x1xf32>
    %20 = math.rsqrt %19 : vector<64x1xf32>
    %21 = vector.broadcast %20 : vector<64x1xf32> to vector<64x32xf32>
    %22 = arith.mulf %17, %21 : vector<64x32xf32>
    %23 = vector.broadcast %3 : vector<1x32xf32> to vector<64x32xf32>
    %24 = arith.mulf %22, %23 : vector<64x32xf32>
    %25 = vector.broadcast %4 : vector<1x32xf32> to vector<64x32xf32>
    %26 = arith.addf %24, %25 : vector<64x32xf32>
    %c0_11 = arith.constant 0 : index
    %c0_12 = arith.constant 0 : index
    %27 = vector.load %arg4[%c0_11, %c0_12] : memref<32x96xbf16, #tpu.memory_space<vmem>>, vector<32x96xbf16>
    %28 = arith.truncf %26 : vector<64x32xf32> to vector<64x32xbf16>
    %cst_13 = arith.constant dense<0.000000e+00> : vector<64x96xf32>
    %29 = tpu.matmul %28, %27, %cst_13 {dimension_numbers = #tpu.dot_dimension_numbers<[1], [0], [0], [1], [0, 0, 1, 1], [], []>} : vector<64x32xbf16>, vector<32x96xbf16>, vector<64x96xf32> -> vector<64x96xf32>
    %c0_14 = arith.constant 0 : index
    %c0_15 = arith.constant 0 : index
    %30 = vector.load %arg5[%c0_14, %c0_15] : memref<32x32xbf16, #tpu.memory_space<vmem>>, vector<32x32xbf16>
    %cst_16 = arith.constant 0.000000e+00 : f32
    %31 = vector.broadcast %cst_16 : f32 to vector<64x32xf32>
    %32 = vector.extract_strided_slice %29 {offsets = [0, 0], sizes = [64, 8], strides = [1, 1]} : vector<64x96xf32> to vector<64x8xf32>
    %cst_17 = arith.constant 0.353553385 : f32
    %33 = vector.broadcast %cst_17 : f32 to vector<64x8xf32>
    %34 = arith.mulf %32, %33 : vector<64x8xf32>
    %35 = vector.shape_cast %34 : vector<64x8xf32> to vector<8x8x8xf32>
    %36 = vector.extract_strided_slice %29 {offsets = [0, 32], sizes = [64, 8], strides = [1, 1]} : vector<64x96xf32> to vector<64x8xf32>
    %37 = vector.shape_cast %36 : vector<64x8xf32> to vector<8x8x8xf32>
    %38 = vector.extract_strided_slice %29 {offsets = [0, 64], sizes = [64, 8], strides = [1, 1]} : vector<64x96xf32> to vector<64x8xf32>
    %39 = vector.shape_cast %38 : vector<64x8xf32> to vector<8x8x8xf32>
    "tpu.trace_start"() <{level = 10 : i32, message = "hwd,hud->hwu"}> : () -> ()
    %cst_18 = arith.constant dense<0.000000e+00> : vector<8x8x8xf32>
    %40 = tpu.matmul %35, %37, %cst_18 {dimension_numbers = #tpu.dot_dimension_numbers<[2], [2], [1], [1], [0, 0, 0, 1, 1, 1], [0], [0]>} : vector<8x8x8xf32>, vector<8x8x8xf32>, vector<8x8x8xf32> -> vector<8x8x8xf32>
    "tpu.trace_stop"() : () -> ()
    %cst_19 = arith.constant dense<0xFF800000> : vector<8x8xf32>
    %41 = vector.multi_reduction <maximumf>, %40, %cst_19 [2] : vector<8x8x8xf32> to vector<8x8xf32>
    %42 = vector.shape_cast %41 : vector<8x8xf32> to vector<8x8x1xf32>
    %43 = vector.broadcast %42 : vector<8x8x1xf32> to vector<8x8x8xf32>
    %44 = arith.subf %40, %43 : vector<8x8x8xf32>
    %45 = math.exp %44 : vector<8x8x8xf32>
    %cst_20 = arith.constant dense<0.000000e+00> : vector<8x8xf32>
    %46 = vector.multi_reduction <add>, %45, %cst_20 [2] : vector<8x8x8xf32> to vector<8x8xf32>
    %47 = vector.shape_cast %46 : vector<8x8xf32> to vector<8x8x1xf32>
    %48 = tpu.reciprocal %47 {approx = true} : vector<8x8x1xf32> -> vector<8x8x1xf32>
    %49 = vector.broadcast %48 : vector<8x8x1xf32> to vector<8x8x8xf32>
    %50 = arith.mulf %45, %49 : vector<8x8x8xf32>
    "tpu.trace_start"() <{level = 10 : i32, message = "hwu,hud->hwd"}> : () -> ()
    %cst_21 = arith.constant dense<0.000000e+00> : vector<8x8x8xf32>
    %51 = tpu.matmul %50, %39, %cst_21 {dimension_numbers = #tpu.dot_dimension_numbers<[2], [1], [1], [2], [0, 0, 0, 1, 1, 2], [0], [0]>} : vector<8x8x8xf32>, vector<8x8x8xf32>, vector<8x8x8xf32> -> vector<8x8x8xf32>
    "tpu.trace_stop"() : () -> ()
    %52 = vector.shape_cast %51 : vector<8x8x8xf32> to vector<64x8xf32>
    %53 = arith.truncf %52 : vector<64x8xf32> to vector<64x8xbf16>
    %54 = vector.extract_strided_slice %30 {offsets = [0, 0], sizes = [8, 32], strides = [1, 1]} : vector<32x32xbf16> to vector<8x32xbf16>
    %cst_22 = arith.constant dense<0.000000e+00> : vector<64x32xf32>
    %55 = tpu.matmul %53, %54, %cst_22 {dimension_numbers = #tpu.dot_dimension_numbers<[1], [0], [0], [1], [0, 0, 1, 1], [], []>} : vector<64x8xbf16>, vector<8x32xbf16>, vector<64x32xf32> -> vector<64x32xf32>
    %56 = arith.addf %31, %55 : vector<64x32xf32>
    %57 = vector.extract_strided_slice %29 {offsets = [0, 8], sizes = [64, 8], strides = [1, 1]} : vector<64x96xf32> to vector<64x8xf32>
    %cst_23 = arith.constant 0.353553385 : f32
    %58 = vector.broadcast %cst_23 : f32 to vector<64x8xf32>
    %59 = arith.mulf %57, %58 : vector<64x8xf32>
    %60 = vector.shape_cast %59 : vector<64x8xf32> to vector<8x8x8xf32>
    %61 = vector.extract_strided_slice %29 {offsets = [0, 40], sizes = [64, 8], strides = [1, 1]} : vector<64x96xf32> to vector<64x8xf32>
    %62 = vector.shape_cast %61 : vector<64x8xf32> to vector<8x8x8xf32>
    %63 = vector.extract_strided_slice %29 {offsets = [0, 72], sizes = [64, 8], strides = [1, 1]} : vector<64x96xf32> to vector<64x8xf32>
    %64 = vector.shape_cast %63 : vector<64x8xf32> to vector<8x8x8xf32>
    "tpu.trace_start"() <{level = 10 : i32, message = "hwd,hud->hwu"}> : () -> ()
    %cst_24 = arith.constant dense<0.000000e+00> : vector<8x8x8xf32>
    %65 = tpu.matmul %60, %62, %cst_24 {dimension_numbers = #tpu.dot_dimension_numbers<[2], [2], [1], [1], [0, 0, 0, 1, 1, 1], [0], [0]>} : vector<8x8x8xf32>, vector<8x8x8xf32>, vector<8x8x8xf32> -> vector<8x8x8xf32>
    "tpu.trace_stop"() : () -> ()
    %cst_25 = arith.constant dense<0xFF800000> : vector<8x8xf32>
    %66 = vector.multi_reduction <maximumf>, %65, %cst_25 [2] : vector<8x8x8xf32> to vector<8x8xf32>
    %67 = vector.shape_cast %66 : vector<8x8xf32> to vector<8x8x1xf32>
    %68 = vector.broadcast %67 : vector<8x8x1xf32> to vector<8x8x8xf32>
    %69 = arith.subf %65, %68 : vector<8x8x8xf32>
    %70 = math.exp %69 : vector<8x8x8xf32>
    %cst_26 = arith.constant dense<0.000000e+00> : vector<8x8xf32>
    %71 = vector.multi_reduction <add>, %70, %cst_26 [2] : vector<8x8x8xf32> to vector<8x8xf32>
    %72 = vector.shape_cast %71 : vector<8x8xf32> to vector<8x8x1xf32>
    %73 = tpu.reciprocal %72 {approx = true} : vector<8x8x1xf32> -> vector<8x8x1xf32>
    %74 = vector.broadcast %73 : vector<8x8x1xf32> to vector<8x8x8xf32>
    %75 = arith.mulf %70, %74 : vector<8x8x8xf32>
    "tpu.trace_start"() <{level = 10 : i32, message = "hwu,hud->hwd"}> : () -> ()
    %cst_27 = arith.constant dense<0.000000e+00> : vector<8x8x8xf32>
    %76 = tpu.matmul %75, %64, %cst_27 {dimension_numbers = #tpu.dot_dimension_numbers<[2], [1], [1], [2], [0, 0, 0, 1, 1, 2], [0], [0]>} : vector<8x8x8xf32>, vector<8x8x8xf32>, vector<8x8x8xf32> -> vector<8x8x8xf32>
    "tpu.trace_stop"() : () -> ()
    %77 = vector.shape_cast %76 : vector<8x8x8xf32> to vector<64x8xf32>
    %78 = arith.truncf %77 : vector<64x8xf32> to vector<64x8xbf16>
    %79 = vector.extract_strided_slice %30 {offsets = [8, 0], sizes = [8, 32], strides = [1, 1]} : vector<32x32xbf16> to vector<8x32xbf16>
    %cst_28 = arith.constant dense<0.000000e+00> : vector<64x32xf32>
    %80 = tpu.matmul %78, %79, %cst_28 {dimension_numbers = #tpu.dot_dimension_numbers<[1], [0], [0], [1], [0, 0, 1, 1], [], []>} : vector<64x8xbf16>, vector<8x32xbf16>, vector<64x32xf32> -> vector<64x32xf32>
    %81 = arith.addf %56, %80 : vector<64x32xf32>
    %82 = vector.extract_strided_slice %29 {offsets = [0, 16], sizes = [64, 8], strides = [1, 1]} : vector<64x96xf32> to vector<64x8xf32>
    %cst_29 = arith.constant 0.353553385 : f32
    %83 = vector.broadcast %cst_29 : f32 to vector<64x8xf32>
    %84 = arith.mulf %82, %83 : vector<64x8xf32>
    %85 = vector.shape_cast %84 : vector<64x8xf32> to vector<8x8x8xf32>
    %86 = vector.extract_strided_slice %29 {offsets = [0, 48], sizes = [64, 8], strides = [1, 1]} : vector<64x96xf32> to vector<64x8xf32>
    %87 = vector.shape_cast %86 : vector<64x8xf32> to vector<8x8x8xf32>
    %88 = vector.extract_strided_slice %29 {offsets = [0, 80], sizes = [64, 8], strides = [1, 1]} : vector<64x96xf32> to vector<64x8xf32>
    %89 = vector.shape_cast %88 : vector<64x8xf32> to vector<8x8x8xf32>
    "tpu.trace_start"() <{level = 10 : i32, message = "hwd,hud->hwu"}> : () -> ()
    %cst_30 = arith.constant dense<0.000000e+00> : vector<8x8x8xf32>
    %90 = tpu.matmul %85, %87, %cst_30 {dimension_numbers = #tpu.dot_dimension_numbers<[2], [2], [1], [1], [0, 0, 0, 1, 1, 1], [0], [0]>} : vector<8x8x8xf32>, vector<8x8x8xf32>, vector<8x8x8xf32> -> vector<8x8x8xf32>
    "tpu.trace_stop"() : () -> ()
    %cst_31 = arith.constant dense<0xFF800000> : vector<8x8xf32>
    %91 = vector.multi_reduction <maximumf>, %90, %cst_31 [2] : vector<8x8x8xf32> to vector<8x8xf32>
    %92 = vector.shape_cast %91 : vector<8x8xf32> to vector<8x8x1xf32>
    %93 = vector.broadcast %92 : vector<8x8x1xf32> to vector<8x8x8xf32>
    %94 = arith.subf %90, %93 : vector<8x8x8xf32>
    %95 = math.exp %94 : vector<8x8x8xf32>
    %cst_32 = arith.constant dense<0.000000e+00> : vector<8x8xf32>
    %96 = vector.multi_reduction <add>, %95, %cst_32 [2] : vector<8x8x8xf32> to vector<8x8xf32>
    %97 = vector.shape_cast %96 : vector<8x8xf32> to vector<8x8x1xf32>
    %98 = tpu.reciprocal %97 {approx = true} : vector<8x8x1xf32> -> vector<8x8x1xf32>
    %99 = vector.broadcast %98 : vector<8x8x1xf32> to vector<8x8x8xf32>
    %100 = arith.mulf %95, %99 : vector<8x8x8xf32>
    "tpu.trace_start"() <{level = 10 : i32, message = "hwu,hud->hwd"}> : () -> ()
    %cst_33 = arith.constant dense<0.000000e+00> : vector<8x8x8xf32>
    %101 = tpu.matmul %100, %89, %cst_33 {dimension_numbers = #tpu.dot_dimension_numbers<[2], [1], [1], [2], [0, 0, 0, 1, 1, 2], [0], [0]>} : vector<8x8x8xf32>, vector<8x8x8xf32>, vector<8x8x8xf32> -> vector<8x8x8xf32>
    "tpu.trace_stop"() : () -> ()
    %102 = vector.shape_cast %101 : vector<8x8x8xf32> to vector<64x8xf32>
    %103 = arith.truncf %102 : vector<64x8xf32> to vector<64x8xbf16>
    %104 = vector.extract_strided_slice %30 {offsets = [16, 0], sizes = [8, 32], strides = [1, 1]} : vector<32x32xbf16> to vector<8x32xbf16>
    %cst_34 = arith.constant dense<0.000000e+00> : vector<64x32xf32>
    %105 = tpu.matmul %103, %104, %cst_34 {dimension_numbers = #tpu.dot_dimension_numbers<[1], [0], [0], [1], [0, 0, 1, 1], [], []>} : vector<64x8xbf16>, vector<8x32xbf16>, vector<64x32xf32> -> vector<64x32xf32>
    %106 = arith.addf %81, %105 : vector<64x32xf32>
    %107 = vector.extract_strided_slice %29 {offsets = [0, 24], sizes = [64, 8], strides = [1, 1]} : vector<64x96xf32> to vector<64x8xf32>
    %cst_35 = arith.constant 0.353553385 : f32
    %108 = vector.broadcast %cst_35 : f32 to vector<64x8xf32>
    %109 = arith.mulf %107, %108 : vector<64x8xf32>
    %110 = vector.shape_cast %109 : vector<64x8xf32> to vector<8x8x8xf32>
    %111 = vector.extract_strided_slice %29 {offsets = [0, 56], sizes = [64, 8], strides = [1, 1]} : vector<64x96xf32> to vector<64x8xf32>
    %112 = vector.shape_cast %111 : vector<64x8xf32> to vector<8x8x8xf32>
    %113 = vector.extract_strided_slice %29 {offsets = [0, 88], sizes = [64, 8], strides = [1, 1]} : vector<64x96xf32> to vector<64x8xf32>
    %114 = vector.shape_cast %113 : vector<64x8xf32> to vector<8x8x8xf32>
    "tpu.trace_start"() <{level = 10 : i32, message = "hwd,hud->hwu"}> : () -> ()
    %cst_36 = arith.constant dense<0.000000e+00> : vector<8x8x8xf32>
    %115 = tpu.matmul %110, %112, %cst_36 {dimension_numbers = #tpu.dot_dimension_numbers<[2], [2], [1], [1], [0, 0, 0, 1, 1, 1], [0], [0]>} : vector<8x8x8xf32>, vector<8x8x8xf32>, vector<8x8x8xf32> -> vector<8x8x8xf32>
    "tpu.trace_stop"() : () -> ()
    %cst_37 = arith.constant dense<0xFF800000> : vector<8x8xf32>
    %116 = vector.multi_reduction <maximumf>, %115, %cst_37 [2] : vector<8x8x8xf32> to vector<8x8xf32>
    %117 = vector.shape_cast %116 : vector<8x8xf32> to vector<8x8x1xf32>
    %118 = vector.broadcast %117 : vector<8x8x1xf32> to vector<8x8x8xf32>
    %119 = arith.subf %115, %118 : vector<8x8x8xf32>
    %120 = math.exp %119 : vector<8x8x8xf32>
    %cst_38 = arith.constant dense<0.000000e+00> : vector<8x8xf32>
    %121 = vector.multi_reduction <add>, %120, %cst_38 [2] : vector<8x8x8xf32> to vector<8x8xf32>
    %122 = vector.shape_cast %121 : vector<8x8xf32> to vector<8x8x1xf32>
    %123 = tpu.reciprocal %122 {approx = true} : vector<8x8x1xf32> -> vector<8x8x1xf32>
    %124 = vector.broadcast %123 : vector<8x8x1xf32> to vector<8x8x8xf32>
    %125 = arith.mulf %120, %124 : vector<8x8x8xf32>
    "tpu.trace_start"() <{level = 10 : i32, message = "hwu,hud->hwd"}> : () -> ()
    %cst_39 = arith.constant dense<0.000000e+00> : vector<8x8x8xf32>
    %126 = tpu.matmul %125, %114, %cst_39 {dimension_numbers = #tpu.dot_dimension_numbers<[2], [1], [1], [2], [0, 0, 0, 1, 1, 2], [0], [0]>} : vector<8x8x8xf32>, vector<8x8x8xf32>, vector<8x8x8xf32> -> vector<8x8x8xf32>
    "tpu.trace_stop"() : () -> ()
    %127 = vector.shape_cast %126 : vector<8x8x8xf32> to vector<64x8xf32>
    %128 = arith.truncf %127 : vector<64x8xf32> to vector<64x8xbf16>
    %129 = vector.extract_strided_slice %30 {offsets = [24, 0], sizes = [8, 32], strides = [1, 1]} : vector<32x32xbf16> to vector<8x32xbf16>
    %cst_40 = arith.constant dense<0.000000e+00> : vector<64x32xf32>
    %130 = tpu.matmul %128, %129, %cst_40 {dimension_numbers = #tpu.dot_dimension_numbers<[1], [0], [0], [1], [0, 0, 1, 1], [], []>} : vector<64x8xbf16>, vector<8x32xbf16>, vector<64x32xf32> -> vector<64x32xf32>
    %131 = arith.addf %106, %130 : vector<64x32xf32>
    %c0_41 = arith.constant 0 : index
    %c0_42 = arith.constant 0 : index
    %132 = vector.load %arg6[%c0_41, %c0_42] : memref<1x32xf32, #tpu.memory_space<vmem>>, vector<1x32xf32>
    %133 = vector.broadcast %132 : vector<1x32xf32> to vector<64x32xf32>
    %134 = arith.addf %131, %133 : vector<64x32xf32>
    %135 = arith.addf %2, %134 : vector<64x32xf32>
    %c0_43 = arith.constant 0 : index
    %c0_44 = arith.constant 0 : index
    %136 = vector.load %arg7[%c0_43, %c0_44] : memref<1x32xf32, #tpu.memory_space<vmem>>, vector<1x32xf32>
    %c0_45 = arith.constant 0 : index
    %c0_46 = arith.constant 0 : index
    %137 = vector.load %arg8[%c0_45, %c0_46] : memref<1x32xf32, #tpu.memory_space<vmem>>, vector<1x32xf32>
    %cst_47 = arith.constant dense<0.000000e+00> : vector<64xf32>
    %138 = vector.multi_reduction <add>, %135, %cst_47 [1] : vector<64x32xf32> to vector<64xf32>
    %139 = vector.shape_cast %138 : vector<64xf32> to vector<64x1xf32>
    %cst_48 = arith.constant 3.200000e+01 : f32
    %140 = vector.broadcast %cst_48 : f32 to vector<64x1xf32>
    %141 = arith.divf %139, %140 : vector<64x1xf32>
    %142 = vector.broadcast %141 : vector<64x1xf32> to vector<64x32xf32>
    %143 = arith.subf %135, %142 : vector<64x32xf32>
    %144 = arith.mulf %143, %143 : vector<64x32xf32>
    %cst_49 = arith.constant dense<0.000000e+00> : vector<64xf32>
    %145 = vector.multi_reduction <add>, %144, %cst_49 [1] : vector<64x32xf32> to vector<64xf32>
    %146 = vector.shape_cast %145 : vector<64xf32> to vector<64x1xf32>
    %cst_50 = arith.constant 3.200000e+01 : f32
    %147 = vector.broadcast %cst_50 : f32 to vector<64x1xf32>
    %148 = arith.divf %146, %147 : vector<64x1xf32>
    %149 = vector.broadcast %141 : vector<64x1xf32> to vector<64x32xf32>
    %150 = arith.subf %135, %149 : vector<64x32xf32>
    %cst_51 = arith.constant 9.99999974E-6 : f32
    %151 = vector.broadcast %cst_51 : f32 to vector<64x1xf32>
    %152 = arith.addf %148, %151 : vector<64x1xf32>
    %153 = math.rsqrt %152 : vector<64x1xf32>
    %154 = vector.broadcast %153 : vector<64x1xf32> to vector<64x32xf32>
    %155 = arith.mulf %150, %154 : vector<64x32xf32>
    %156 = vector.broadcast %136 : vector<1x32xf32> to vector<64x32xf32>
    %157 = arith.mulf %155, %156 : vector<64x32xf32>
    %158 = vector.broadcast %137 : vector<1x32xf32> to vector<64x32xf32>
    %159 = arith.addf %157, %158 : vector<64x32xf32>
    %c0_52 = arith.constant 0 : index
    %c0_53 = arith.constant 0 : index
    %160 = vector.load %arg9[%c0_52, %c0_53] : memref<32x128xbf16, #tpu.memory_space<vmem>>, vector<32x128xbf16>
    %161 = arith.truncf %159 : vector<64x32xf32> to vector<64x32xbf16>
    %cst_54 = arith.constant dense<0.000000e+00> : vector<64x128xf32>
    %162 = tpu.matmul %161, %160, %cst_54 {dimension_numbers = #tpu.dot_dimension_numbers<[1], [0], [0], [1], [0, 0, 1, 1], [], []>} : vector<64x32xbf16>, vector<32x128xbf16>, vector<64x128xf32> -> vector<64x128xf32>
    %c0_55 = arith.constant 0 : index
    %c0_56 = arith.constant 0 : index
    %163 = vector.load %arg10[%c0_55, %c0_56] : memref<1x128xf32, #tpu.memory_space<vmem>>, vector<1x128xf32>
    %164 = vector.broadcast %163 : vector<1x128xf32> to vector<64x128xf32>
    %165 = arith.addf %162, %164 : vector<64x128xf32>
    %cst_57 = arith.constant 5.000000e-01 : f32
    %166 = vector.broadcast %cst_57 : f32 to vector<64x128xf32>
    %167 = arith.mulf %166, %165 : vector<64x128xf32>
    %cst_58 = arith.constant 0.707106769 : f32
    %168 = vector.broadcast %cst_58 : f32 to vector<64x128xf32>
    %169 = arith.mulf %165, %168 : vector<64x128xf32>
    %cst_59 = arith.constant 0.000000e+00 : f32
    %170 = vector.broadcast %cst_59 : f32 to vector<64x128xf32>
    %171 = arith.cmpf oge, %169, %170 : vector<64x128xf32>
    %cst_60 = arith.constant 1.000000e+00 : f32
    %cst_61 = arith.constant -1.000000e+00 : f32
    %172 = vector.broadcast %cst_60 : f32 to vector<64x128xf32>
    %173 = vector.broadcast %cst_61 : f32 to vector<64x128xf32>
    %174 = arith.select %171, %172, %173 : vector<64x128xi1>, vector<64x128xf32>
    %175 = math.absf %169 : vector<64x128xf32>
    %cst_62 = arith.constant 0.327591091 : f32
    %176 = vector.broadcast %cst_62 : f32 to vector<64x128xf32>
    %177 = arith.mulf %176, %175 : vector<64x128xf32>
    %cst_63 = arith.constant 1.000000e+00 : f32
    %178 = vector.broadcast %cst_63 : f32 to vector<64x128xf32>
    %179 = arith.addf %178, %177 : vector<64x128xf32>
    %180 = tpu.reciprocal %179 {approx = true} : vector<64x128xf32> -> vector<64x128xf32>
    %cst_64 = arith.constant 1.06140542 : f32
    %181 = vector.broadcast %cst_64 : f32 to vector<64x128xf32>
    %182 = arith.mulf %181, %180 : vector<64x128xf32>
    %cst_65 = arith.constant -1.45315206 : f32
    %183 = vector.broadcast %cst_65 : f32 to vector<64x128xf32>
    %184 = arith.addf %182, %183 : vector<64x128xf32>
    %185 = arith.mulf %184, %180 : vector<64x128xf32>
    %cst_66 = arith.constant 1.42141378 : f32
    %186 = vector.broadcast %cst_66 : f32 to vector<64x128xf32>
    %187 = arith.addf %185, %186 : vector<64x128xf32>
    %188 = arith.mulf %187, %180 : vector<64x128xf32>
    %cst_67 = arith.constant -0.284496725 : f32
    %189 = vector.broadcast %cst_67 : f32 to vector<64x128xf32>
    %190 = arith.addf %188, %189 : vector<64x128xf32>
    %191 = arith.mulf %190, %180 : vector<64x128xf32>
    %cst_68 = arith.constant 0.254829586 : f32
    %192 = vector.broadcast %cst_68 : f32 to vector<64x128xf32>
    %193 = arith.addf %191, %192 : vector<64x128xf32>
    %194 = arith.mulf %193, %180 : vector<64x128xf32>
    %cst_69 = arith.constant 0.000000e+00 : f32
    %195 = vector.broadcast %cst_69 : f32 to vector<64x128xf32>
    %196 = arith.subf %195, %175 : vector<64x128xf32>
    %197 = arith.mulf %196, %175 : vector<64x128xf32>
    %198 = math.exp %197 : vector<64x128xf32>
    %199 = arith.mulf %194, %198 : vector<64x128xf32>
    %cst_70 = arith.constant 1.000000e+00 : f32
    %200 = vector.broadcast %cst_70 : f32 to vector<64x128xf32>
    %201 = arith.subf %200, %199 : vector<64x128xf32>
    %202 = arith.mulf %174, %201 : vector<64x128xf32>
    %cst_71 = arith.constant 1.000000e+00 : f32
    %203 = vector.broadcast %cst_71 : f32 to vector<64x128xf32>
    %204 = arith.addf %203, %202 : vector<64x128xf32>
    %205 = arith.mulf %167, %204 : vector<64x128xf32>
    %c0_72 = arith.constant 0 : index
    %c0_73 = arith.constant 0 : index
    %206 = vector.load %arg11[%c0_72, %c0_73] : memref<128x32xbf16, #tpu.memory_space<vmem>>, vector<128x32xbf16>
    %207 = arith.truncf %205 : vector<64x128xf32> to vector<64x128xbf16>
    %cst_74 = arith.constant dense<0.000000e+00> : vector<64x32xf32>
    %208 = tpu.matmul %207, %206, %cst_74 {dimension_numbers = #tpu.dot_dimension_numbers<[1], [0], [0], [1], [0, 0, 1, 1], [], []>} : vector<64x128xbf16>, vector<128x32xbf16>, vector<64x32xf32> -> vector<64x32xf32>
    %c0_75 = arith.constant 0 : index
    %c0_76 = arith.constant 0 : index
    %209 = vector.load %arg12[%c0_75, %c0_76] : memref<1x32xf32, #tpu.memory_space<vmem>>, vector<1x32xf32>
    %210 = vector.broadcast %209 : vector<1x32xf32> to vector<64x32xf32>
    %211 = arith.addf %208, %210 : vector<64x32xf32>
    %212 = arith.addf %135, %211 : vector<64x32xf32>
    %213 = vector.shape_cast %212 : vector<64x32xf32> to vector<8x8x32xf32>
    %c0_77 = arith.constant 0 : index
    %c0_78 = arith.constant 0 : index
    %c0_79 = arith.constant 0 : index
    %c0_80 = arith.constant 0 : index
    %214 = vector.load %arg13[%c0_77, %c0_78, %c0_79, %c0_80] : memref<1x8x8x32xf32, #tpu.memory_space<vmem>>, vector<1x8x8x32xf32>
    %215 = vector.shape_cast %214 : vector<1x8x8x32xf32> to vector<8x8x32xf32>
    %216 = vector.shape_cast %213 : vector<8x8x32xf32> to vector<1x8x8x32xf32>
    tpu.vector_store %arg13[%c0_77, %c0_78, %c0_79, %c0_80], %216 {strides = array<i32>} : memref<1x8x8x32xf32, #tpu.memory_space<vmem>>, vector<1x8x8x32xf32>,
    return
  }
  func.func @transform_0(%arg0: i32) -> (i32, i32, i32, i32) {
    %c0_i32 = arith.constant 0 : i32
    %c0_i32_0 = arith.constant 0 : i32
    %c0_i32_1 = arith.constant 0 : i32
    %c0_i32_2 = arith.constant 0 : i32
    return %arg0, %c0_i32, %c0_i32_0, %c0_i32_1 : i32, i32, i32, i32
  }
  func.func @transform_1(%arg0: i32) -> (i32, i32) {
    %c0_i32 = arith.constant 0 : i32
    %c0_i32_0 = arith.constant 0 : i32
    %c0_i32_1 = arith.constant 0 : i32
    return %c0_i32, %c0_i32_0 : i32, i32
  }
  func.func @transform_2(%arg0: i32) -> (i32, i32) {
    %c0_i32 = arith.constant 0 : i32
    %c0_i32_0 = arith.constant 0 : i32
    %c0_i32_1 = arith.constant 0 : i32
    return %c0_i32, %c0_i32_0 : i32, i32
  }
  func.func @transform_3(%arg0: i32) -> (i32, i32) {
    %c0_i32 = arith.constant 0 : i32
    %c0_i32_0 = arith.constant 0 : i32
    %c0_i32_1 = arith.constant 0 : i32
    return %c0_i32, %c0_i32_0 : i32, i32
  }
  func.func @transform_4(%arg0: i32) -> (i32, i32) {
    %c0_i32 = arith.constant 0 : i32
    %c0_i32_0 = arith.constant 0 : i32
    %c0_i32_1 = arith.constant 0 : i32
    return %c0_i32, %c0_i32_0 : i32, i32
  }
  func.func @transform_5(%arg0: i32) -> (i32, i32) {
    %c0_i32 = arith.constant 0 : i32
    %c0_i32_0 = arith.constant 0 : i32
    %c0_i32_1 = arith.constant 0 : i32
    return %c0_i32, %c0_i32_0 : i32, i32
  }
  func.func @transform_6(%arg0: i32) -> (i32, i32) {
    %c0_i32 = arith.constant 0 : i32
    %c0_i32_0 = arith.constant 0 : i32
    %c0_i32_1 = arith.constant 0 : i32
    return %c0_i32, %c0_i32_0 : i32, i32
  }
  func.func @transform_7(%arg0: i32) -> (i32, i32) {
    %c0_i32 = arith.constant 0 : i32
    %c0_i32_0 = arith.constant 0 : i32
    %c0_i32_1 = arith.constant 0 : i32
    return %c0_i32, %c0_i32_0 : i32, i32
  }
  func.func @transform_8(%arg0: i32) -> (i32, i32) {
    %c0_i32 = arith.constant 0 : i32
    %c0_i32_0 = arith.constant 0 : i32
    %c0_i32_1 = arith.constant 0 : i32
    return %c0_i32, %c0_i32_0 : i32, i32
  }
  func.func @transform_9(%arg0: i32) -> (i32, i32) {
    %c0_i32 = arith.constant 0 : i32
    %c0_i32_0 = arith.constant 0 : i32
    %c0_i32_1 = arith.constant 0 : i32
    return %c0_i32, %c0_i32_0 : i32, i32
  }
  func.func @transform_10(%arg0: i32) -> (i32, i32) {
    %c0_i32 = arith.constant 0 : i32
    %c0_i32_0 = arith.constant 0 : i32
    %c0_i32_1 = arith.constant 0 : i32
    return %c0_i32, %c0_i32_0 : i32, i32
  }
  func.func @transform_11(%arg0: i32) -> (i32, i32) {
    %c0_i32 = arith.constant 0 : i32
    %c0_i32_0 = arith.constant 0 : i32
    %c0_i32_1 = arith.constant 0 : i32
    return %c0_i32, %c0_i32_0 : i32, i32
  }
  func.func @transform_12(%arg0: i32) -> (i32, i32, i32, i32) {
    %c0_i32 = arith.constant 0 : i32
    %c0_i32_0 = arith.constant 0 : i32
    %c0_i32_1 = arith.constant 0 : i32
    %c0_i32_2 = arith.constant 0 : i32
    return %arg0, %c0_i32, %c0_i32_0, %c0_i32_1 : i32, i32, i32, i32
  }
}

</mosaic_0001>

<bundles_post_ra>
// kernel: tpu_custom_call.1
= control target key start
LH: loop header
LB: loop body
LE: loop exit
PB: predicated region body
PF: predicated region fallthrough
CT: control target
= control target key end

     0   :  { %17 = vsyncpa [#allocation3], 0  ;;  %s9529_s0 = inlined_call_operand.hbm [shape: f32[2,8,8,32], index: 0, kind: input, shape index: {}]   ;;  %s9530_s1 = inlined_call_operand.vmem [shape: f32[1,32], index: 1, kind: input, shape index: {}]   ;;  %s9531_s2 = inlined_call_operand.vmem [shape: f32[1,32], index: 2, kind: input, shape index: {}]   ;;  %s9532_s3 = inlined_call_operand.vmem [shape: bf16[32,96], index: 3, kind: input, shape index: {}]   ;;  %s9533_s4 = inlined_call_operand.vmem [shape: bf16[32,32], index: 4, kind: input, shape index: {}]   ;;  %s9534_s5 = inlined_call_operand.vmem [shape: f32[1,32], index: 5, kind: input, shape index: {}]   ;;  %s9535_s6 = inlined_call_operand.vmem [shape: f32[1,32], index: 6, kind: input, shape index: {}]   ;;  %s9536_s7 = inlined_call_operand.vmem [shape: f32[1,32], index: 7, kind: input, shape index: {}]   ;;  %s9537_s8 = inlined_call_operand.vmem [shape: bf16[32,128], index: 8, kind: input, shape index: {}]   ;;  %s9538_s9 = inlined_call_operand.vmem [shape: f32[1,128], index: 9, kind: input, shape index: {}]   ;;  %s9539_s10 = inlined_call_operand.vmem [shape: bf16[128,32], index: 10, kind: input, shape index: {}]   ;;  %s9540_s11 = inlined_call_operand.vmem [shape: f32[1,32], index: 11, kind: input, shape index: {}]   ;;  %s9541_s12 = inlined_call_operand.hbm [shape: f32[2,8,8,32], index: 12, kind: output, shape index: {}]  }
   0x1   :  { %19 = vsyncpa [#allocation3 + $0x1], 0 }
   0x2   :  { %20 = vsyncpa [#allocation4], 0 }
   0x3   :  { %22 = vsyncpa [#allocation4 + $0x1], 0  ;;  %s8254_s21 = smov 0   ;;  %s8256_s22 = smov 0  }
   0x4   :  { %s8258_s23 = smov 0   ;;  %s8260_s24 = smov 0  }
   0x5 LB: > { %9546 = sst [smem:[#allocation8_spill]] %s8163_s23  ;;  %s8275_s25 = sadd.s32 4294967295, %s8167_s24   ;;  %s8167_s24 = sphi %s8260_s24, %s9557_s24   ;;  %s8163_s23 = sphi %s8258_s23, %s9562_s23   ;;  %s8159_s22 = sphi %s8256_s22, %s9561_s22   ;;  %s8155_s21 = sphi %s8254_s21, %s9560_s21  }
   0x6   : > { %s7032_s26 = sadd.s32 4294967294, %s8167_s24   ;;  %s8279_s27 = sadd.s32 1, %s8167_s24  }
   0x7   : > { %9547 = sst [smem:[#allocation9_spill]] %s8279_s27  ;;  %s35_s28 = sadd.s32 1, %s8163_s23 }
   0x8   : > { %s32_s29 = ssub.s32 %s8167_s24, %s8279_s27  ;;  %p42_p0 = scmp.ne.s32.totalorder %s8163_s23, %s8159_s22 }
   0x9   : > { %p33_p1 = scmp.eq.s32.totalorder %s32_s29, 0  ;;  %p43_p2 = scmp.eq.s32.totalorder %s8167_s24, 0 }
   0xa   : > { %p48_p3 = scmp.ne.s32.totalorder %s8159_s22, %s8155_s21  ;;  %p49_p4 = scmp.eq.s32.totalorder %s8275_s25, 0 }
   0xb   : > { %s8291_s30 = scalar_select %p33_p1, %s8163_s23, %s35_s28  }
   0xc   : > { %p8293_p5 = por %p43_p2, %p42_p0  ;;  %p8297_p6 = por %p49_p4, %p48_p3 }
   0xd   : > { %9548 = sst [smem:[#allocation10_spill]] %s8291_s30  ;;  %p303_p7 = scmp.eq.s32.totalorder %s8275_s25, 1 }
   0xe   : > { %p309_p8 = scmp.eq.s32.totalorder %s7032_s26, 1  ;;  %p7807_p10 = scmp.lt.s32.totalorder %s8167_s24, 2 }
   0xf   : > { %p8304_p11 = por %p303_p7, %p42_p0  ;;  %s362_s17 = sand.u32 1, %s8163_s23  }
  0x10   : > { %p8308_p12 = por %p309_p8, %p48_p3  ;;  %s7185_s18 = sshll.u32 %s8167_s24, 10 }
  0x11   : > { %s9551_s15 = scalar_select %p8304_p11, 1, 0 }
  0x12   : > { %s9552_s16 = scalar_select %p8308_p12, 1, 0 }
  0x13   : > { %s7035_s19 = sshll.u32 %s362_s17, 6  ;;  %s8317_s29 = scalar_lea.hbm %s9529_s0, %s7185_s18 }
  0x14   : > { %s366_s26 = scalar_lea.vmem [#allocation2], %s7035_s19  ;;  %p8321_p13 = pnand %p7807_p10, %p8293_p5 }
  0x15   : > { %s373_s30 = sshll.u32 %s366_s26, 4  ;;  %s8327_s23 = scalar_lea.sflag [#allocation3], %s362_s17  ;;  %s8325_s30 = int_to_ptr.vmem [resolvable:$true] %s373_s30 }
  0x16   : > { %s8071_s20 = scalar_lea.hbm %s8317_s29, 1024  ;;  %p8073_p1 = pneg %p8321_p13 }
  0x17   : > { %p8072_p0 = scmp.ne.s32.totalorder %s8317_s29, %s8071_s20  ;;  %s8076_s19 = scalar_lea.hbm %s9529_s0, 2048 }
  0x18   : > { %p8077_p4 = scmp.lt.u32.totalorder %s8317_s29, %s9529_s0  ;;  %p8078_p5 = scmp.lt.u32.totalorder %s8076_s19, %s8071_s20 }
  0x19   : > { %p8074_p2 = pnand %p8073_p1, %p8072_p0  ;;  %p8080_p8 = scmp.lt.u32.totalorder %s8071_s20, %s8317_s29 }
  0x1a   : > { %p8079_p7 = por %p8078_p5, %p8077_p4 }
  0x1b   : > { %p8075_p3 = pneg %p8074_p2 }
  0x1c   : > { %p8081_p10 = por %p8080_p8, %p8079_p7 }
  0x1e   : > { %p8082_p9 = pnand %p8081_p10, %p8075_p3 }
  0x20   : > { %8085 = shalt.err (!%p8082_p9)
}
  0x21   : > { %s8086_s17 = scalar_lea.vmem %s8325_s30, 1024  ;;  %s8169_s18 = smov [#allocation2]  }
  0x22   : > { %p8087_p0 = scmp.ne.s32.totalorder %s8325_s30, %s8086_s17  ;;  %s8091_s13 = sshll.u32 %s8169_s18, 4  ;;  %s8092_s13 = int_to_ptr.vmem [resolvable:$false] %s8091_s13 }
  0x23   : > { %s8093_s28 = scalar_lea.vmem %s8092_s13, 2048  ;;  %p8094_p11 = scmp.lt.s32.totalorder %s8325_s30, %s8092_s13 }
  0x24   : > { %p8089_p2 = pnand %p8087_p0, %p8073_p1  ;;  %p8095_p4 = scmp.lt.s32.totalorder %s8093_s28, %s8086_s17 }
  0x26   : > { %p8090_p12 = pneg %p8089_p2  ;;  %p8096_p5 = por %p8095_p4, %p8094_p11 }
  0x28   : > { %p8097_p7 = pnand %p8096_p5, %p8090_p12 }
  0x2a   : > { %8100 = shalt.err (!%p8097_p7)
}
  0x2b   : > { %s8170_s20 = smov 128   ;;  %s8171_s19 = smov 8  }
  0x2c   : > { %7802 = dma.hbm_to_vmem [thread:$0]  (!%p8321_p13), %s8317_s29, 1024, %s8325_s30, %s8327_s23, %s8170_s20, %s8170_s20, %s8171_s19  }
  0x2d   : > { %p7038_p9 = scmp.ge.s32.totalorder %s8167_s24, 1  ;;  %p381_p1 = scmp.lt.s32.totalorder %s8167_s24, 3 }
  0x2f   : > { %p382_p3 = pnand %p7038_p9, %p381_p1 }
  0x30   : > { %s8358_s26 = sand.u32 (!%p382_p3), 1, %s8159_s22  }
  0x31   : > { %385 = sbr.rel (%p382_p3) target bundleno = 4649 (0x1229), region = 68  ;;  %s7039_s17 = sshll.u32 (!%p382_p3), %s8358_s26, 6 }
  0x32   : > { %s388_s18 = scalar_lea.sflag (!%p382_p3), [#allocation3], %s8358_s26  ;;  %s8364_s13 = scalar_lea.vmem (!%p382_p3), [#allocation2], %s7039_s17 }
  0x38   : > { %8146 = dma.done.wait (%p8297_p6), %s388_s18, 1024  }
  0x39   : > { %8148 = vsyncadd (%p8297_p6), %s388_s18, 4294966272  ;;  %vm443_vm0 = vcmask 261120   ;;  %v433_v0 = vld [vmem:[%s8364_s13] sm:$0xff]  ;;  %v435_v1 = vld [vmem:[%s8364_s13 + $0x10] sm:$0xff]  ;;  %vm8173_vm1 = vmmov 0   ;;  %s8174_s18 = smov 96  }
  0x3a   : > { %v434_v2 = vld [vmem:[%s8364_s13 + $0x8] sm:$0xff]  ;;  %v444_v3 = vsel %vm443_vm0, %v433_v0, 0.0  ;;  %v450_v4 = vsel %vm443_vm0, %v435_v1, 0.0  ;;  %v436_v5 = vld [vmem:[%s8364_s13 + $0x18] sm:$0xff]  ;;  %v437_v6 = vld [vmem:[%s8364_s13 + $0x20] sm:$0xff]  ;;  %s8175_s23 = smov 64  }
  0x3b   : > { %v438_v7 = vld [vmem:[%s8364_s13 + $0x28] sm:$0xff]  ;;  %445 = vadd.xlane.f32.xlu0 %v444_v3  ;;  %451 = vadd.xlane.f32.xlu1 %v450_v4  ;;  %v447_v8 = vsel %vm443_vm0, %v434_v2, 0.0  ;;  %v453_v9 = vsel %vm443_vm0, %v436_v5, 0.0  ;;  %v456_v10 = vsel %vm443_vm0, %v437_v6, 0.0  ;;  %v439_v12 = vld [vmem:[%s8364_s13 + $0x30] sm:$0xff]  ;;  %v440_v13 = vld [vmem:[%s8364_s13 + $0x38] sm:$0xff] }
  0x3c   : > { %v459_v11 = vsel %vm443_vm0, %v438_v7, 0.0  ;;  %v462_v14 = vsel %vm443_vm0, %v439_v12, 0.0  ;;  %v465_v15 = vsel %vm443_vm0, %v440_v13, 0.0  ;;  %v7859_v56 = vld [vmem:[%s9532_s3] sm:$0xff]   ;;  %v7860_v57 = vld [vmem:[%s9532_s3 + $0x8] sm:$0xff]   ;;  %vm689_vm2 = vcmask 64512  }
  0x3d   : > { %7359 = vmatprep.subr.bf16.mxu0 %v7859_v56  ;;  %s8176_s27 = smov 88   ;;  %s8177_s30 = smov 120   ;;  %vm3347_vm3 = vcmask 1043456  }
  0x3e   : > { %7360 = vmatpush3.bf16.msra.mxu0 %v7859_v56  ;;  %s8178_s14 = smov 56   ;;  %s8179_s29 = smov 112  }
  0x3f   : > { %448 = vadd.xlane.f32.xlu0 %v447_v8  ;;  %454 = vadd.xlane.f32.xlu1 %v453_v9  ;;  %s8180_s28 = smov 80   ;;  %s8184_s20 = smov 40  }
  0x40   : > { %7361 = vmatprep.subr.bf16.mxu0 %v7860_v57  ;;  %p9554_p11 = scmp.ne.s32.totalorder %s9551_s15, 0 }
  0x42   : > { %7362 = vmatpush3.bf16.msra.mxu0 %v7860_v57 }
  0x43   : > { %457 = vadd.xlane.f32.xlu0 %v456_v10  ;;  %460 = vadd.xlane.f32.xlu1 %v459_v11 }
  0x47   : > { %463 = vadd.xlane.f32.xlu0 %v462_v14  ;;  %466 = vadd.xlane.f32.xlu1 %v465_v15 }
  0xc8   : > { %v446_v16 = vpop.xlane.xlu0 %445  ;;  %v452_v17 = vpop.xlane.xlu1 %451 }
  0xc9   : > { %v469_v18 = vmul.f32 0.03125, %v446_v16  ;;  %v471_v19 = vmul.f32 0.03125, %v452_v17 }
  0xcb   : > { %v8386_v20 = vsub.f32 %v433_v0, %v469_v18  ;;  %v8388_v21 = vsub.f32 %v435_v1, %v471_v19  ;;  %v7041_v19 = vld [vmem:[%s9530_s1] ss:$0 sm:$0xff] }
  0xcc   : > { %v449_v22 = vpop.xlane.xlu0 %448  ;;  %v455_v23 = vpop.xlane.xlu1 %454 }
  0xcd   : > { %v470_v24 = vmul.f32 0.03125, %v449_v22  ;;  %v472_v25 = vmul.f32 0.03125, %v455_v23  ;;  %v485_v26 = vmul.f32 %v8386_v20, %v8386_v20  ;;  %v487_v27 = vmul.f32 %v8388_v21, %v8388_v21 }
  0xcf   : > { %v8394_v28 = vsub.f32 %v434_v2, %v470_v24  ;;  %v8396_v29 = vsub.f32 %v436_v5, %v472_v25  ;;  %v493_v30 = vsel %vm443_vm0, %v485_v26, 0.0  ;;  %v499_v33 = vsel %vm443_vm0, %v487_v27, 0.0  ;;  %v7042_v27 = vld [vmem:[%s9531_s2] ss:$0 sm:$0xff] }
  0xd0   : > { %494 = vadd.xlane.f32.xlu0 %v493_v30  ;;  %v458_v31 = vpop.xlane.xlu0 %457  ;;  %v461_v32 = vpop.xlane.xlu1 %460 }
  0xd1   : > { %v473_v34 = vmul.f32 0.03125, %v458_v31  ;;  %v474_v35 = vmul.f32 0.03125, %v461_v32  ;;  %v486_v36 = vmul.f32 %v8394_v28, %v8394_v28  ;;  %v488_v37 = vmul.f32 %v8396_v29, %v8396_v29 }
  0xd3   : > { %v8404_v38 = vsub.f32 %v437_v6, %v473_v34  ;;  %v8406_v39 = vsub.f32 %v438_v7, %v474_v35  ;;  %v496_v40 = vsel %vm443_vm0, %v486_v36, 0.0  ;;  %v502_v43 = vsel %vm443_vm0, %v488_v37, 0.0 }
  0xd4   : > { %500 = vadd.xlane.f32.xlu0 %v499_v33  ;;  %497 = vadd.xlane.f32.xlu1 %v496_v40  ;;  %v464_v41 = vpop.xlane.xlu0 %463  ;;  %v467_v42 = vpop.xlane.xlu1 %466 }
  0xd5   : > { %v475_v44 = vmul.f32 0.03125, %v464_v41  ;;  %v476_v45 = vmul.f32 0.03125, %v467_v42  ;;  %v489_v46 = vmul.f32 %v8404_v38, %v8404_v38  ;;  %v490_v47 = vmul.f32 %v8406_v39, %v8406_v39 }
  0xd7   : > { %v8414_v48 = vsub.f32 %v439_v12, %v475_v44  ;;  %v8416_v49 = vsub.f32 %v440_v13, %v476_v45  ;;  %v505_v50 = vsel %vm443_vm0, %v489_v46, 0.0  ;;  %v508_v51 = vsel %vm443_vm0, %v490_v47, 0.0 }
  0xd8   : > { %503 = vadd.xlane.f32.xlu1 %v502_v43  ;;  %506 = vadd.xlane.f32.xlu0 %v505_v50 }
  0xd9   : > { %v491_v52 = vmul.f32 %v8414_v48, %v8414_v48  ;;  %v492_v53 = vmul.f32 %v8416_v49, %v8416_v49 }
  0xdb   : > { %v511_v54 = vsel %vm443_vm0, %v491_v52, 0.0  ;;  %v514_v55 = vsel %vm443_vm0, %v492_v53, 0.0 }
  0xdc   : > { %509 = vadd.xlane.f32.xlu1 %v508_v51  ;;  %512 = vadd.xlane.f32.xlu0 %v511_v54 }
  0xe0   : > { %515 = vadd.xlane.f32.xlu1 %v514_v55 }
 0x15d   : > { %v495_v58 = vpop.xlane.xlu0 %494 }
 0x15e   : > { %v517_v59 = vmul.f32 0.03125, %v495_v58 }
 0x160   : > { %v525_v60 = vadd.f32 1e-05, %v517_v59 }
 0x161   : > { %v498_v61 = vpop.xlane.xlu1 %497  ;;  %v501_v62 = vpop.xlane.xlu0 %500 }
 0x162   : > { %7871 = vrsqrt.f32 %v525_v60  ;;  %v518_v63 = vmul.f32 0.03125, %v498_v61  ;;  %v519_v0 = vmul.f32 0.03125, %v501_v62 }
 0x164   : > { %v526_v1 = vadd.f32 1e-05, %v518_v63  ;;  %v527_v2 = vadd.f32 1e-05, %v519_v0 }
 0x165   : > { %v504_v3 = vpop.xlane.xlu1 %503  ;;  %v507_v4 = vpop.xlane.xlu0 %506 }
 0x166   : > { %7873 = vrsqrt.f32 %v526_v1  ;;  %v520_v5 = vmul.f32 0.03125, %v504_v3  ;;  %v521_v6 = vmul.f32 0.03125, %v507_v4 }
 0x167   : > { %7875 = vrsqrt.f32 %v527_v2 }
 0x168   : > { %v528_v7 = vadd.f32 1e-05, %v520_v5  ;;  %v529_v8 = vadd.f32 1e-05, %v521_v6 }
 0x169   : > { %v510_v9 = vpop.xlane.xlu1 %509  ;;  %v513_v10 = vpop.xlane.xlu0 %512 }
 0x16a   : > { %7877 = vrsqrt.f32 %v528_v7  ;;  %v522_v11 = vmul.f32 0.03125, %v510_v9  ;;  %v523_v12 = vmul.f32 0.03125, %v513_v10 }
 0x16b   : > { %7879 = vrsqrt.f32 %v529_v8 }
 0x16c   : > { %v7872_v13 = vpop.eup %7871  ;;  %v530_v14 = vadd.f32 1e-05, %v522_v11  ;;  %v531_v15 = vadd.f32 1e-05, %v523_v12 }
 0x16d   : > { %v516_v16 = vpop.xlane.xlu1 %515  ;;  %v541_v17 = vmul.f32 %v7872_v13, %v8386_v20 }
 0x16e   : > { %7881 = vrsqrt.f32 %v530_v14  ;;  %v524_v18 = vmul.f32 0.03125, %v516_v16 }
 0x16f   : > { %7883 = vrsqrt.f32 %v531_v15  ;;  %v555_v26 = vmul.f32 %v7041_v19, %v541_v17 }
 0x170   : > { %v7874_v22 = vpop.eup %7873  ;;  %v532_v23 = vadd.f32 1e-05, %v524_v18 }
 0x171   : > { %v7876_v24 = vpop.eup %7875  ;;  %v542_v25 = vmul.f32 %v7874_v22, %v8394_v28  ;;  %v569_v33 = vadd.f32 %v7042_v27, %v555_v26 }
 0x172   : > { %7885 = vrsqrt.f32 %v532_v23  ;;  %v543_v20 = vmul.f32 %v7876_v24, %v8388_v21 }
 0x173   : > { %v556_v30 = vmul.f32 %v7041_v19, %v542_v25 }
 0x174   : > { %v7878_v31 = vpop.eup %7877  ;;  %v557_v36 = vmul.f32 %v7041_v19, %v543_v20 }
 0x175   : > { %v7880_v32 = vpop.eup %7879  ;;  %v570_v34 = vadd.f32 %v7042_v27, %v556_v30  ;;  %v544_v35 = vmul.f32 %v7878_v31, %v8396_v29 }
 0x176   : > { %v545_v37 = vmul.f32 %v7880_v32, %v8404_v38  ;;  %v571_v43 = vadd.f32 %v7042_v27, %v557_v36 }
 0x177   : > { %v581_v40 = vpack.c.bf16 %v570_v34, %v569_v33  ;;  %v558_v28 = vmul.f32 %v7041_v19, %v544_v35 }
 0x178   : > { %v7882_v41 = vpop.eup %7881  ;;  %v559_v45 = vmul.f32 %v7041_v19, %v545_v37 }
 0x179   : > { %v7884_v42 = vpop.eup %7883  ;;  %7363 = vmatprep.mubr.msk.bf16.mxu0 %vm443_vm0, %v581_v40  ;;  %v572_v44 = vadd.f32 %v7042_v27, %v558_v28  ;;  %v546_v21 = vmul.f32 %v7882_v41, %v8406_v39 }
 0x17a   : > { %v547_v46 = vmul.f32 %v7884_v42, %v8414_v48  ;;  %v573_v29 = vadd.f32 %v7042_v27, %v559_v45  ;;  %v8172_v48 = vmov 0.0  }
 0x17b   : > { %v582_v47 = vpack.c.bf16 %v572_v44, %v571_v43  ;;  %v560_v50 = vmul.f32 %v7041_v19, %v546_v21  ;;  %7371 = vmatprep.subr.mxu1 %v8172_v48  ;;  %7406 = vmatprep.subr.mxu0 %v8172_v48 }
 0x17c   : > { %v7886_v51 = vpop.eup %7885  ;;  %v561_v53 = vmul.f32 %v7041_v19, %v547_v46  ;;  %7373 = vmatprep.mubr.msk.f32.mxu1 %vm8173_vm1, %v8172_v48 }
 0x17d   : > { %7364 = vmatmul.mubr.msk.bf16.vlgmr.msra.gmra.mrb[0].mxu0 %vm443_vm0, %v582_v47  ;;  %v574_v38 = vadd.f32 %v7042_v27, %v560_v50  ;;  %v548_v52 = vmul.f32 %v7886_v51, %v8416_v49 }
 0x17e   : > { %v575_v56 = vadd.f32 %v7042_v27, %v561_v53 }
 0x17f   : > { %v583_v54 = vpack.c.bf16 %v574_v38, %v573_v29  ;;  %v562_v55 = vmul.f32 %v7041_v19, %v548_v52 }
 0x181   : > { %7367 = vmatprep.mubr.msk.bf16.mxu0 %vm443_vm0, %v583_v54  ;;  %v576_v57 = vadd.f32 %v7042_v27, %v562_v55 }
 0x183   : > { %v584_v39 = vpack.c.bf16 %v576_v57, %v575_v56 }
 0x185   : > { %7368 = vmatmul.mubr.msk.bf16.gmra.mrb[4].mxu0 %vm443_vm0, %v584_v39 }
 0x186   : > { %7408 = vmatprep.mubr.msk.f32.mxu0 %vm8173_vm1, %v8172_v48 }
 0x250   : > { %v8456_v49 = vpop.f32.mrb[0].mxu0 }
 0x251   : > { %v8458_v58 = vpop.f32.mrb[1].mxu0  ;;  %v8506_v7 = vmul.f32 0.35355338, %v8456_v49 }
 0x252   : > { %687 = vrot.lane.b32.xlu0 %v8458_v58, %s8174_s18  ;;  %v8461_v59 = vpop.f32.mrb[2].mxu0  ;;  %v8488_v3 = vmul.f32 0.35355338, %v8458_v58 }
 0x253   : > { %v8463_v60 = vpop.f32.mrb[3].mxu0  ;;  %v8515_v9 = vmul.f32 0.35355338, %v8461_v59 }
 0x254   : > { %766 = vrot.lane.b32.xlu1 %v8463_v60, %s8174_s18  ;;  %v8497_v5 = vmul.f32 0.35355338, %v8463_v60 }
 0x258   : > { %844 = vrot.lane.b32.xlu1 %v8456_v49, %s8174_s18  ;;  %v8467_v61 = vpop.f32.mrb[4].mxu0 }
 0x259   : > { %v8469_v62 = vpop.f32.mrb[5].mxu0  ;;  %v8552_v17 = vmul.f32 0.35355338, %v8467_v61 }
 0x25a   : > { %1000 = vrot.lane.b32.xlu0 %v8469_v62, %s8174_s18  ;;  %v8472_v63 = vpop.f32.mrb[6].mxu0  ;;  %v8524_v12 = vmul.f32 0.35355338, %v8469_v62 }
 0x25b   : > { %v8474_v0 = vpop.f32.mrb[7].mxu0  ;;  %v8531_v13 = vmul.f32 0.35355338, %v8472_v63 }
 0x25c   : > { %922 = vrot.lane.b32.xlu1 %v8461_v59, %s8174_s18  ;;  %v8540_v16 = vmul.f32 0.35355338, %v8474_v0 }
 0x25e   : > { %1156 = vrot.lane.b32.xlu0 %v8467_v61, %s8174_s18 }
 0x260   : > { %1078 = vrot.lane.b32.xlu1 %v8474_v0, %s8174_s18 }
 0x262   : > { %1399 = vrot.lane.b32.xlu0 %v8458_v58, %s8175_s23 }
 0x264   : > { %1234 = vrot.lane.b32.xlu1 %v8472_v63, %s8174_s18 }
 0x268   : > { %1475 = vrot.lane.b32.xlu1 %v8463_v60, %s8175_s23 }
 0x26c   : > { %1551 = vrot.lane.b32.xlu1 %v8456_v49, %s8175_s23 }
 0x2c4   : > { %v688_v1 = vpop.permute.xlu0 %687 }
 0x2c5   : > { %7372 = vmatpush3.xpose.msk.msra.mxu1 %vm689_vm2, %v688_v1 }
 0x2c6   : > { %v767_v2 = vpop.permute.xlu1 %766  ;;  %7376 = vmatprep.subr.mxu1 %v8172_v48 }
 0x2c8   : > { %7374 = vmatmul.mubr.msk.f32.vlgmr.msra.gmra.mrb[0].mxu1 %vm689_vm2, %v8488_v3 }
 0x2c9   : > { %7377 = vmatpush3.xpose.msk.msra.mxu1 %vm689_vm2, %v767_v2  ;;  %7378 = vmatprep.mubr.msk.f32.mxu1 %vm8173_vm1, %v8172_v48 }
 0x2ca   : > { %v845_v4 = vpop.permute.xlu1 %844  ;;  %7381 = vmatprep.subr.mxu1 %v8172_v48 }
 0x2cc   : > { %7379 = vmatmul.mubr.msk.f32.vlgmr.msra.gmra.mrb[2].mxu1 %vm689_vm2, %v8497_v5  ;;  %v1001_v10 = vpop.permute.xlu0 %1000 }
 0x2cd   : > { %7382 = vmatpush3.xpose.msk.msra.mxu1 %vm689_vm2, %v845_v4  ;;  %7383 = vmatprep.mubr.msk.f32.mxu1 %vm8173_vm1, %v8172_v48 }
 0x2ce   : > { %v923_v6 = vpop.permute.xlu1 %922  ;;  %7386 = vmatprep.subr.mxu1 %v8172_v48 }
 0x2d0   : > { %7384 = vmatmul.mubr.msk.f32.vlgmr.msra.gmra.mrb[4].mxu1 %vm689_vm2, %v8506_v7  ;;  %v1157_v14 = vpop.permute.xlu0 %1156 }
 0x2d1   : > { %7387 = vmatpush3.xpose.msk.msra.mxu1 %vm689_vm2, %v923_v6  ;;  %7388 = vmatprep.mubr.msk.f32.mxu1 %vm8173_vm1, %v8172_v48 }
 0x2d2   : > { %v1079_v8 = vpop.permute.xlu1 %1078  ;;  %7391 = vmatprep.subr.mxu1 %v8172_v48 }
 0x2d4   : > { %7389 = vmatmul.mubr.msk.f32.vlgmr.msra.gmra.mrb[6].mxu1 %vm689_vm2, %v8515_v9  ;;  %v1400_v18 = vpop.permute.xlu0 %1399 }
 0x2d5   : > { %7392 = vmatpush3.xpose.msk.msra.mxu1 %vm689_vm2, %v1001_v10  ;;  %7393 = vmatprep.mubr.msk.f32.mxu1 %vm8173_vm1, %v8172_v48 }
 0x2d6   : > { %v1235_v11 = vpop.permute.xlu1 %1234  ;;  %7396 = vmatprep.subr.mxu1 %v8172_v48 }
 0x2d7   : > { %7407 = vmatpush3.xpose.msk.msra.mxu0 %vm689_vm2, %v1235_v11 }
 0x2d8   : > { %7394 = vmatmul.mubr.msk.f32.vlgmr.msra.gmra.mrb[8].mxu1 %vm689_vm2, %v8524_v12  ;;  %7416 = vmatprep.subr.mxu0 %v8172_v48 }
 0x2d9   : > { %7397 = vmatpush3.xpose.msk.msra.mxu1 %vm689_vm2, %v1079_v8  ;;  %7398 = vmatprep.mubr.msk.f32.mxu1 %vm8173_vm1, %v8172_v48 }
 0x2da   : > { %7409 = vmatmul.mubr.msk.f32.vlgmr.msra.gmra.mrb[8].mxu0 %vm689_vm2, %v8531_v13  ;;  %v1476_v15 = vpop.permute.xlu1 %1475  ;;  %7401 = vmatprep.subr.mxu1 %v8172_v48 }
 0x2db   : > { %7417 = vmatpush3.msra.mxu0 %v1476_v15  ;;  %7418 = vmatprep.mubr.msk.f32.mxu0 %vm8173_vm1, %v8172_v48 }
 0x2dc   : > { %7399 = vmatmul.mubr.msk.f32.vlgmr.msra.gmra.mrb[10].mxu1 %vm689_vm2, %v8540_v16  ;;  %7426 = vmatprep.subr.mxu0 %v8172_v48 }
 0x2dd   : > { %7402 = vmatpush3.xpose.msk.msra.mxu1 %vm689_vm2, %v1157_v14  ;;  %7403 = vmatprep.mubr.msk.f32.mxu1 %vm8173_vm1, %v8172_v48 }
 0x2de   : > { %7411 = vmatprep.subr.mxu1 %v8172_v48  ;;  %v8593_v46 = vpop.permute.xlu1 %1551 }
 0x2e0   : > { %7404 = vmatmul.mubr.msk.f32.vlgmr.msra.gmra.mrb[12].mxu1 %vm689_vm2, %v8552_v17 }
 0x2e1   : > { %7412 = vmatpush3.msra.mxu1 %v1400_v18  ;;  %7413 = vmatprep.mubr.msk.f32.mxu1 %vm8173_vm1, %v8172_v48 }
 0x2e2   : > { %7421 = vmatprep.subr.mxu1 %v8172_v48 }
 0x39b   : > { %v761_v19 = vpop.f32.mrb[0].mxu1 }
 0x39c   : > { %v7375_v22 = vpop.f32.mrb[1].mxu1  ;;  %v1311_v23 = vsel %vm689_vm2, %v761_v19, -inf }
 0x39d   : > { %1312 = vmax.xlane.f32.xlu0 %v1311_v23 }
 0x39f   : > { %v839_v24 = vpop.f32.mrb[2].mxu1 }
 0x3a0   : > { %v7380_v25 = vpop.f32.mrb[3].mxu1  ;;  %v1314_v26 = vsel %vm689_vm2, %v839_v24, -inf }
 0x3a1   : > { %1315 = vmax.xlane.f32.xlu1 %v1314_v26 }
 0x3a3   : > { %v917_v27 = vpop.f32.mrb[4].mxu1 }
 0x3a4   : > { %v7385_v20 = vpop.f32.mrb[5].mxu1  ;;  %v1317_v30 = vsel %vm689_vm2, %v917_v27, -inf }
 0x3a5   : > { %1318 = vmax.xlane.f32.xlu0 %v1317_v30 }
 0x3a7   : > { %v995_v31 = vpop.f32.mrb[6].mxu1 }
 0x3a8   : > { %v7390_v32 = vpop.f32.mrb[7].mxu1  ;;  %v1320_v33 = vsel %vm689_vm2, %v995_v31, -inf }
 0x3a9   : > { %1321 = vmax.xlane.f32.xlu0 %v1320_v33 }
 0x3ab   : > { %v1073_v34 = vpop.f32.mrb[8].mxu1 }
 0x3ac   : > { %v7395_v35 = vpop.f32.mrb[9].mxu1  ;;  %v1323_v36 = vsel %vm689_vm2, %v1073_v34, -inf }
 0x3ad   : > { %v1307_v37 = vpop.f32.mrb[8].mxu0  ;;  %1324 = vmax.xlane.f32.xlu0 %v1323_v36 }
 0x3ae   : > { %v7410_v40 = vpop.f32.mrb[9].mxu0  ;;  %v1332_v28 = vsel %vm689_vm2, %v1307_v37, -inf }
 0x3af   : > { %1333 = vmax.xlane.f32.xlu1 %v1332_v28  ;;  %v1151_v41 = vpop.f32.mrb[10].mxu1 }
 0x3b0   : > { %v7400_v42 = vpop.f32.mrb[11].mxu1  ;;  %v1326_v43 = vsel %vm689_vm2, %v1151_v41, -inf }
 0x3b3   : > { %1327 = vmax.xlane.f32.xlu1 %v1326_v43  ;;  %v8567_v44 = vpop.f32.mrb[12].mxu1 }
 0x3b4   : > { %v7405_v21 = vpop.f32.mrb[13].mxu1  ;;  %v1329_v45 = vsel %vm689_vm2, %v8567_v44, -inf }
 0x3c3   : > { %1703 = vrot.lane.b32.xlu0 %v8469_v62, %s8175_s23 }
 0x3c4   : > { %1627 = vrot.lane.b32.xlu1 %v8461_v59, %s8175_s23 }
 0x3c7   : > { %1855 = vrot.lane.b32.xlu0 %v8467_v61, %s8175_s23 }
 0x3c8   : > { %1779 = vrot.lane.b32.xlu1 %v8474_v0, %s8175_s23 }
 0x3cb   : > { %2013 = vrot.lane.b32.xlu0 %v8458_v58, %s8176_s27 }
 0x3cc   : > { %1931 = vrot.lane.b32.xlu1 %v8472_v63, %s8175_s23  ;;  %s431_s23 = scalar_lea.vmem [#allocation5], %s7039_s17 }
 0x3cd   : > { %s6959_s17 = sshll.u32 %s431_s23, 4  ;;  %s9481_s17 = int_to_ptr.vmem [resolvable:$true] %s6959_s17 }
 0x3cf   : > { %2011 = vrot.lane.b32.xlu0 %v8488_v3, %s8177_s30 }
 0x3d0   : > { %2091 = vrot.lane.b32.xlu1 %v8463_v60, %s8176_s27 }
 0x3d4   : > { %2089 = vrot.lane.b32.xlu1 %v8497_v5, %s8177_s30 }
 0x3d8   : > { %2247 = vrot.lane.b32.xlu1 %v8461_v59, %s8176_s27 }
 0x3ee   : > { %1330 = vmax.xlane.f32.xlu0 %v1329_v45 }
 0x404   : > { %2169 = vrot.lane.b32.xlu0 %v8456_v49, %s8176_s27 }
 0x42a   : > { %v1313_v47 = vpop.xlane.xlu0 %1312 }
 0x42b   : > { %v1335_v50 = vsub.f32 %v761_v19, %v1313_v47 }
 0x42d   : > { %v1343_v51 = vmul.f32 1.442695, %v1335_v50 }
 0x42e   : > { %v1316_v29 = vpop.xlane.xlu1 %1315 }
 0x42f   : > { %7887 = vpow2.f32 %v1343_v51  ;;  %v1336_v38 = vsub.f32 %v839_v24, %v1316_v29 }
 0x431   : > { %v1345_v52 = vmul.f32 1.442695, %v1336_v38 }
 0x432   : > { %v1319_v53 = vpop.xlane.xlu0 %1318 }
 0x433   : > { %7889 = vpow2.f32 %v1345_v52  ;;  %v1337_v54 = vsub.f32 %v917_v27, %v1319_v53 }
 0x435   : > { %v1347_v55 = vmul.f32 1.442695, %v1337_v54 }
 0x436   : > { %v1322_v56 = vpop.xlane.xlu0 %1321 }
 0x437   : > { %7891 = vpow2.f32 %v1347_v55  ;;  %v1338_v2 = vsub.f32 %v995_v31, %v1322_v56 }
 0x439   : > { %v8595_v57 = vpop.eup %7887  ;;  %v1349_v15 = vmul.f32 1.442695, %v1338_v2 }
 0x43a   : > { %v1325_v39 = vpop.xlane.xlu0 %1324  ;;  %v1359_v1 = vsel %vm689_vm2, %v8595_v57, 0.0 }
 0x43b   : > { %v1339_v4 = vsub.f32 %v1073_v34, %v1325_v39  ;;  %1360 = vadd.xlane.f32.xlu0 %v1359_v1 }
 0x43c   : > { %v1334_v6 = vpop.xlane.xlu1 %1333 }
 0x43d   : > { %v8599_v8 = vpop.eup %7889  ;;  %v1351_v10 = vmul.f32 1.442695, %v1339_v4  ;;  %v1342_v11 = vsub.f32 %v1307_v37, %v1334_v6 }
 0x43e   : > { %v1362_v14 = vsel %vm689_vm2, %v8599_v8, 0.0  ;;  %v1704_v35 = vpop.permute.xlu0 %1703 }
 0x43f   : > { %7893 = vpow2.f32 %v1351_v10  ;;  %v1357_v18 = vmul.f32 1.442695, %v1342_v11  ;;  %1363 = vadd.xlane.f32.xlu1 %v1362_v14 }
 0x440   : > { %v1328_v19 = vpop.xlane.xlu1 %1327 }
 0x441   : > { %v8603_v22 = vpop.eup %7891  ;;  %7895 = vpow2.f32 %v1357_v18  ;;  %v1340_v23 = vsub.f32 %v1151_v41, %v1328_v19 }
 0x442   : > { %v1365_v24 = vsel %vm689_vm2, %v8603_v22, 0.0  ;;  %7897 = vpow2.f32 %v1349_v15  ;;  %v1856_v36 = vpop.permute.xlu0 %1855 }
 0x443   : > { %v1353_v25 = vmul.f32 1.442695, %v1340_v23  ;;  %1366 = vadd.xlane.f32.xlu0 %v1365_v24 }
 0x444   : > { %v1628_v45 = vpop.permute.xlu1 %1627 }
 0x445   : > { %7899 = vpow2.f32 %v1353_v25 }
 0x446   : > { %v8631_v37 = vpop.permute.xlu0 %2013 }
 0x449   : > { %v8607_v26 = vpop.eup %7893 }
 0x44a   : > { %v1371_v27 = vsel %vm689_vm2, %v8607_v26, 0.0  ;;  %v8637_v40 = vpop.permute.xlu0 %2011 }
 0x44b   : > { %v8611_v20 = vpop.eup %7895  ;;  %1372 = vadd.xlane.f32.xlu0 %v1371_v27 }
 0x44c   : > { %v1380_v30 = vsel %vm689_vm2, %v8611_v20, 0.0  ;;  %v8615_v31 = vpop.eup %7897 }
 0x44d   : > { %1381 = vadd.xlane.f32.xlu1 %v1380_v30  ;;  %v1368_v32 = vsel %vm689_vm2, %v8615_v31, 0.0 }
 0x44f   : > { %v8619_v33 = vpop.eup %7899 }
 0x450   : > { %v1374_v34 = vsel %vm689_vm2, %v8619_v33, 0.0 }
 0x451   : > { %1369 = vadd.xlane.f32.xlu1 %v1368_v32 }
 0x455   : > { %1375 = vadd.xlane.f32.xlu1 %v1374_v34 }
 0x461   : > { %2167 = vrot.lane.b32.xlu0 %v8506_v7, %s8177_s30 }
 0x466   : > { %2245 = vrot.lane.b32.xlu1 %v8515_v9, %s8177_s30 }
 0x46a   : > { %2403 = vrot.lane.b32.xlu1 %v8474_v0, %s8176_s27 }
 0x46e   : > { %2401 = vrot.lane.b32.xlu1 %v8540_v16, %s8177_s30 }
 0x472   : > { %2559 = vrot.lane.b32.xlu1 %v8472_v63, %s8176_s27 }
 0x476   : > { %2557 = vrot.lane.b32.xlu1 %v8531_v13, %s8177_s30 }
 0x47b   : > { %v1331_v28 = vpop.xlane.xlu0 %1330 }
 0x47c   : > { %v1341_v41 = vsub.f32 %v8567_v44, %v1331_v28  ;;  %v1780_v44 = vpop.permute.xlu1 %1779 }
 0x47e   : > { %v1355_v42 = vmul.f32 1.442695, %v1341_v41 }
 0x47f   : > { %v8652_v29 = vpop.permute.xlu0 %2169 }
 0x480   : > { %7901 = vpow2.f32 %v1355_v42  ;;  %v1932_v47 = vpop.permute.xlu1 %1931 }
 0x484   : > { %v2092_v50 = vpop.permute.xlu1 %2091 }
 0x488   : > { %v2090_v51 = vpop.permute.xlu1 %2089 }
 0x48a   : > { %v8640_v43 = vpop.eup %7901 }
 0x48b   : > { %v1377_v21 = vsel %vm689_vm2, %v8640_v43, 0.0 }
 0x48c   : > { %1378 = vadd.xlane.f32.xlu0 %v1377_v21  ;;  %v2248_v38 = vpop.permute.xlu1 %2247 }
 0x4a2   : > { %2325 = vrot.lane.b32.xlu0 %v8469_v62, %s8176_s27 }
 0x4a6   : > { %2323 = vrot.lane.b32.xlu0 %v8524_v12, %s8177_s30 }
 0x4aa   : > { %2481 = vrot.lane.b32.xlu0 %v8467_v61, %s8176_s27  ;;  %s8181_s27 = smov 48  }
 0x4ae   : > { %2479 = vrot.lane.b32.xlu0 %v8552_v17, %s8177_s30  ;;  %s8182_s30 = smov 104  }
 0x4c8   : > { %v1361_v52 = vpop.xlane.xlu0 %1360 }
 0x4c9   : > { %7903 = vrcp.f32 %v1361_v52 }
 0x4cc   : > { %v1364_v53 = vpop.xlane.xlu1 %1363 }
 0x4cd   : > { %7905 = vrcp.f32 %v1364_v53 }
 0x4d0   : > { %v1367_v54 = vpop.xlane.xlu0 %1366 }
 0x4d1   : > { %7907 = vrcp.f32 %v1367_v54 }
 0x4d3   : > { %v7904_v55 = vpop.eup %7903 }
 0x4d4   : > { %v1391_v56 = vmul.f32 %v7904_v55, %v8595_v57 }
 0x4d6   : > { %7414 = vmatmul.mubr.msk.f32.vlgmr.msra.gmra.mrb[14].mxu1 %vm689_vm2, %v1391_v56 }
 0x4d7   : > { %v7906_v39 = vpop.eup %7905  ;;  %7422 = vmatpush3.msra.mxu1 %v8593_v46  ;;  %7423 = vmatprep.mubr.msk.f32.mxu1 %vm8173_vm1, %v8172_v48 }
 0x4d8   : > { %v1373_v1 = vpop.xlane.xlu0 %1372  ;;  %v1392_v2 = vmul.f32 %v7906_v39, %v8599_v8  ;;  %7431 = vmatprep.subr.mxu1 %v8172_v48 }
 0x4d9   : > { %7909 = vrcp.f32 %v1373_v1 }
 0x4da   : > { %7419 = vmatmul.mubr.msk.f32.vlgmr.msra.gmra.mrb[10].mxu0 %vm689_vm2, %v1392_v2  ;;  %v1382_v4 = vpop.xlane.xlu1 %1381 }
 0x4db   : > { %v7908_v6 = vpop.eup %7907  ;;  %7427 = vmatpush3.msra.mxu0 %v1628_v45  ;;  %7428 = vmatprep.mubr.msk.f32.mxu0 %vm8173_vm1, %v8172_v48 }
 0x4dc   : > { %v1393_v57 = vmul.f32 %v7908_v6, %v8603_v22  ;;  %7436 = vmatprep.subr.mxu0 %v8172_v48  ;;  %v2168_v30 = vpop.permute.xlu0 %2167 }
 0x4de   : > { %v1370_v46 = vpop.xlane.xlu1 %1369  ;;  %7424 = vmatmul.mubr.msk.f32.vlgmr.msra.gmra.mrb[16].mxu1 %vm689_vm2, %v1393_v57 }
 0x4df   : > { %7911 = vrcp.f32 %v1370_v46  ;;  %7432 = vmatpush3.msra.mxu1 %v1704_v35  ;;  %7433 = vmatprep.mubr.msk.f32.mxu1 %vm8173_vm1, %v8172_v48 }
 0x4e0   : > { %7441 = vmatprep.subr.mxu1 %v8172_v48 }
 0x4e2   : > { %v1376_v8 = vpop.xlane.xlu1 %1375 }
 0x4e3   : > { %v7910_v10 = vpop.eup %7909  ;;  %7913 = vrcp.f32 %v1376_v8 }
 0x4e4   : > { %v1395_v11 = vmul.f32 %v7910_v10, %v8607_v26  ;;  %7915 = vrcp.f32 %v1382_v4 }
 0x4e6   : > { %7434 = vmatmul.mubr.msk.f32.vlgmr.msra.gmra.mrb[18].mxu1 %vm689_vm2, %v1395_v11  ;;  %v2246_v19 = vpop.permute.xlu1 %2245 }
 0x4e7   : > { %7442 = vmatpush3.msra.mxu1 %v1856_v36  ;;  %7443 = vmatprep.mubr.msk.f32.mxu1 %vm8173_vm1, %v8172_v48 }
 0x4e8   : > { %7451 = vmatprep.subr.mxu1 %v8172_v48 }
 0x4e9   : > { %v7912_v14 = vpop.eup %7911 }
 0x4ea   : > { %v1394_v15 = vmul.f32 %v7912_v14, %v8615_v31  ;;  %v2404_v25 = vpop.permute.xlu1 %2403 }
 0x4ec   : > { %7429 = vmatmul.mubr.msk.f32.vlgmr.msra.gmra.mrb[12].mxu0 %vm689_vm2, %v1394_v15 }
 0x4ed   : > { %v7914_v18 = vpop.eup %7913  ;;  %7437 = vmatpush3.msra.mxu0 %v1780_v44  ;;  %7438 = vmatprep.mubr.msk.f32.mxu0 %vm8173_vm1, %v8172_v48 }
 0x4ee   : > { %7446 = vmatprep.subr.mxu0 %v8172_v48  ;;  %v1396_v22 = vmul.f32 %v7914_v18, %v8619_v33  ;;  %v7916_v23 = vpop.eup %7915  ;;  %v2402_v26 = vpop.permute.xlu1 %2401 }
 0x4ef   : > { %v1398_v24 = vmul.f32 %v7916_v23, %v8611_v20 }
 0x4f0   : > { %7439 = vmatmul.mubr.msk.f32.vlgmr.msra.gmra.mrb[14].mxu0 %vm689_vm2, %v1396_v22 }
 0x4f1   : > { %7447 = vmatpush3.msra.mxu0 %v1932_v47  ;;  %7448 = vmatprep.mubr.msk.f32.mxu0 %vm8173_vm1, %v8172_v48 }
 0x4f2   : > { %7456 = vmatprep.subr.mxu0 %v8172_v48  ;;  %v2560_v27 = vpop.permute.xlu1 %2559 }
 0x4f4   : > { %7449 = vmatmul.mubr.msk.f32.vlgmr.msra.gmra.mrb[16].mxu0 %vm689_vm2, %v1398_v24 }
 0x4f5   : > { %7458 = vmatprep.mubr.msk.f32.mxu0 %vm8173_vm1, %v8172_v48 }
 0x4f6   : > { %v2558_v20 = vpop.permute.xlu1 %2557 }
 0x4f8   : > { %7457 = vmatpush3.xpose.msk.msra.mxu0 %vm689_vm2, %v2092_v50 }
 0x4f9   : > { %7466 = vmatprep.subr.mxu0 %v8172_v48 }
 0x4fb   : > { %7459 = vmatmul.mubr.msk.f32.vlgmr.msra.gmra.mrb[18].mxu0 %vm689_vm2, %v2090_v51 }
 0x4fc   : > { %7467 = vmatpush3.xpose.msk.msra.mxu0 %vm689_vm2, %v2248_v38  ;;  %7468 = vmatprep.mubr.msk.f32.mxu0 %vm8173_vm1, %v8172_v48 }
 0x4fd   : > { %7476 = vmatprep.subr.mxu0 %v8172_v48 }
 0x4ff   : > { %7469 = vmatmul.mubr.msk.f32.vlgmr.msra.gmra.mrb[20].mxu0 %vm689_vm2, %v2246_v19 }
 0x500   : > { %7477 = vmatpush3.xpose.msk.msra.mxu0 %vm689_vm2, %v2404_v25  ;;  %7478 = vmatprep.mubr.msk.f32.mxu0 %vm8173_vm1, %v8172_v48 }
 0x501   : > { %7486 = vmatprep.subr.mxu0 %v8172_v48 }
 0x503   : > { %7479 = vmatmul.mubr.msk.f32.vlgmr.msra.gmra.mrb[22].mxu0 %vm689_vm2, %v2402_v26 }
 0x504   : > { %7487 = vmatpush3.xpose.msk.msra.mxu0 %vm689_vm2, %v2560_v27  ;;  %7488 = vmatprep.mubr.msk.f32.mxu0 %vm8173_vm1, %v8172_v48 }
 0x505   : > { %7496 = vmatprep.subr.mxu0 %v8172_v48 }
 0x507   : > { %7489 = vmatmul.mubr.msk.f32.vlgmr.msra.gmra.mrb[24].mxu0 %vm689_vm2, %v2558_v20 }
 0x508   : > { %7498 = vmatprep.mubr.msk.f32.mxu0 %vm8173_vm1, %v8172_v48 }
 0x519   : > { %v1379_v31 = vpop.xlane.xlu0 %1378 }
 0x51a   : > { %7917 = vrcp.f32 %v1379_v31 }
 0x51d   : > { %v2326_v33 = vpop.permute.xlu0 %2325 }
 0x521   : > { %v2324_v35 = vpop.permute.xlu0 %2323 }
 0x524   : > { %v7918_v32 = vpop.eup %7917 }
 0x525   : > { %v1397_v34 = vmul.f32 %v7918_v32, %v8640_v43  ;;  %v2482_v36 = vpop.permute.xlu0 %2481 }
 0x527   : > { %7444 = vmatmul.mubr.msk.f32.vlgmr.msra.gmra.mrb[20].mxu1 %vm689_vm2, %v1397_v34 }
 0x528   : > { %7452 = vmatpush3.xpose.msk.msra.mxu1 %vm689_vm2, %v8631_v37  ;;  %7453 = vmatprep.mubr.msk.f32.mxu1 %vm8173_vm1, %v8172_v48 }
 0x529   : > { %7461 = vmatprep.subr.mxu1 %v8172_v48  ;;  %v2480_v37 = vpop.permute.xlu0 %2479 }
 0x52b   : > { %7454 = vmatmul.mubr.msk.f32.vlgmr.msra.gmra.mrb[22].mxu1 %vm689_vm2, %v8637_v40 }
 0x52c   : > { %7462 = vmatpush3.xpose.msk.msra.mxu1 %vm689_vm2, %v8652_v29  ;;  %7463 = vmatprep.mubr.msk.f32.mxu1 %vm8173_vm1, %v8172_v48 }
 0x52d   : > { %7471 = vmatprep.subr.mxu1 %v8172_v48 }
 0x52f   : > { %7464 = vmatmul.mubr.msk.f32.vlgmr.msra.gmra.mrb[24].mxu1 %vm689_vm2, %v2168_v30 }
 0x530   : > { %7472 = vmatpush3.xpose.msk.msra.mxu1 %vm689_vm2, %v2326_v33  ;;  %7473 = vmatprep.mubr.msk.f32.mxu1 %vm8173_vm1, %v8172_v48 }
 0x531   : > { %7481 = vmatprep.subr.mxu1 %v8172_v48 }
 0x533   : > { %7474 = vmatmul.mubr.msk.f32.vlgmr.msra.gmra.mrb[26].mxu1 %vm689_vm2, %v2324_v35 }
 0x534   : > { %7482 = vmatpush3.xpose.msk.msra.mxu1 %vm689_vm2, %v2482_v36  ;;  %7483 = vmatprep.mubr.msk.f32.mxu1 %vm8173_vm1, %v8172_v48 }
 0x535   : > { %7491 = vmatprep.subr.mxu1 %v8172_v48 }
 0x537   : > { %7484 = vmatmul.mubr.msk.f32.vlgmr.msra.gmra.mrb[28].mxu1 %vm689_vm2, %v2480_v37 }
 0x538   : > { %7493 = vmatprep.mubr.msk.f32.mxu1 %vm8173_vm1, %v8172_v48 }
 0x5a9   : > { %v8736_v40 = vpop.f32.mrb[14].mxu1 }
 0x5aa   : > { %v7415_v28 = vpop.f32.mrb[15].mxu1 }
 0x5ad   : > { %v8738_v41 = vpop.f32.mrb[10].mxu0 }
 0x5ae   : > { %v2007_v42 = vpack.c.bf16 %v8738_v41, %v8736_v40  ;;  %v7420_v43 = vpop.f32.mrb[11].mxu0  ;;  %v675_v40 = vld [vmem:[%s9533_s4 + $0x4] sm:$0xf] }
 0x5af   : > { %v3349_v41 = vsel %vm3347_vm3, %v675_v40, 0 }
 0x5b1   : > { %v8742_v21 = vpop.f32.mrb[16].mxu1 }
 0x5b2   : > { %v7425_v45 = vpop.f32.mrb[17].mxu1 }
 0x5b9   : > { %v8744_v44 = vpop.f32.mrb[18].mxu1 }
 0x5ba   : > { %v7435_v47 = vpop.f32.mrb[19].mxu1 }
 0x5bf   : > { %v8746_v50 = vpop.f32.mrb[12].mxu0 }
 0x5c0   : > { %v2008_v51 = vpack.c.bf16 %v8746_v50, %v8742_v21  ;;  %v7430_v29 = vpop.f32.mrb[13].mxu0 }
 0x5c3   : > { %v8750_v38 = vpop.f32.mrb[14].mxu0 }
 0x5c4   : > { %v2009_v52 = vpack.c.bf16 %v8750_v38, %v8744_v44  ;;  %v7440_v53 = vpop.f32.mrb[15].mxu0 }
 0x5c7   : > { %v8754_v54 = vpop.f32.mrb[16].mxu0 }
 0x5c8   : > { %v7450_v55 = vpop.f32.mrb[17].mxu0 }
 0x5ce   : > { %v2163_v56 = vpop.f32.mrb[18].mxu0 }
 0x5cf   : > { %v7460_v39 = vpop.f32.mrb[19].mxu0  ;;  %v2638_v1 = vsel %vm689_vm2, %v2163_v56, -inf }
 0x5d0   : > { %2639 = vmax.xlane.f32.xlu1 %v2638_v1 }
 0x5d2   : > { %v8757_v2 = vpop.f32.mrb[20].mxu0 }
 0x5d3   : > { %v7470_v4 = vpop.f32.mrb[21].mxu0  ;;  %v2644_v30 = vsel %vm689_vm2, %v8757_v2, -inf }
 0x5d6   : > { %v2475_v6 = vpop.f32.mrb[22].mxu0 }
 0x5d7   : > { %v7480_v57 = vpop.f32.mrb[23].mxu0  ;;  %v2650_v46 = vsel %vm689_vm2, %v2475_v6, -inf }
 0x5d8   : > { %2651 = vmax.xlane.f32.xlu1 %v2650_v46 }
 0x5da   : > { %v8760_v8 = vpop.f32.mrb[24].mxu0 }
 0x5db   : > { %v7490_v10 = vpop.f32.mrb[25].mxu0  ;;  %v2656_v11 = vsel %vm689_vm2, %v8760_v8, -inf }
 0x5dc   : > { %2657 = vmax.xlane.f32.xlu1 %v2656_v11 }
 0x5ed   : > { %2799 = vrot.lane.b32.xlu1 %v8463_v60, %s8178_s14 }
 0x5f1   : > { %2875 = vrot.lane.b32.xlu1 %v8456_v49, %s8178_s14 }
 0x5f5   : > { %2951 = vrot.lane.b32.xlu1 %v8461_v59, %s8178_s14 }
 0x5f9   : > { %3103 = vrot.lane.b32.xlu1 %v8474_v0, %s8178_s14 }
 0x5fa   : > { %v8772_v14 = vpop.f32.mrb[20].mxu1 }
 0x5fb   : > { %v2010_v15 = vpack.c.bf16 %v8754_v54, %v8772_v14  ;;  %v7445_v18 = vpop.f32.mrb[21].mxu1 }
 0x5fe   : > { %v2085_v19 = vpop.f32.mrb[22].mxu1 }
 0x5ff   : > { %v7455_v22 = vpop.f32.mrb[23].mxu1  ;;  %v2635_v23 = vsel %vm689_vm2, %v2085_v19, -inf }
 0x600   : > { %2636 = vmax.xlane.f32.xlu0 %v2635_v23 }
 0x602   : > { %v2241_v24 = vpop.f32.mrb[24].mxu1 }
 0x603   : > { %v7465_v25 = vpop.f32.mrb[25].mxu1  ;;  %v2641_v26 = vsel %vm689_vm2, %v2241_v24, -inf }
 0x604   : > { %2642 = vmax.xlane.f32.xlu0 %v2641_v26 }
 0x606   : > { %v2397_v27 = vpop.f32.mrb[26].mxu1 }
 0x607   : > { %v7475_v20 = vpop.f32.mrb[27].mxu1  ;;  %v2647_v33 = vsel %vm689_vm2, %v2397_v27, -inf }
 0x608   : > { %2645 = vmax.xlane.f32.xlu0 %v2644_v30 }
 0x60a   : > { %v2553_v31 = vpop.f32.mrb[28].mxu1 }
 0x60b   : > { %v7485_v32 = vpop.f32.mrb[29].mxu1  ;;  %v2653_v34 = vsel %vm689_vm2, %v2553_v31, -inf }
 0x60c   : > { %2648 = vmax.xlane.f32.xlu0 %v2647_v33 }
 0x610   : > { %2654 = vmax.xlane.f32.xlu0 %v2653_v34 }
 0x626   : > { %2723 = vrot.lane.b32.xlu0 %v8458_v58, %s8178_s14 }
 0x62a   : > { %3027 = vrot.lane.b32.xlu0 %v8469_v62, %s8178_s14 }
 0x65d   : > { %v2640_v35 = vpop.xlane.xlu1 %2639 }
 0x65e   : > { %v2660_v36 = vsub.f32 %v2163_v56, %v2640_v35 }
 0x660   : > { %v2669_v37 = vmul.f32 1.442695, %v2660_v36 }
 0x662   : > { %7919 = vpow2.f32 %v2669_v37 }
 0x665   : > { %v2652_v28 = vpop.xlane.xlu1 %2651 }
 0x666   : > { %v2664_v4 = vsub.f32 %v2475_v6, %v2652_v28 }
 0x668   : > { %v2677_v11 = vmul.f32 1.442695, %v2664_v4 }
 0x669   : > { %v2658_v43 = vpop.xlane.xlu1 %2657 }
 0x66a   : > { %v2666_v18 = vsub.f32 %v8760_v8, %v2658_v43 }
 0x66c   : > { %v8786_v45 = vpop.eup %7919 }
 0x66d   : > { %v2800_v47 = vpop.permute.xlu1 %2799  ;;  %v2686_v29 = vsel %vm689_vm2, %v8786_v45, 0.0 }
 0x66e   : > { %2687 = vadd.xlane.f32.xlu1 %v2686_v29  ;;  %7497 = vmatpush3.msra.mxu0 %v2800_v47 }
 0x66f   : > { %7506 = vmatprep.subr.mxu0 %v8172_v48 }
 0x68d   : > { %v2637_v53 = vpop.xlane.xlu0 %2636 }
 0x68e   : > { %v2659_v55 = vsub.f32 %v2085_v19, %v2637_v53  ;;  %v2681_v19 = vmul.f32 1.442695, %v2666_v18  ;;  %v2876_v53 = vpop.permute.xlu1 %2875 }
 0x690   : > { %v2667_v39 = vmul.f32 1.442695, %v2659_v55 }
 0x691   : > { %v2643_v1 = vpop.xlane.xlu0 %2642 }
 0x692   : > { %7921 = vpow2.f32 %v2667_v39  ;;  %v2661_v56 = vsub.f32 %v2241_v24, %v2643_v1  ;;  %v2952_v55 = vpop.permute.xlu1 %2951 }
 0x694   : > { %v2671_v57 = vmul.f32 1.442695, %v2661_v56 }
 0x695   : > { %v2646_v46 = vpop.xlane.xlu0 %2645 }
 0x696   : > { %7923 = vpow2.f32 %v2671_v57  ;;  %v2662_v10 = vsub.f32 %v8757_v2, %v2646_v46  ;;  %v3104_v39 = vpop.permute.xlu1 %3103 }
 0x698   : > { %v2673_v22 = vmul.f32 1.442695, %v2662_v10 }
 0x699   : > { %v2649_v23 = vpop.xlane.xlu0 %2648 }
 0x69a   : > { %7925 = vpow2.f32 %v2673_v22  ;;  %v2663_v25 = vsub.f32 %v2397_v27, %v2649_v23 }
 0x69b   : > { %7927 = vpow2.f32 %v2677_v11 }
 0x69c   : > { %v8793_v26 = vpop.eup %7921  ;;  %v2675_v20 = vmul.f32 1.442695, %v2663_v25 }
 0x69d   : > { %v2655_v30 = vpop.xlane.xlu0 %2654  ;;  %v2683_v6 = vsel %vm689_vm2, %v8793_v26, 0.0 }
 0x69e   : > { %7929 = vpow2.f32 %v2675_v20  ;;  %v2665_v24 = vsub.f32 %v2553_v31, %v2655_v30  ;;  %2684 = vadd.xlane.f32.xlu0 %v2683_v6 }
 0x69f   : > { %7931 = vpow2.f32 %v2681_v19 }
 0x6a0   : > { %v8797_v2 = vpop.eup %7923  ;;  %v2679_v8 = vmul.f32 1.442695, %v2665_v24 }
 0x6a1   : > { %v2724_v32 = vpop.permute.xlu0 %2723  ;;  %v2689_v27 = vsel %vm689_vm2, %v8797_v2, 0.0 }
 0x6a2   : > { %7933 = vpow2.f32 %v2679_v8  ;;  %2690 = vadd.xlane.f32.xlu0 %v2689_v27  ;;  %7492 = vmatpush3.msra.mxu1 %v2724_v32 }
 0x6a3   : > { %7501 = vmatprep.subr.mxu1 %v8172_v48 }
 0x6a4   : > { %v8802_v33 = vpop.eup %7925 }
 0x6a5   : > { %v2692_v34 = vsel %vm689_vm2, %v8802_v33, 0.0  ;;  %v8806_v31 = vpop.eup %7927  ;;  %v3028_v57 = vpop.permute.xlu0 %3027 }
 0x6a6   : > { %2693 = vadd.xlane.f32.xlu1 %v2692_v34  ;;  %v2698_v36 = vsel %vm689_vm2, %v8806_v31, 0.0 }
 0x6a8   : > { %v8808_v35 = vpop.eup %7929 }
 0x6a9   : > { %v2695_v37 = vsel %vm689_vm2, %v8808_v35, 0.0  ;;  %v8814_v28 = vpop.eup %7931 }
 0x6aa   : > { %2699 = vadd.xlane.f32.xlu1 %v2698_v36  ;;  %2696 = vadd.xlane.f32.xlu0 %v2695_v37  ;;  %v2704_v47 = vsel %vm689_vm2, %v8814_v28, 0.0 }
 0x6ac   : > { %v8816_v43 = vpop.eup %7933 }
 0x6ad   : > { %v2701_v29 = vsel %vm689_vm2, %v8816_v43, 0.0 }
 0x6ae   : > { %2705 = vadd.xlane.f32.xlu1 %v2704_v47  ;;  %2702 = vadd.xlane.f32.xlu0 %v2701_v29 }
 0x6bf   : > { %3255 = vrot.lane.b32.xlu1 %v8472_v63, %s8178_s14 }
 0x6c3   : > { %3496 = vrot.lane.b32.xlu1 %v8488_v3, %s8179_s29 }
 0x6c4   : > { %3179 = vrot.lane.b32.xlu0 %v8467_v61, %s8178_s14  ;;  %s8183_s14 = smov 72  }
 0x6c7   : > { %3574 = vrot.lane.b32.xlu1 %v8497_v5, %s8179_s29 }
 0x6c8   : > { %3498 = vrot.lane.b32.xlu0 %v8458_v58, %s8180_s28 }
 0x6cb   : > { %3652 = vrot.lane.b32.xlu1 %v8506_v7, %s8179_s29 }
 0x6cc   : > { %3576 = vrot.lane.b32.xlu0 %v8463_v60, %s8180_s28 }
 0x6cf   : > { %3730 = vrot.lane.b32.xlu1 %v8515_v9, %s8179_s29 }
 0x6d0   : > { %3654 = vrot.lane.b32.xlu0 %v8456_v49, %s8180_s28 }
 0x6d3   : > { %3808 = vrot.lane.b32.xlu1 %v8524_v12, %s8179_s29 }
 0x6d4   : > { %3732 = vrot.lane.b32.xlu0 %v8461_v59, %s8180_s28 }
 0x6d7   : > { %3886 = vrot.lane.b32.xlu1 %v8540_v16, %s8179_s29 }
 0x6d8   : > { %3810 = vrot.lane.b32.xlu0 %v8469_v62, %s8180_s28 }
 0x6db   : > { %3964 = vrot.lane.b32.xlu1 %v8552_v17, %s8179_s29 }
 0x6dc   : > { %3888 = vrot.lane.b32.xlu0 %v8474_v0, %s8180_s28 }
 0x6df   : > { %4042 = vrot.lane.b32.xlu1 %v8531_v13, %s8179_s29  ;;  %s8101_s29 = scalar_lea.vmem %s9481_s17, 1024 }
 0x6e0   : > { %3966 = vrot.lane.b32.xlu0 %v8467_v61, %s8180_s28  ;;  %p8102_p6 = scmp.ne.s32.totalorder %s9481_s17, %s8101_s29 }
 0x6e2   : > { %p8103_p12 = pnand %p8102_p6, %p9554_p11 }
 0x6e4   : > { %4044 = vrot.lane.b32.xlu0 %v8472_v63, %s8180_s28  ;;  %p8104_p13 = pneg %p8103_p12  ;;  %s8186_s28 = smov [#allocation5]  }
 0x6fb   : > { %v2688_v1 = vpop.xlane.xlu1 %2687 }
 0x6fc   : > { %7935 = vrcp.f32 %v2688_v1 }
 0x706   : > { %v7936_v56 = vpop.eup %7935 }
 0x707   : > { %v2716_v4 = vmul.f32 %v7936_v56, %v8786_v45 }
 0x709   : > { %7499 = vmatmul.mubr.msk.f32.vlgmr.msra.gmra.mrb[26].mxu0 %vm689_vm2, %v2716_v4 }
 0x70a   : > { %7507 = vmatpush3.msra.mxu0 %v2952_v55  ;;  %7508 = vmatprep.mubr.msk.f32.mxu0 %vm8173_vm1, %v8172_v48 }
 0x70b   : > { %7516 = vmatprep.subr.mxu0 %v8172_v48 }
 0x72b   : > { %v2685_v46 = vpop.xlane.xlu0 %2684 }
 0x72c   : > { %7937 = vrcp.f32 %v2685_v46 }
 0x72f   : > { %v2691_v10 = vpop.xlane.xlu0 %2690 }
 0x730   : > { %7939 = vrcp.f32 %v2691_v10 }
 0x733   : > { %v2694_v11 = vpop.xlane.xlu1 %2693 }
 0x734   : > { %7941 = vrcp.f32 %v2694_v11 }
 0x736   : > { %v7938_v18 = vpop.eup %7937 }
 0x737   : > { %v2700_v22 = vpop.xlane.xlu1 %2699  ;;  %v2697_v23 = vpop.xlane.xlu0 %2696  ;;  %v2715_v45 = vmul.f32 %v7938_v18, %v8793_v26 }
 0x738   : > { %7943 = vrcp.f32 %v2700_v22 }
 0x739   : > { %7945 = vrcp.f32 %v2697_v23  ;;  %7494 = vmatmul.mubr.msk.f32.vlgmr.msra.gmra.mrb[30].mxu1 %vm689_vm2, %v2715_v45 }
 0x73a   : > { %v7940_v25 = vpop.eup %7939  ;;  %7502 = vmatpush3.msra.mxu1 %v2876_v53  ;;  %7503 = vmatprep.mubr.msk.f32.mxu1 %vm8173_vm1, %v8172_v48 }
 0x73b   : > { %v2706_v19 = vpop.xlane.xlu1 %2705  ;;  %v2703_v20 = vpop.xlane.xlu0 %2702  ;;  %7511 = vmatprep.subr.mxu1 %v8172_v48  ;;  %v2717_v30 = vmul.f32 %v7940_v25, %v8797_v2 }
 0x73c   : > { %7947 = vrcp.f32 %v2706_v19 }
 0x73d   : > { %7949 = vrcp.f32 %v2703_v20  ;;  %7504 = vmatmul.mubr.msk.f32.vlgmr.msra.gmra.mrb[32].mxu1 %vm689_vm2, %v2717_v30 }
 0x73e   : > { %v7942_v26 = vpop.eup %7941  ;;  %7512 = vmatpush3.msra.mxu1 %v3028_v57  ;;  %7513 = vmatprep.mubr.msk.f32.mxu1 %vm8173_vm1, %v8172_v48 }
 0x73f   : > { %v2718_v6 = vmul.f32 %v7942_v26, %v8802_v33  ;;  %7521 = vmatprep.subr.mxu1 %v8172_v48  ;;  %v3256_v27 = vpop.permute.xlu1 %3255  ;;  %v674_v33 = vld [vmem:[%s9533_s4] sm:$0xf]  ;;  %v3180_v36 = vpop.permute.xlu0 %3179 }
 0x741   : > { %7509 = vmatmul.mubr.msk.f32.vlgmr.msra.gmra.mrb[28].mxu0 %vm689_vm2, %v2718_v6 }
 0x742   : > { %v7944_v24 = vpop.eup %7943  ;;  %7517 = vmatpush3.msra.mxu0 %v3104_v39  ;;  %7518 = vmatprep.mubr.msk.f32.mxu0 %vm8173_vm1, %v8172_v48 }
 0x743   : > { %v7946_v2 = vpop.eup %7945  ;;  %7526 = vmatprep.subr.mxu0 %v8172_v48  ;;  %v2720_v8 = vmul.f32 %v7944_v24, %v8806_v31 }
 0x744   : > { %v2719_v32 = vmul.f32 %v7946_v2, %v8808_v35  ;;  %v3429_v35 = vsel %vm3347_vm3, %v674_v33, 0 }
 0x745   : > { %7519 = vmatmul.mubr.msk.f32.vlgmr.msra.gmra.mrb[30].mxu0 %vm689_vm2, %v2720_v8 }
 0x746   : > { %v7948_v34 = vpop.eup %7947  ;;  %7514 = vmatmul.mubr.msk.f32.vlgmr.msra.gmra.mrb[34].mxu1 %vm689_vm2, %v2719_v32  ;;  %7527 = vmatpush3.msra.mxu0 %v3256_v27 }
 0x747   : > { %v7950_v37 = vpop.eup %7949  ;;  %v2722_v47 = vmul.f32 %v7948_v34, %v8814_v28  ;;  %7522 = vmatpush3.msra.mxu1 %v3180_v36  ;;  %7523 = vmatprep.mubr.msk.f32.mxu1 %vm8173_vm1, %v8172_v48  ;;  %v3499_v28 = vpop.permute.xlu0 %3498 }
 0x748   : > { %7528 = vmatprep.mubr.msk.f32.mxu0 %vm8173_vm1, %v8172_v48  ;;  %v2721_v31 = vmul.f32 %v7950_v37, %v8816_v43  ;;  %7792 = vmatprep.subr.msk.bf16.mxu1 %vm3347_vm3, %v674_v33  ;;  %v3497_v43 = vpop.permute.xlu1 %3496 }
 0x749   : > { %7529 = vmatmul.mubr.msk.f32.vlgmr.msra.gmra.mrb[32].mxu0 %vm689_vm2, %v2722_v47  ;;  %7791 = vmatprep.subr.msk.bf16.mxu0 %vm3347_vm3, %v675_v40 }
 0x74a   : > { %7524 = vmatmul.mubr.msk.f32.vlgmr.msra.gmra.mrb[36].mxu1 %vm689_vm2, %v2721_v31  ;;  %7532 = vmatpush3.bf16.msra.mxu0 %v3349_v41 }
 0x74b   : > { %7542 = vmatpush3.bf16.msra.mxu1 %v3429_v35  ;;  %7543 = vmatprep.mubr.msk.bf16.mxu1 %vm689_vm2, %v2007_v42  ;;  %v3577_v56 = vpop.permute.xlu0 %3576 }
 0x74c   : > { %7591 = vmatprep.subr.mxu1 %v8172_v48  ;;  %7551 = vmatprep.subr.mxu0 %v8172_v48  ;;  %v3575_v18 = vpop.permute.xlu1 %3574 }
 0x74e   : > { %7544 = vmatmul.mubr.msk.bf16.vlgmr.msra.gmra.mrb[40].mxu1 %vm689_vm2, %v2008_v51 }
 0x74f   : > { %7547 = vmatprep.mubr.msk.bf16.mxu1 %vm689_vm2, %v2009_v52  ;;  %v3655_v22 = vpop.permute.xlu0 %3654 }
 0x750   : > { %v3653_v23 = vpop.permute.xlu1 %3652 }
 0x753   : > { %v3733_v45 = vpop.permute.xlu0 %3732 }
 0x754   : > { %v3731_v25 = vpop.permute.xlu1 %3730 }
 0x756   : > { %7548 = vmatmul.mubr.msk.bf16.gmra.mrb[44].mxu1 %vm689_vm2, %v2010_v15 }
 0x757   : > { %7593 = vmatprep.mubr.msk.f32.mxu1 %vm8173_vm1, %v8172_v48  ;;  %v3811_v19 = vpop.permute.xlu0 %3810 }
 0x758   : > { %v3809_v20 = vpop.permute.xlu1 %3808 }
 0x75b   : > { %v3889_v30 = vpop.permute.xlu0 %3888 }
 0x75c   : > { %v3887_v26 = vpop.permute.xlu1 %3886 }
 0x75f   : > { %v3967_v6 = vpop.permute.xlu0 %3966 }
 0x760   : > { %v3965_v24 = vpop.permute.xlu1 %3964 }
 0x763   : > { %v4045_v2 = vpop.permute.xlu0 %4044 }
 0x764   : > { %v4043_v8 = vpop.permute.xlu1 %4042 }
 0x7dc   : > { %v2871_v42 = vpop.f32.mrb[26].mxu0 }
 0x7dd   : > { %v7500_v21 = vpop.f32.mrb[27].mxu0 }
 0x80c   : > { %v2795_v44 = vpop.f32.mrb[30].mxu1 }
 0x80d   : > { %v3331_v50 = vpack.c.bf16 %v2871_v42, %v2795_v44  ;;  %v7495_v51 = vpop.f32.mrb[31].mxu1 }
 0x80f   : > { %7533 = vmatprep.mubr.msk.bf16.mxu0 %vm689_vm2, %v3331_v50 }
 0x810   : > { %v2947_v38 = vpop.f32.mrb[32].mxu1 }
 0x811   : > { %v7505_v52 = vpop.f32.mrb[33].mxu1 }
 0x814   : > { %v3023_v54 = vpop.f32.mrb[28].mxu0 }
 0x815   : > { %v3332_v14 = vpack.c.bf16 %v3023_v54, %v2947_v38  ;;  %v7510_v15 = vpop.f32.mrb[29].mxu0 }
 0x817   : > { %7534 = vmatmul.mubr.msk.bf16.vlgmr.msra.gmra.mrb[36].mxu0 %vm689_vm2, %v3332_v14 }
 0x818   : > { %7552 = vmatpush3.xpose.msk.msra.mxu0 %vm689_vm2, %v3499_v28  ;;  %v3175_v29 = vpop.f32.mrb[30].mxu0 }
 0x819   : > { %v3099_v53 = vpop.f32.mrb[34].mxu1  ;;  %v7520_v55 = vpop.f32.mrb[31].mxu0  ;;  %7556 = vmatprep.subr.mxu0 %v8172_v48 }
 0x81a   : > { %v3333_v39 = vpack.c.bf16 %v3175_v29, %v3099_v53  ;;  %v7515_v1 = vpop.f32.mrb[35].mxu1 }
 0x81c   : > { %7537 = vmatprep.mubr.msk.bf16.mxu0 %vm689_vm2, %v3333_v39  ;;  %v3327_v4 = vpop.f32.mrb[32].mxu0 }
 0x81d   : > { %v3251_v57 = vpop.f32.mrb[36].mxu1  ;;  %v7530_v46 = vpop.f32.mrb[33].mxu0 }
 0x81e   : > { %v3334_v10 = vpack.c.bf16 %v3327_v4, %v3251_v57  ;;  %v7525_v11 = vpop.f32.mrb[37].mxu1 }
 0x820   : > { %7538 = vmatmul.mubr.msk.bf16.gmra.mrb[40].mxu0 %vm689_vm2, %v3334_v10 }
 0x821   : > { %7553 = vmatprep.mubr.msk.f32.mxu0 %vm8173_vm1, %v8172_v48 }
 0x828   : > { %7554 = vmatmul.mubr.msk.f32.vlgmr.msra.gmra.mrb[34].mxu0 %vm689_vm2, %v3497_v43 }
 0x829   : > { %7557 = vmatpush3.xpose.msk.msra.mxu0 %vm689_vm2, %v3577_v56  ;;  %7558 = vmatprep.mubr.msk.f32.mxu0 %vm8173_vm1, %v8172_v48 }
 0x82a   : > { %7561 = vmatprep.subr.mxu0 %v8172_v48 }
 0x82c   : > { %7559 = vmatmul.mubr.msk.f32.vlgmr.msra.gmra.mrb[44].mxu0 %vm689_vm2, %v3575_v18 }
 0x82d   : > { %7562 = vmatpush3.xpose.msk.msra.mxu0 %vm689_vm2, %v3655_v22  ;;  %7563 = vmatprep.mubr.msk.f32.mxu0 %vm8173_vm1, %v8172_v48 }
 0x82e   : > { %7566 = vmatprep.subr.mxu0 %v8172_v48 }
 0x830   : > { %7564 = vmatmul.mubr.msk.f32.vlgmr.msra.gmra.mrb[46].mxu0 %vm689_vm2, %v3653_v23 }
 0x831   : > { %7567 = vmatpush3.xpose.msk.msra.mxu0 %vm689_vm2, %v3733_v45  ;;  %7568 = vmatprep.mubr.msk.f32.mxu0 %vm8173_vm1, %v8172_v48 }
 0x832   : > { %7571 = vmatprep.subr.mxu0 %v8172_v48 }
 0x834   : > { %7569 = vmatmul.mubr.msk.f32.vlgmr.msra.gmra.mrb[48].mxu0 %vm689_vm2, %v3731_v25 }
 0x835   : > { %7572 = vmatpush3.xpose.msk.msra.mxu0 %vm689_vm2, %v3811_v19  ;;  %7573 = vmatprep.mubr.msk.f32.mxu0 %vm8173_vm1, %v8172_v48 }
 0x836   : > { %7576 = vmatprep.subr.mxu0 %v8172_v48 }
 0x838   : > { %7574 = vmatmul.mubr.msk.f32.vlgmr.msra.gmra.mrb[50].mxu0 %vm689_vm2, %v3809_v20 }
 0x839   : > { %7577 = vmatpush3.xpose.msk.msra.mxu0 %vm689_vm2, %v3889_v30  ;;  %7578 = vmatprep.mubr.msk.f32.mxu0 %vm8173_vm1, %v8172_v48 }
 0x83a   : > { %7581 = vmatprep.subr.mxu0 %v8172_v48 }
 0x83c   : > { %7579 = vmatmul.mubr.msk.f32.vlgmr.msra.gmra.mrb[52].mxu0 %vm689_vm2, %v3887_v26 }
 0x83d   : > { %7582 = vmatpush3.xpose.msk.msra.mxu0 %vm689_vm2, %v3967_v6  ;;  %7583 = vmatprep.mubr.msk.f32.mxu0 %vm8173_vm1, %v8172_v48 }
 0x83e   : > { %7586 = vmatprep.subr.mxu0 %v8172_v48 }
 0x840   : > { %7584 = vmatmul.mubr.msk.f32.vlgmr.msra.gmra.mrb[54].mxu0 %vm689_vm2, %v3965_v24 }
 0x841   : > { %7587 = vmatpush3.xpose.msk.msra.mxu0 %vm689_vm2, %v4045_v2  ;;  %7588 = vmatprep.mubr.msk.f32.mxu0 %vm8173_vm1, %v8172_v48 }
 0x842   : > { %7596 = vmatprep.subr.mxu0 %v8172_v48 }
 0x844   : > { %7589 = vmatmul.mubr.msk.f32.vlgmr.msra.gmra.mrb[56].mxu0 %vm689_vm2, %v4043_v8 }
 0x845   : > { %7598 = vmatprep.mubr.msk.f32.mxu0 %vm8173_vm1, %v8172_v48 }
 0x8ea   : > { %v8950_v32 = vpop.f32.mrb[36].mxu0 }
 0x8eb   : > { %v8952_v27 = vpop.f32.mrb[37].mxu0 }
 0x8ec   : > { %v8954_v33 = vpop.f32.mrb[38].mxu0 }
 0x8ed   : > { %v8956_v34 = vpop.f32.mrb[39].mxu0 }
 0x8f3   : > { %v8958_v36 = vpop.f32.mrb[40].mxu0 }
 0x8f4   : > { %v8960_v37 = vpop.f32.mrb[41].mxu0 }
 0x8f5   : > { %v8962_v47 = vpop.f32.mrb[42].mxu0 }
 0x8f6   : > { %v8964_v31 = vpop.f32.mrb[43].mxu0 }
 0x8fb   : > { %v3570_v35 = vpop.f32.mrb[34].mxu0 }
 0x8fc   : > { %v7555_v40 = vpop.f32.mrb[35].mxu0  ;;  %v4120_v41 = vsel %vm689_vm2, %v3570_v35, -inf }
 0x8fd   : > { %4121 = vmax.xlane.f32.xlu0 %v4120_v41 }
 0x8ff   : > { %v3648_v42 = vpop.f32.mrb[44].mxu0 }
 0x900   : > { %v7560_v21 = vpop.f32.mrb[45].mxu0  ;;  %v4123_v44 = vsel %vm689_vm2, %v3648_v42, -inf }
 0x901   : > { %4124 = vmax.xlane.f32.xlu1 %v4123_v44 }
 0x903   : > { %v3726_v50 = vpop.f32.mrb[46].mxu0 }
 0x904   : > { %v7565_v51 = vpop.f32.mrb[47].mxu0  ;;  %v4126_v38 = vsel %vm689_vm2, %v3726_v50, -inf }
 0x905   : > { %4127 = vmax.xlane.f32.xlu0 %v4126_v38 }
 0x907   : > { %v3804_v52 = vpop.f32.mrb[48].mxu0 }
 0x908   : > { %v7570_v54 = vpop.f32.mrb[49].mxu0  ;;  %v4129_v14 = vsel %vm689_vm2, %v3804_v52, -inf }
 0x909   : > { %4130 = vmax.xlane.f32.xlu0 %v4129_v14 }
 0x90b   : > { %v3882_v15 = vpop.f32.mrb[50].mxu0 }
 0x90c   : > { %v7575_v28 = vpop.f32.mrb[51].mxu0  ;;  %v4132_v43 = vsel %vm689_vm2, %v3882_v15, -inf }
 0x90d   : > { %4133 = vmax.xlane.f32.xlu0 %v4132_v43 }
 0x90f   : > { %v3960_v29 = vpop.f32.mrb[52].mxu0 }
 0x910   : > { %v7580_v53 = vpop.f32.mrb[53].mxu0  ;;  %v4135_v55 = vsel %vm689_vm2, %v3960_v29, -inf }
 0x911   : > { %4136 = vmax.xlane.f32.xlu1 %v4135_v55 }
 0x913   : > { %v4038_v39 = vpop.f32.mrb[54].mxu0 }
 0x914   : > { %v7585_v1 = vpop.f32.mrb[55].mxu0  ;;  %v4138_v56 = vsel %vm689_vm2, %v4038_v39, -inf }
 0x915   : > { %4139 = vmax.xlane.f32.xlu0 %v4138_v56 }
 0x917   : > { %v4116_v4 = vpop.f32.mrb[56].mxu0 }
 0x918   : > { %v7590_v57 = vpop.f32.mrb[57].mxu0  ;;  %v4141_v46 = vsel %vm689_vm2, %v4116_v4, -inf }
 0x919   : > { %4142 = vmax.xlane.f32.xlu1 %v4141_v46 }
 0x92a   : > { %4284 = vrot.lane.b32.xlu1 %v8463_v60, %s8181_s27 }
 0x92b   : > { %4208 = vrot.lane.b32.xlu0 %v8458_v58, %s8181_s27 }
 0x92e   : > { %4360 = vrot.lane.b32.xlu1 %v8456_v49, %s8181_s27 }
 0x92f   : > { %4512 = vrot.lane.b32.xlu0 %v8469_v62, %s8181_s27 }
 0x932   : > { %4436 = vrot.lane.b32.xlu1 %v8461_v59, %s8181_s27 }
 0x936   : > { %4588 = vrot.lane.b32.xlu1 %v8474_v0, %s8181_s27 }
 0x98a   : > { %v4122_v10 = vpop.xlane.xlu0 %4121 }
 0x98b   : > { %v4144_v11 = vsub.f32 %v3570_v35, %v4122_v10 }
 0x98d   : > { %v4152_v18 = vmul.f32 1.442695, %v4144_v11 }
 0x98e   : > { %v4125_v22 = vpop.xlane.xlu1 %4124 }
 0x98f   : > { %7951 = vpow2.f32 %v4152_v18  ;;  %v4145_v23 = vsub.f32 %v3648_v42, %v4125_v22 }
 0x991   : > { %v4154_v45 = vmul.f32 1.442695, %v4145_v23 }
 0x992   : > { %v4128_v25 = vpop.xlane.xlu0 %4127 }
 0x993   : > { %7953 = vpow2.f32 %v4154_v45  ;;  %v4146_v19 = vsub.f32 %v3726_v50, %v4128_v25 }
 0x995   : > { %v4156_v20 = vmul.f32 1.442695, %v4146_v19 }
 0x996   : > { %v4131_v30 = vpop.xlane.xlu0 %4130 }
 0x997   : > { %7955 = vpow2.f32 %v4156_v20  ;;  %v4147_v26 = vsub.f32 %v3804_v52, %v4131_v30 }
 0x999   : > { %v8986_v6 = vpop.eup %7951  ;;  %v4158_v24 = vmul.f32 1.442695, %v4147_v26 }
 0x99a   : > { %v4134_v2 = vpop.xlane.xlu0 %4133  ;;  %v4168_v8 = vsel %vm689_vm2, %v8986_v6, 0.0 }
 0x99b   : > { %7957 = vpow2.f32 %v4158_v24  ;;  %v4148_v35 = vsub.f32 %v3882_v15, %v4134_v2  ;;  %4169 = vadd.xlane.f32.xlu0 %v4168_v8 }
 0x99d   : > { %v8990_v40 = vpop.eup %7953  ;;  %v4160_v41 = vmul.f32 1.442695, %v4148_v35 }
 0x99e   : > { %v4137_v42 = vpop.xlane.xlu1 %4136  ;;  %v4171_v21 = vsel %vm689_vm2, %v8990_v40, 0.0 }
 0x99f   : > { %7959 = vpow2.f32 %v4160_v41  ;;  %v4149_v44 = vsub.f32 %v3960_v29, %v4137_v42  ;;  %4172 = vadd.xlane.f32.xlu1 %v4171_v21 }
 0x9a1   : > { %v8994_v50 = vpop.eup %7955  ;;  %v4162_v51 = vmul.f32 1.442695, %v4149_v44 }
 0x9a2   : > { %v4140_v38 = vpop.xlane.xlu0 %4139  ;;  %v4174_v52 = vsel %vm689_vm2, %v8994_v50, 0.0 }
 0x9a3   : > { %7961 = vpow2.f32 %v4162_v51  ;;  %v4150_v54 = vsub.f32 %v4038_v39, %v4140_v38  ;;  %4175 = vadd.xlane.f32.xlu0 %v4174_v52 }
 0x9a5   : > { %v8998_v14 = vpop.eup %7957  ;;  %v4164_v15 = vmul.f32 1.442695, %v4150_v54 }
 0x9a6   : > { %v4143_v28 = vpop.xlane.xlu1 %4142  ;;  %v4209_v43 = vpop.permute.xlu0 %4208  ;;  %v4177_v53 = vsel %vm689_vm2, %v8998_v14, 0.0 }
 0x9a7   : > { %7963 = vpow2.f32 %v4164_v15  ;;  %v4151_v29 = vsub.f32 %v4116_v4, %v4143_v28  ;;  %4178 = vadd.xlane.f32.xlu1 %v4177_v53  ;;  %7592 = vmatpush3.msra.mxu1 %v4209_v43 }
 0x9a8   : > { %7601 = vmatprep.subr.mxu1 %v8172_v48 }
 0x9a9   : > { %v9003_v55 = vpop.eup %7959  ;;  %v4166_v1 = vmul.f32 1.442695, %v4151_v29 }
 0x9aa   : > { %v4285_v56 = vpop.permute.xlu1 %4284  ;;  %v4180_v39 = vsel %vm689_vm2, %v9003_v55, 0.0 }
 0x9ab   : > { %7965 = vpow2.f32 %v4166_v1  ;;  %7597 = vmatpush3.msra.mxu0 %v4285_v56  ;;  %4181 = vadd.xlane.f32.xlu0 %v4180_v39 }
 0x9ac   : > { %7606 = vmatprep.subr.mxu0 %v8172_v48 }
 0x9ad   : > { %v9008_v57 = vpop.eup %7961 }
 0x9ae   : > { %v4183_v4 = vsel %vm689_vm2, %v9008_v57, 0.0 }
 0x9af   : > { %4184 = vadd.xlane.f32.xlu1 %v4183_v4  ;;  %v676_v4 = vld [vmem:[%s9533_s4 + $0x8] sm:$0xf] }
 0x9b1   : > { %v9012_v46 = vpop.eup %7963 }
 0x9b2   : > { %v4186_v10 = vsel %vm689_vm2, %v9012_v46, 0.0 }
 0x9b3   : > { %4187 = vadd.xlane.f32.xlu0 %v4186_v10 }
 0x9b5   : > { %v9016_v11 = vpop.eup %7965 }
 0x9b6   : > { %v4189_v18 = vsel %vm689_vm2, %v9016_v11, 0.0 }
 0x9b7   : > { %4190 = vadd.xlane.f32.xlu1 %v4189_v18 }
 0x9c8   : > { %4740 = vrot.lane.b32.xlu1 %v8472_v63, %s8181_s27 }
 0x9c9   : > { %4664 = vrot.lane.b32.xlu0 %v8467_v61, %s8181_s27  ;;  %s7186_s27 = sshll.u32 %s8275_s25, 10  ;;  %s6946_s25 = scalar_lea.sflag [#allocation4], %s8358_s26 }
 0x9cc   : > { %4908 = vrot.lane.b32.xlu1 %v8488_v3, %s8182_s30  ;;  %v4361_v3 = vpop.permute.xlu1 %4360 }
 0x9cd   : > { %4910 = vrot.lane.b32.xlu0 %v8458_v58, %s8183_s14 }
 0x9d0   : > { %4986 = vrot.lane.b32.xlu1 %v8497_v5, %s8182_s30  ;;  %v4437_v5 = vpop.permute.xlu1 %4436 }
 0x9d1   : > { %4988 = vrot.lane.b32.xlu0 %v8463_v60, %s8183_s14 }
 0x9d4   : > { %5064 = vrot.lane.b32.xlu1 %v8506_v7, %s8182_s30  ;;  %v4513_v7 = vpop.permute.xlu0 %4512 }
 0x9d5   : > { %5066 = vrot.lane.b32.xlu0 %v8456_v49, %s8183_s14 }
 0x9d8   : > { %5142 = vrot.lane.b32.xlu1 %v8515_v9, %s8182_s30  ;;  %v4589_v9 = vpop.permute.xlu1 %4588 }
 0x9d9   : > { %5144 = vrot.lane.b32.xlu0 %v8461_v59, %s8183_s14 }
 0x9dc   : > { %5300 = vrot.lane.b32.xlu1 %v8474_v0, %s8183_s14 }
 0x9dd   : > { %5222 = vrot.lane.b32.xlu0 %v8469_v62, %s8183_s14 }
 0x9e0   : > { %5298 = vrot.lane.b32.xlu1 %v8540_v16, %s8182_s30 }
 0x9e1   : > { %5220 = vrot.lane.b32.xlu0 %v8524_v12, %s8182_s30 }
 0x9e4   : > { %5456 = vrot.lane.b32.xlu1 %v8472_v63, %s8183_s14 }
 0x9e5   : > { %5378 = vrot.lane.b32.xlu0 %v8467_v61, %s8183_s14  ;;  %s9479_s14 = scalar_lea.hbm %s9541_s12, %s7186_s27 }
 0x9e8   : > { %5454 = vrot.lane.b32.xlu1 %v8531_v13, %s8182_s30 }
 0x9e9   : > { %5376 = vrot.lane.b32.xlu0 %v8552_v17, %s8182_s30 }
 0xa28   : > { %v4170_v22 = vpop.xlane.xlu0 %4169 }
 0xa29   : > { %7967 = vrcp.f32 %v4170_v22 }
 0xa2c   : > { %v4173_v23 = vpop.xlane.xlu1 %4172 }
 0xa2d   : > { %7969 = vrcp.f32 %v4173_v23 }
 0xa30   : > { %v4176_v45 = vpop.xlane.xlu0 %4175 }
 0xa31   : > { %7971 = vrcp.f32 %v4176_v45 }
 0xa33   : > { %v7968_v16 = vpop.eup %7967 }
 0xa34   : > { %v4200_v12 = vmul.f32 %v7968_v16, %v8986_v6  ;;  %v4179_v25 = vpop.xlane.xlu1 %4178 }
 0xa35   : > { %7973 = vrcp.f32 %v4179_v25 }
 0xa36   : > { %7594 = vmatmul.mubr.msk.f32.vlgmr.msra.gmra.mrb[38].mxu1 %vm689_vm2, %v4200_v12 }
 0xa37   : > { %v7970_v13 = vpop.eup %7969  ;;  %7602 = vmatpush3.msra.mxu1 %v4361_v3  ;;  %7603 = vmatprep.mubr.msk.f32.mxu1 %vm8173_vm1, %v8172_v48 }
 0xa38   : > { %v4201_v17 = vmul.f32 %v7970_v13, %v8990_v40  ;;  %v4182_v19 = vpop.xlane.xlu0 %4181  ;;  %7611 = vmatprep.subr.mxu1 %v8172_v48 }
 0xa39   : > { %7975 = vrcp.f32 %v4182_v19 }
 0xa3a   : > { %7599 = vmatmul.mubr.msk.f32.vlgmr.msra.gmra.mrb[58].mxu0 %vm689_vm2, %v4201_v17 }
 0xa3b   : > { %v7972_v20 = vpop.eup %7971  ;;  %7607 = vmatpush3.msra.mxu0 %v4437_v5  ;;  %7608 = vmatprep.mubr.msk.f32.mxu0 %vm8173_vm1, %v8172_v48 }
 0xa3c   : > { %v4202_v30 = vmul.f32 %v7972_v20, %v8994_v50  ;;  %v4185_v26 = vpop.xlane.xlu1 %4184  ;;  %7616 = vmatprep.subr.mxu0 %v8172_v48 }
 0xa3d   : > { %7977 = vrcp.f32 %v4185_v26 }
 0xa3e   : > { %7604 = vmatmul.mubr.msk.f32.vlgmr.msra.gmra.mrb[48].mxu1 %vm689_vm2, %v4202_v30 }
 0xa3f   : > { %v7974_v6 = vpop.eup %7973  ;;  %7612 = vmatpush3.msra.mxu1 %v4513_v7  ;;  %7613 = vmatprep.mubr.msk.f32.mxu1 %vm8173_vm1, %v8172_v48 }
 0xa40   : > { %v4203_v24 = vmul.f32 %v7974_v6, %v8998_v14  ;;  %v4188_v2 = vpop.xlane.xlu0 %4187  ;;  %7621 = vmatprep.subr.mxu1 %v8172_v48 }
 0xa41   : > { %7979 = vrcp.f32 %v4188_v2 }
 0xa42   : > { %7609 = vmatmul.mubr.msk.f32.vlgmr.msra.gmra.mrb[60].mxu0 %vm689_vm2, %v4203_v24 }
 0xa43   : > { %v7976_v8 = vpop.eup %7975  ;;  %7617 = vmatpush3.msra.mxu0 %v4589_v9  ;;  %7618 = vmatprep.mubr.msk.f32.mxu0 %vm8173_vm1, %v8172_v48 }
 0xa44   : > { %v4204_v35 = vmul.f32 %v7976_v8, %v9003_v55  ;;  %v4191_v40 = vpop.xlane.xlu1 %4190  ;;  %v4665_v41 = vpop.permute.xlu0 %4664  ;;  %7626 = vmatprep.subr.mxu0 %v8172_v48 }
 0xa45   : > { %7981 = vrcp.f32 %v4191_v40 }
 0xa46   : > { %7614 = vmatmul.mubr.msk.f32.vlgmr.msra.gmra.mrb[50].mxu1 %vm689_vm2, %v4204_v35 }
 0xa47   : > { %v7978_v42 = vpop.eup %7977  ;;  %7622 = vmatpush3.msra.mxu1 %v4665_v41  ;;  %7623 = vmatprep.mubr.msk.f32.mxu1 %vm8173_vm1, %v8172_v48 }
 0xa48   : > { %v4205_v21 = vmul.f32 %v7978_v42, %v9008_v57  ;;  %v4741_v44 = vpop.permute.xlu1 %4740  ;;  %v4911_v38 = vpop.permute.xlu0 %4910  ;;  %7793 = vmatprep.subr.msk.bf16.mxu1 %vm3347_vm3, %v676_v4 }
 0xa4a   : > { %7619 = vmatmul.mubr.msk.f32.vlgmr.msra.gmra.mrb[62].mxu0 %vm689_vm2, %v4205_v21 }
 0xa4b   : > { %v7980_v50 = vpop.eup %7979  ;;  %7627 = vmatpush3.msra.mxu0 %v4741_v44  ;;  %7628 = vmatprep.mubr.msk.f32.mxu0 %vm8173_vm1, %v8172_v48 }
 0xa4c   : > { %v4206_v51 = vmul.f32 %v7980_v50, %v9012_v46  ;;  %v4909_v52 = vpop.permute.xlu1 %4908  ;;  %7641 = vmatprep.subr.mxu0 %v8172_v48  ;;  %v4989_v28 = vpop.permute.xlu0 %4988  ;;  %v4833_v46 = vsel %vm3347_vm3, %v676_v4, 0 }
 0xa4e   : > { %7624 = vmatmul.mubr.msk.f32.vlgmr.msra.gmra.mrb[52].mxu1 %vm689_vm2, %v4206_v51 }
 0xa4f   : > { %v7982_v54 = vpop.eup %7981  ;;  %7632 = vmatpush3.bf16.msra.mxu1 %v4833_v46 }
 0xa50   : > { %v4207_v14 = vmul.f32 %v7982_v54, %v9016_v11  ;;  %v4987_v15 = vpop.permute.xlu1 %4986  ;;  %v5067_v53 = vpop.permute.xlu0 %5066  ;;  %7661 = vmatprep.subr.mxu1 %v8172_v48 }
 0xa52   : > { %7629 = vmatmul.mubr.msk.f32.vlgmr.msra.gmra.mrb[64].mxu0 %vm689_vm2, %v4207_v14 }
 0xa53   : > { %7642 = vmatpush3.xpose.msk.msra.mxu0 %vm689_vm2, %v4911_v38  ;;  %7643 = vmatprep.mubr.msk.f32.mxu0 %vm8173_vm1, %v8172_v48 }
 0xa54   : > { %v5065_v43 = vpop.permute.xlu1 %5064  ;;  %7646 = vmatprep.subr.mxu0 %v8172_v48  ;;  %v5145_v1 = vpop.permute.xlu0 %5144 }
 0xa56   : > { %7644 = vmatmul.mubr.msk.f32.vlgmr.msra.gmra.mrb[66].mxu0 %vm689_vm2, %v4909_v52 }
 0xa57   : > { %7647 = vmatpush3.xpose.msk.msra.mxu0 %vm689_vm2, %v4989_v28  ;;  %7648 = vmatprep.mubr.msk.f32.mxu0 %vm8173_vm1, %v8172_v48 }
 0xa58   : > { %v5143_v29 = vpop.permute.xlu1 %5142  ;;  %7651 = vmatprep.subr.mxu0 %v8172_v48  ;;  %v5223_v16 = vpop.permute.xlu0 %5222 }
 0xa5a   : > { %7649 = vmatmul.mubr.msk.f32.vlgmr.msra.gmra.mrb[68].mxu0 %vm689_vm2, %v4987_v15 }
 0xa5b   : > { %7652 = vmatpush3.xpose.msk.msra.mxu0 %vm689_vm2, %v5067_v53  ;;  %7653 = vmatprep.mubr.msk.f32.mxu0 %vm8173_vm1, %v8172_v48 }
 0xa5c   : > { %v5301_v55 = vpop.permute.xlu1 %5300  ;;  %7656 = vmatprep.subr.mxu0 %v8172_v48  ;;  %v5221_v2 = vpop.permute.xlu0 %5220 }
 0xa5e   : > { %7654 = vmatmul.mubr.msk.f32.vlgmr.msra.gmra.mrb[70].mxu0 %vm689_vm2, %v5065_v43 }
 0xa5f   : > { %7657 = vmatpush3.xpose.msk.msra.mxu0 %vm689_vm2, %v5145_v1  ;;  %7658 = vmatprep.mubr.msk.f32.mxu0 %vm8173_vm1, %v8172_v48 }
 0xa60   : > { %v5299_v56 = vpop.permute.xlu1 %5298  ;;  %7666 = vmatprep.subr.mxu0 %v8172_v48  ;;  %v5379_v41 = vpop.permute.xlu0 %5378 }
 0xa62   : > { %7659 = vmatmul.mubr.msk.f32.vlgmr.msra.gmra.mrb[72].mxu0 %vm689_vm2, %v5143_v29 }
 0xa63   : > { %7667 = vmatpush3.xpose.msk.msra.mxu0 %vm689_vm2, %v5301_v55  ;;  %7668 = vmatprep.mubr.msk.f32.mxu0 %vm8173_vm1, %v8172_v48 }
 0xa64   : > { %v5457_v39 = vpop.permute.xlu1 %5456  ;;  %7676 = vmatprep.subr.mxu0 %v8172_v48  ;;  %v5377_v52 = vpop.permute.xlu0 %5376 }
 0xa66   : > { %7669 = vmatmul.mubr.msk.f32.vlgmr.msra.gmra.mrb[74].mxu0 %vm689_vm2, %v5299_v56 }
 0xa67   : > { %7677 = vmatpush3.xpose.msk.msra.mxu0 %vm689_vm2, %v5457_v39  ;;  %7678 = vmatprep.mubr.msk.f32.mxu0 %vm8173_vm1, %v8172_v48 }
 0xa68   : > { %v5455_v57 = vpop.permute.xlu1 %5454  ;;  %7686 = vmatprep.subr.mxu0 %v8172_v48 }
 0xa6a   : > { %7679 = vmatmul.mubr.msk.f32.vlgmr.msra.gmra.mrb[76].mxu0 %vm689_vm2, %v5455_v57 }
 0xa6b   : > { %7688 = vmatprep.mubr.msk.f32.mxu0 %vm8173_vm1, %v8172_v48 }
 0xb09   : > { %v4280_v10 = vpop.f32.mrb[38].mxu1 }
 0xb0a   : > { %v7595_v11 = vpop.f32.mrb[39].mxu1 }
 0xb0d   : > { %v4356_v18 = vpop.f32.mrb[58].mxu0 }
 0xb0e   : > { %v4816_v3 = vpack.c.bf16 %v4356_v18, %v4280_v10  ;;  %v7600_v5 = vpop.f32.mrb[59].mxu0 }
 0xb10   : > { %7633 = vmatprep.mubr.msk.bf16.mxu1 %vm689_vm2, %v4816_v3 }
 0xb11   : > { %v4432_v7 = vpop.f32.mrb[48].mxu1 }
 0xb12   : > { %v7605_v9 = vpop.f32.mrb[49].mxu1 }
 0xb15   : > { %v4508_v22 = vpop.f32.mrb[60].mxu0 }
 0xb16   : > { %v4817_v23 = vpack.c.bf16 %v4508_v22, %v4432_v7  ;;  %v7610_v45 = vpop.f32.mrb[61].mxu0 }
 0xb18   : > { %7634 = vmatmul.mubr.msk.bf16.vlgmr.msra.gmra.mrb[40].mxu1 %vm689_vm2, %v4817_v23 }
 0xb19   : > { %7662 = vmatpush3.xpose.msk.msra.mxu1 %vm689_vm2, %v5223_v16  ;;  %v4584_v12 = vpop.f32.mrb[50].mxu1 }
 0xb1a   : > { %v7615_v25 = vpop.f32.mrb[51].mxu1  ;;  %7671 = vmatprep.subr.mxu1 %v8172_v48 }
 0xb1d   : > { %v4660_v13 = vpop.f32.mrb[62].mxu0 }
 0xb1e   : > { %v4818_v17 = vpack.c.bf16 %v4660_v13, %v4584_v12  ;;  %v7620_v19 = vpop.f32.mrb[63].mxu0 }
 0xb20   : > { %7637 = vmatprep.mubr.msk.bf16.mxu1 %vm689_vm2, %v4818_v17 }
 0xb21   : > { %v4736_v20 = vpop.f32.mrb[52].mxu1 }
 0xb22   : > { %v7625_v30 = vpop.f32.mrb[53].mxu1 }
 0xb25   : > { %v4812_v26 = vpop.f32.mrb[64].mxu0 }
 0xb26   : > { %v4819_v6 = vpack.c.bf16 %v4812_v26, %v4736_v20  ;;  %v7630_v24 = vpop.f32.mrb[65].mxu0 }
 0xb28   : > { %7638 = vmatmul.mubr.msk.bf16.gmra.mrb[44].mxu1 %vm689_vm2, %v4819_v6 }
 0xb29   : > { %v9117_v8 = vpop.f32.mrb[66].mxu0  ;;  %7663 = vmatprep.mubr.msk.f32.mxu1 %vm8173_vm1, %v8172_v48 }
 0xb2a   : > { %v7645_v35 = vpop.f32.mrb[67].mxu0  ;;  %v5532_v40 = vsel %vm689_vm2, %v9117_v8, -inf }
 0xb2b   : > { %5533 = vmax.xlane.f32.xlu0 %v5532_v40 }
 0xb2d   : > { %v5060_v42 = vpop.f32.mrb[68].mxu0 }
 0xb2e   : > { %v7650_v21 = vpop.f32.mrb[69].mxu0  ;;  %v5535_v44 = vsel %vm689_vm2, %v5060_v42, -inf }
 0xb2f   : > { %5536 = vmax.xlane.f32.xlu1 %v5535_v44 }
 0xb30   : > { %7664 = vmatmul.mubr.msk.f32.vlgmr.msra.gmra.mrb[54].mxu1 %vm689_vm2, %v5221_v2 }
 0xb31   : > { %7672 = vmatpush3.xpose.msk.msra.mxu1 %vm689_vm2, %v5379_v41  ;;  %v5138_v50 = vpop.f32.mrb[70].mxu0  ;;  %7673 = vmatprep.mubr.msk.f32.mxu1 %vm8173_vm1, %v8172_v48 }
 0xb32   : > { %v7655_v51 = vpop.f32.mrb[71].mxu0  ;;  %v5538_v38 = vsel %vm689_vm2, %v5138_v50, -inf  ;;  %7681 = vmatprep.subr.mxu1 %v8172_v48 }
 0xb33   : > { %5539 = vmax.xlane.f32.xlu0 %v5538_v38 }
 0xb34   : > { %7674 = vmatmul.mubr.msk.f32.vlgmr.msra.gmra.mrb[56].mxu1 %vm689_vm2, %v5377_v52 }
 0xb35   : > { %v5216_v54 = vpop.f32.mrb[72].mxu0  ;;  %7683 = vmatprep.mubr.msk.f32.mxu1 %vm8173_vm1, %v8172_v48 }
 0xb36   : > { %v7660_v14 = vpop.f32.mrb[73].mxu0  ;;  %v5541_v15 = vsel %vm689_vm2, %v5216_v54, -inf }
 0xb37   : > { %5542 = vmax.xlane.f32.xlu0 %v5541_v15 }
 0xb39   : > { %v5372_v28 = vpop.f32.mrb[74].mxu0 }
 0xb3a   : > { %v7670_v43 = vpop.f32.mrb[75].mxu0  ;;  %v5547_v53 = vsel %vm689_vm2, %v5372_v28, -inf }
 0xb3b   : > { %5548 = vmax.xlane.f32.xlu1 %v5547_v53 }
 0xb3d   : > { %v5528_v29 = vpop.f32.mrb[76].mxu0 }
 0xb3e   : > { %v7680_v55 = vpop.f32.mrb[77].mxu0  ;;  %v5553_v1 = vsel %vm689_vm2, %v5528_v29, -inf }
 0xb3f   : > { %5554 = vmax.xlane.f32.xlu1 %v5553_v1 }
 0xbb8   : > { %v5534_v56 = vpop.xlane.xlu0 %5533 }
 0xbb9   : > { %v5556_v39 = vsub.f32 %v9117_v8, %v5534_v56 }
 0xbbb   : > { %v5564_v6 = vmul.f32 1.442695, %v5556_v39 }
 0xbbc   : > { %v5537_v57 = vpop.xlane.xlu1 %5536 }
 0xbbd   : > { %v5557_v4 = vsub.f32 %v5060_v42, %v5537_v57 }
 0xbbf   : > { %v5566_v46 = vmul.f32 1.442695, %v5557_v4 }
 0xbc0   : > { %v5540_v10 = vpop.xlane.xlu0 %5539 }
 0xbc1   : > { %7983 = vpow2.f32 %v5566_v46  ;;  %v5558_v11 = vsub.f32 %v5138_v50, %v5540_v10 }
 0xbc3   : > { %v5568_v24 = vmul.f32 1.442695, %v5558_v11 }
 0xbc4   : > { %v5543_v18 = vpop.xlane.xlu0 %5542 }
 0xbc5   : > { %v5559_v3 = vsub.f32 %v5216_v54, %v5543_v18 }
 0xbc7   : > { %v5570_v5 = vmul.f32 1.442695, %v5559_v3 }
 0xbc8   : > { %v5549_v7 = vpop.xlane.xlu1 %5548 }
 0xbc9   : > { %7985 = vpow2.f32 %v5570_v5  ;;  %v5561_v9 = vsub.f32 %v5372_v28, %v5549_v7 }
 0xbcb   : > { %v7984_v22 = vpop.eup %7983  ;;  %v5574_v23 = vmul.f32 1.442695, %v5561_v9 }
 0xbcc   : > { %v5555_v45 = vpop.xlane.xlu1 %5554  ;;  %v5583_v16 = vsel %vm689_vm2, %v7984_v22, 0.0 }
 0xbcd   : > { %7987 = vpow2.f32 %v5574_v23  ;;  %v5563_v12 = vsub.f32 %v5528_v29, %v5555_v45  ;;  %5584 = vadd.xlane.f32.xlu1 %v5583_v16 }
 0xbcf   : > { %v5578_v25 = vmul.f32 1.442695, %v5563_v12 }
 0xbd1   : > { %7989 = vpow2.f32 %v5578_v25 }
 0xbd2   : > { %7991 = vpow2.f32 %v5564_v6 }
 0xbd3   : > { %v7986_v13 = vpop.eup %7985  ;;  %7993 = vpow2.f32 %v5568_v24 }
 0xbd4   : > { %v5589_v17 = vsel %vm689_vm2, %v7986_v13, 0.0 }
 0xbd5   : > { %5590 = vadd.xlane.f32.xlu1 %v5589_v17 }
 0xbd7   : > { %v7988_v19 = vpop.eup %7987 }
 0xbd8   : > { %v5595_v20 = vsel %vm689_vm2, %v7988_v19, 0.0 }
 0xbd9   : > { %5596 = vadd.xlane.f32.xlu1 %v5595_v20  ;;  %v677_v20 = vld [vmem:[%s9533_s4 + $0xc] sm:$0xf] }
 0xbdb   : > { %v7990_v30 = vpop.eup %7989 }
 0xbdc   : > { %v5601_v26 = vsel %vm689_vm2, %v7990_v30, 0.0 }
 0xbdd   : > { %5602 = vadd.xlane.f32.xlu1 %v5601_v26 }
 0xbee   : > { %5696 = vrot.lane.b32.xlu1 %v8463_v60, %s8184_s20 }
 0xbf2   : > { %5772 = vrot.lane.b32.xlu1 %v8456_v49, %s8184_s20 }
 0xbf6   : > { %5848 = vrot.lane.b32.xlu1 %v8461_v59, %s8184_s20  ;;  %v9153_v59 = vpop.eup %7991 }
 0xbf7   : > { %v9157_v41 = vpop.eup %7993 }
 0xbfa   : > { %6000 = vrot.lane.b32.xlu1 %v8474_v0, %s8184_s20  ;;  %v5580_v0 = vsel %vm689_vm2, %v9153_v59, 0.0 }
 0xbfe   : > { %6152 = vrot.lane.b32.xlu1 %v8472_v63, %s8184_s20  ;;  %v5586_v63 = vsel %vm689_vm2, %v9157_v41, 0.0 }
 0xc03   : > { %v5294_v2 = vpop.f32.mrb[54].mxu1 }
 0xc04   : > { %v7665_v8 = vpop.f32.mrb[55].mxu1  ;;  %v5544_v60 = vsel %vm689_vm2, %v5294_v2, -inf }
 0xc05   : > { %5545 = vmax.xlane.f32.xlu0 %v5544_v60 }
 0xc07   : > { %v5450_v35 = vpop.f32.mrb[56].mxu1 }
 0xc08   : > { %v7675_v49 = vpop.f32.mrb[57].mxu1  ;;  %v5550_v40 = vsel %vm689_vm2, %v5450_v35, -inf }
 0xc09   : > { %5551 = vmax.xlane.f32.xlu0 %v5550_v40 }
 0xc0d   : > { %5581 = vadd.xlane.f32.xlu0 %v5580_v0 }
 0xc11   : > { %5587 = vadd.xlane.f32.xlu0 %v5586_v63 }
 0xc27   : > { %5620 = vrot.lane.b32.xlu0 %v8458_v58, %s8184_s20 }
 0xc2b   : > { %5924 = vrot.lane.b32.xlu0 %v8469_v62, %s8184_s20 }
 0xc5a   : > { %v5585_v42 = vpop.xlane.xlu1 %5584 }
 0xc5b   : > { %7995 = vrcp.f32 %v5585_v42 }
 0xc62   : > { %v5591_v21 = vpop.xlane.xlu1 %5590 }
 0xc63   : > { %7997 = vrcp.f32 %v5591_v21 }
 0xc65   : > { %v7996_v51 = vpop.eup %7995 }
 0xc66   : > { %v5597_v44 = vpop.xlane.xlu1 %5596  ;;  %v5613_v38 = vmul.f32 %v7996_v51, %v7984_v22 }
 0xc67   : > { %7999 = vrcp.f32 %v5597_v44 }
 0xc6a   : > { %v5603_v50 = vpop.xlane.xlu1 %5602 }
 0xc6b   : > { %8001 = vrcp.f32 %v5603_v50 }
 0xc6d   : > { %v7998_v62 = vpop.eup %7997 }
 0xc6e   : > { %v5697_v52 = vpop.permute.xlu1 %5696  ;;  %v5615_v54 = vmul.f32 %v7998_v62, %v7986_v13 }
 0xc6f   : > { %7687 = vmatpush3.msra.mxu0 %v5697_v52 }
 0xc70   : > { %7689 = vmatmul.mubr.msk.f32.vlgmr.msra.gmra.mrb[78].mxu0 %vm689_vm2, %v5613_v38  ;;  %7696 = vmatprep.subr.mxu0 %v8172_v48 }
 0xc71   : > { %7698 = vmatprep.mubr.msk.f32.mxu0 %vm8173_vm1, %v8172_v48  ;;  %v8000_v15 = vpop.eup %7999 }
 0xc72   : > { %v5773_v58 = vpop.permute.xlu1 %5772  ;;  %v5617_v28 = vmul.f32 %v8000_v15, %v7988_v19 }
 0xc75   : > { %v8002_v53 = vpop.eup %8001 }
 0xc76   : > { %v5849_v14 = vpop.permute.xlu1 %5848  ;;  %v5619_v29 = vmul.f32 %v8002_v53, %v7990_v30 }
 0xc77   : > { %7697 = vmatpush3.msra.mxu0 %v5849_v14  ;;  %v7161_v14 = vld [vmem:[%s9534_s5] ss:$0 sm:$0xff] }
 0xc78   : > { %7699 = vmatmul.mubr.msk.f32.vlgmr.msra.gmra.mrb[80].mxu0 %vm689_vm2, %v5615_v54  ;;  %7706 = vmatprep.subr.mxu0 %v8172_v48 }
 0xc79   : > { %7708 = vmatprep.mubr.msk.f32.mxu0 %vm8173_vm1, %v8172_v48 }
 0xc7a   : > { %v6001_v43 = vpop.permute.xlu1 %6000 }
 0xc7b   : > { %7707 = vmatpush3.msra.mxu0 %v6001_v43 }
 0xc7c   : > { %7709 = vmatmul.mubr.msk.f32.vlgmr.msra.gmra.mrb[82].mxu0 %vm689_vm2, %v5617_v28  ;;  %7716 = vmatprep.subr.mxu0 %v8172_v48 }
 0xc7d   : > { %7718 = vmatprep.mubr.msk.f32.mxu0 %vm8173_vm1, %v8172_v48 }
 0xc7e   : > { %v6153_v55 = vpop.permute.xlu1 %6152 }
 0xc7f   : > { %7717 = vmatpush3.msra.mxu0 %v6153_v55 }
 0xc80   : > { %7719 = vmatmul.mubr.msk.f32.vlgmr.msra.gmra.mrb[84].mxu0 %vm689_vm2, %v5619_v29 }
 0xc92   : > { %v5546_v1 = vpop.xlane.xlu0 %5545 }
 0xc93   : > { %v5560_v56 = vsub.f32 %v5294_v2, %v5546_v1 }
 0xc95   : > { %v5572_v39 = vmul.f32 1.442695, %v5560_v56 }
 0xc96   : > { %v5552_v57 = vpop.xlane.xlu0 %5551 }
 0xc97   : > { %8003 = vpow2.f32 %v5572_v39  ;;  %v5562_v4 = vsub.f32 %v5450_v35, %v5552_v57  ;;  %v8063_v39 = vld [vmem:[%s8364_s13] sm:$0xff] }
 0xc99   : > { %v5576_v46 = vmul.f32 1.442695, %v5562_v4  ;;  %v8064_v4 = vld [vmem:[%s8364_s13 + $0x10] sm:$0xff] }
 0xc9a   : > { %v5582_v10 = vpop.xlane.xlu0 %5581 }
 0xc9b   : > { %8005 = vpow2.f32 %v5576_v46 }
 0xc9c   : > { %8007 = vrcp.f32 %v5582_v10 }
 0xc9e   : > { %v5588_v11 = vpop.xlane.xlu0 %5587 }
 0xc9f   : > { %8009 = vrcp.f32 %v5588_v11  ;;  %v8065_v11 = vld [vmem:[%s8364_s13 + $0x8] sm:$0xff] }
 0xca1   : > { %v8004_v18 = vpop.eup %8003 }
 0xca2   : > { %v5621_v3 = vpop.permute.xlu0 %5620  ;;  %v5592_v5 = vsel %vm689_vm2, %v8004_v18, 0.0 }
 0xca3   : > { %5593 = vadd.xlane.f32.xlu0 %v5592_v5  ;;  %7682 = vmatpush3.msra.mxu1 %v5621_v3 }
 0xca4   : > { %7691 = vmatprep.subr.mxu1 %v8172_v48 }
 0xca5   : > { %v8006_v7 = vpop.eup %8005 }
 0xca6   : > { %v8008_v9 = vpop.eup %8007  ;;  %v5598_v22 = vsel %vm689_vm2, %v8006_v7, 0.0  ;;  %v5925_v12 = vpop.permute.xlu0 %5924 }
 0xca7   : > { %v5612_v23 = vmul.f32 %v8008_v9, %v9153_v59  ;;  %5599 = vadd.xlane.f32.xlu0 %v5598_v22 }
 0xca9   : > { %v8010_v45 = vpop.eup %8009  ;;  %7684 = vmatmul.mubr.msk.f32.vlgmr.msra.gmra.mrb[58].mxu1 %vm689_vm2, %v5612_v23 }
 0xcaa   : > { %v5614_v16 = vmul.f32 %v8010_v45, %v9157_v41  ;;  %7692 = vmatpush3.msra.mxu1 %v5773_v58  ;;  %7693 = vmatprep.mubr.msk.f32.mxu1 %vm8173_vm1, %v8172_v48 }
 0xcab   : > { %7701 = vmatprep.subr.mxu1 %v8172_v48 }
 0xcad   : > { %7694 = vmatmul.mubr.msk.f32.vlgmr.msra.gmra.mrb[60].mxu1 %vm689_vm2, %v5614_v16 }
 0xcae   : > { %7702 = vmatpush3.msra.mxu1 %v5925_v12  ;;  %7703 = vmatprep.mubr.msk.f32.mxu1 %vm8173_vm1, %v8172_v48 }
 0xcaf   : > { %7711 = vmatprep.subr.mxu1 %v8172_v48 }
 0xcbd   : > { %6076 = vrot.lane.b32.xlu0 %v8467_v61, %s8184_s20  ;;  %v6245_v61 = vsel %vm3347_vm3, %v677_v20, 0  ;;  %s8105_s20 = sshll.u32 %s8186_s28, 4  ;;  %s8106_s20 = int_to_ptr.vmem [resolvable:$false] %s8105_s20 }
 0xcbe   : > { %s8107_s19 = scalar_lea.vmem %s8106_s20, 2048  ;;  %p8108_p8 = scmp.lt.s32.totalorder %s9481_s17, %s8106_s20 }
 0xcbf   : > { %p8109_p10 = scmp.lt.s32.totalorder %s8107_s19, %s8101_s29 }
 0xcc1   : > { %p8110_p0 = por %p8109_p10, %p8108_p8 }
 0xcc3   : > { %p8111_p2 = pnand %p8110_p0, %p8104_p13 }
 0xd30   : > { %v5594_v25 = vpop.xlane.xlu0 %5593 }
 0xd31   : > { %8011 = vrcp.f32 %v5594_v25 }
 0xd34   : > { %v5600_v13 = vpop.xlane.xlu0 %5599 }
 0xd35   : > { %8013 = vrcp.f32 %v5600_v13 }
 0xd38   : > { %v6077_v30 = vpop.permute.xlu0 %6076 }
 0xd3b   : > { %v8012_v17 = vpop.eup %8011 }
 0xd3c   : > { %v5616_v19 = vmul.f32 %v8012_v17, %v8004_v18 }
 0xd3e   : > { %7704 = vmatmul.mubr.msk.f32.vlgmr.msra.gmra.mrb[62].mxu1 %vm689_vm2, %v5616_v19 }
 0xd3f   : > { %v8014_v26 = vpop.eup %8013  ;;  %7712 = vmatpush3.msra.mxu1 %v6077_v30  ;;  %7713 = vmatprep.mubr.msk.f32.mxu1 %vm8173_vm1, %v8172_v48 }
 0xd40   : > { %v5618_v6 = vmul.f32 %v8014_v26, %v8006_v7  ;;  %7794 = vmatprep.subr.msk.bf16.mxu1 %vm3347_vm3, %v677_v20 }
 0xd42   : > { %7714 = vmatmul.mubr.msk.f32.vlgmr.msra.gmra.mrb[64].mxu1 %vm689_vm2, %v5618_v6 }
 0xd43   : > { %v5768_v24 = vpop.f32.mrb[78].mxu0  ;;  %7722 = vmatpush3.bf16.msra.mxu1 %v6245_v61  ;;  %v8067_v61 = vld [vmem:[%s8364_s13 + $0x20] sm:$0xff] }
 0xd44   : > { %v7690_v2 = vpop.f32.mrb[79].mxu0 }
 0xd4b   : > { %v5920_v8 = vpop.f32.mrb[80].mxu0 }
 0xd4c   : > { %v7700_v60 = vpop.f32.mrb[81].mxu0 }
 0xd4d   : > { %v8068_v60 = vld [vmem:[%s8364_s13 + $0x30] sm:$0xff] }
 0xd4f   : > { %v6072_v35 = vpop.f32.mrb[82].mxu0 }
 0xd50   : > { %v7710_v49 = vpop.f32.mrb[83].mxu0 }
 0xd53   : > { %v6224_v40 = vpop.f32.mrb[84].mxu0 }
 0xd54   : > { %v7720_v59 = vpop.f32.mrb[85].mxu0 }
 0xd7c   : > { %v5692_v0 = vpop.f32.mrb[58].mxu1 }
 0xd7d   : > { %v6228_v41 = vpack.c.bf16 %v5768_v24, %v5692_v0  ;;  %v7685_v63 = vpop.f32.mrb[59].mxu1 }
 0xd7f   : > { %7723 = vmatprep.mubr.msk.bf16.mxu1 %vm689_vm2, %v6228_v41  ;;  %v8070_v41 = vld [vmem:[%s8364_s13 + $0x38] sm:$0xff] }
 0xd80   : > { %v5844_v48 = vpop.f32.mrb[60].mxu1 }
 0xd81   : > { %v6229_v42 = vpack.c.bf16 %v5920_v8, %v5844_v48  ;;  %v7695_v21 = vpop.f32.mrb[61].mxu1 }
 0xd83   : > { %7724 = vmatmul.mubr.msk.bf16.vlgmr.msra.gmra.mrb[40].mxu1 %vm689_vm2, %v6229_v42 }
 0xe11   : > { %v5996_v44 = vpop.f32.mrb[62].mxu1 }
 0xe12   : > { %v6230_v50 = vpack.c.bf16 %v6072_v35, %v5996_v44  ;;  %v7705_v51 = vpop.f32.mrb[63].mxu1 }
 0xe14   : > { %7727 = vmatprep.mubr.msk.bf16.mxu1 %vm689_vm2, %v6230_v50 }
 0xe15   : > { %v6148_v38 = vpop.f32.mrb[64].mxu1 }
 0xe16   : > { %v6231_v52 = vpack.c.bf16 %v6224_v40, %v6148_v38  ;;  %v7715_v58 = vpop.f32.mrb[65].mxu1 }
 0xe18   : > { %7728 = vmatmul.mubr.msk.bf16.gmra.mrb[44].mxu1 %vm689_vm2, %v6231_v52 }
 0xe56   : > { %v7725_v62 = vpop.f32.mrb[40].mxu1 }
 0xe57   : > { %v7767_v54 = vadd.f32 %v7725_v62, %v8950_v32  ;;  %v6281_v15 = vpop.f32.mrb[41].mxu1 }
 0xe58   : > { %v7768_v28 = vadd.f32 %v6281_v15, %v8952_v27  ;;  %v7726_v43 = vpop.f32.mrb[42].mxu1 }
 0xe59   : > { %v7769_v53 = vadd.f32 %v7726_v43, %v8954_v33  ;;  %v6284_v29 = vpop.f32.mrb[43].mxu1  ;;  %v6329_v55 = vadd.f32 %v7767_v54, %v7161_v14  ;;  %v7861_v43 = vld [vmem:[%s9537_s8] sm:$0xff]  }
 0xe5a   : > { %v6327_v1 = vadd.f32 %v7768_v28, %v7161_v14  ;;  %v7770_v56 = vadd.f32 %v6284_v29, %v8956_v34  ;;  %v8066_v34 = vld [vmem:[%s8364_s13 + $0x18] sm:$0xff]  ;;  %7731 = vmatprep.subr.bf16.mxu0 %v7861_v43 }
 0xe5b   : > { %v9217_v46 = vadd.f32 %v8064_v4, %v6329_v55  ;;  %v6330_v10 = vadd.f32 %v7769_v53, %v7161_v14  ;;  %v7862_v53 = vld [vmem:[%s9537_s8 + $0x8] sm:$0xff]   ;;  %7732 = vmatpush3.bf16.msra.mxu0 %v7861_v43 }
 0xe5c   : > { %v9214_v57 = vadd.f32 %v8063_v39, %v6327_v1  ;;  %v6328_v32 = vadd.f32 %v7770_v56, %v7161_v14  ;;  %7733 = vmatprep.subr.bf16.mxu0 %v7862_v53 }
 0xe5d   : > { %v9227_v3 = vadd.f32 %v8066_v34, %v6330_v10  ;;  %v6351_v5 = vsel %vm443_vm0, %v9217_v46, 0.0 }
 0xe5e   : > { %v9220_v18 = vadd.f32 %v8065_v11, %v6328_v32  ;;  %v6345_v27 = vsel %vm443_vm0, %v9214_v57, 0.0 }
 0xe5f   : > { %6346 = vadd.xlane.f32.xlu0 %v6345_v27  ;;  %v6354_v7 = vsel %vm443_vm0, %v9227_v3, 0.0  ;;  %7734 = vmatpush3.bf16.msra.mxu0 %v7862_v53 }
 0xe60   : > { %v6348_v33 = vsel %vm443_vm0, %v9220_v18, 0.0 }
 0xe61   : > { %6349 = vadd.xlane.f32.xlu1 %v6348_v33 }
 0xe63   : > { %6352 = vadd.xlane.f32.xlu0 %v6351_v5 }
 0xe67   : > { %6355 = vadd.xlane.f32.xlu0 %v6354_v7 }
 0xeeb   : > { %v7729_v9 = vpop.f32.mrb[44].mxu1 }
 0xeec   : > { %v6347_v22 = vpop.xlane.xlu0 %6346  ;;  %v7771_v23 = vadd.f32 %v7729_v9, %v8958_v36  ;;  %v6297_v45 = vpop.f32.mrb[45].mxu1 }
 0xeed   : > { %v7772_v16 = vadd.f32 %v6297_v45, %v8960_v37  ;;  %v7730_v12 = vpop.f32.mrb[46].mxu1  ;;  %v6369_v25 = vmul.f32 0.03125, %v6347_v22 }
 0xeee   : > { %v6350_v13 = vpop.xlane.xlu1 %6349  ;;  %v7773_v17 = vadd.f32 %v7730_v12, %v8962_v47  ;;  %v6300_v19 = vpop.f32.mrb[47].mxu1  ;;  %v6333_v20 = vadd.f32 %v7771_v23, %v7161_v14  ;;  %v8069_v47 = vld [vmem:[%s8364_s13 + $0x28] sm:$0xff] }
 0xeef   : > { %v6331_v30 = vadd.f32 %v7772_v16, %v7161_v14  ;;  %v7774_v26 = vadd.f32 %v6300_v19, %v8964_v31  ;;  %v6370_v36 = vmul.f32 0.03125, %v6350_v13  ;;  %v9241_v8 = vsub.f32 %v9214_v57, %v6369_v25 }
 0xef0   : > { %v6353_v6 = vpop.xlane.xlu0 %6352  ;;  %v6334_v2 = vadd.f32 %v7773_v17, %v7161_v14  ;;  %v9244_v35 = vadd.f32 %v8068_v60, %v6333_v20 }
 0xef1   : > { %v9238_v24 = vadd.f32 %v8067_v61, %v6331_v30  ;;  %v6332_v37 = vadd.f32 %v7774_v26, %v7161_v14  ;;  %v6371_v40 = vmul.f32 0.03125, %v6353_v6  ;;  %v9252_v0 = vsub.f32 %v9220_v18, %v6370_v36 }
 0xef2   : > { %v9255_v63 = vadd.f32 %v8070_v41, %v6334_v2  ;;  %v6363_v44 = vsel %vm443_vm0, %v9244_v35, 0.0  ;;  %v6385_v50 = vmul.f32 %v9241_v8, %v9241_v8 }
 0xef3   : > { %v9247_v49 = vadd.f32 %v8069_v47, %v6332_v37  ;;  %v6357_v31 = vsel %vm443_vm0, %v9238_v24, 0.0  ;;  %v9260_v21 = vsub.f32 %v9217_v46, %v6371_v40  ;;  %v6386_v52 = vmul.f32 %v9252_v0, %v9252_v0  ;;  %v9314_v47 = vld [vmem:[%s9535_s6] ss:$0 sm:$0xff] }
 0xef4   : > { %v6356_v59 = vpop.xlane.xlu0 %6355  ;;  %6358 = vadd.xlane.f32.xlu0 %v6357_v31  ;;  %v6366_v38 = vsel %vm443_vm0, %v9255_v63, 0.0  ;;  %v6393_v58 = vsel %vm443_vm0, %v6385_v50, 0.0 }
 0xef5   : > { %v6372_v48 = vmul.f32 0.03125, %v6356_v59  ;;  %v6360_v42 = vsel %vm443_vm0, %v9247_v49, 0.0  ;;  %v6387_v62 = vmul.f32 %v9260_v21, %v9260_v21  ;;  %v6396_v54 = vsel %vm443_vm0, %v6386_v52, 0.0 }
 0xef6   : > { %6361 = vadd.xlane.f32.xlu1 %v6360_v42  ;;  %v9322_v42 = vld [vmem:[%s9536_s7] ss:$0 sm:$0xff] }
 0xef7   : > { %v9267_v51 = vsub.f32 %v9227_v3, %v6372_v48  ;;  %v6399_v15 = vsel %vm443_vm0, %v6387_v62, 0.0 }
 0xef8   : > { %6364 = vadd.xlane.f32.xlu0 %v6363_v44 }
 0xef9   : > { %v6388_v14 = vmul.f32 %v9267_v51, %v9267_v51 }
 0xefa   : > { %6367 = vadd.xlane.f32.xlu1 %v6366_v38 }
 0xefb   : > { %v6402_v28 = vsel %vm443_vm0, %v6388_v14, 0.0 }
 0xefc   : > { %6394 = vadd.xlane.f32.xlu0 %v6393_v58 }
 0xefe   : > { %6397 = vadd.xlane.f32.xlu1 %v6396_v54 }
 0xf00   : > { %6400 = vadd.xlane.f32.xlu0 %v6399_v15 }
 0xf02   : > { %6403 = vadd.xlane.f32.xlu1 %v6402_v28 }
 0xf81   : > { %v6359_v29 = vpop.xlane.xlu0 %6358 }
 0xf82   : > { %v6373_v55 = vmul.f32 0.03125, %v6359_v29  ;;  %v7864_v29 = vld [vmem:[%s9539_s10 + $0x8] sm:$0xff]  }
 0xf83   : > { %v6362_v1 = vpop.xlane.xlu1 %6361 }
 0xf84   : > { %v9288_v56 = vsub.f32 %v9238_v24, %v6373_v55  ;;  %v6374_v39 = vmul.f32 0.03125, %v6362_v1 }
 0xf85   : > { %v6365_v32 = vpop.xlane.xlu0 %6364 }
 0xf86   : > { %v9291_v4 = vsub.f32 %v9247_v49, %v6374_v39  ;;  %v6375_v10 = vmul.f32 0.03125, %v6365_v32  ;;  %v6389_v11 = vmul.f32 %v9288_v56, %v9288_v56 }
 0xf87   : > { %v6368_v27 = vpop.xlane.xlu1 %6367 }
 0xf88   : > { %v9296_v33 = vsub.f32 %v9244_v35, %v6375_v10  ;;  %v6376_v34 = vmul.f32 0.03125, %v6368_v27  ;;  %v6405_v5 = vsel %vm443_vm0, %v6389_v11, 0.0  ;;  %v6390_v7 = vmul.f32 %v9291_v4, %v9291_v4  ;;  %v7865_v27 = vld [vmem:[%s9539_s10 + $0x10] sm:$0xff]  }
 0xf89   : > { %6406 = vadd.xlane.f32.xlu0 %v6405_v5  ;;  %v6395_v9 = vpop.xlane.xlu0 %6394 }
 0xf8a   : > { %v9302_v22 = vsub.f32 %v9255_v63, %v6376_v34  ;;  %v6417_v23 = vmul.f32 0.03125, %v6395_v9  ;;  %v6408_v45 = vsel %vm443_vm0, %v6390_v7, 0.0  ;;  %v6391_v16 = vmul.f32 %v9296_v33, %v9296_v33  ;;  %v7866_v9 = vld [vmem:[%s9539_s10 + $0x18] sm:$0xff]  }
 0xf8b   : > { %6409 = vadd.xlane.f32.xlu1 %v6408_v45  ;;  %v6398_v12 = vpop.xlane.xlu1 %6397 }
 0xf8c   : > { %v6425_v25 = vadd.f32 1e-05, %v6417_v23  ;;  %v6418_v13 = vmul.f32 0.03125, %v6398_v12  ;;  %v6411_v17 = vsel %vm443_vm0, %v6391_v16, 0.0  ;;  %v6392_v19 = vmul.f32 %v9302_v22, %v9302_v22  ;;  %v7867_v23 = vld [vmem:[%s9539_s10 + $0x20] sm:$0xff]  }
 0xf8d   : > { %6412 = vadd.xlane.f32.xlu0 %v6411_v17  ;;  %v6401_v20 = vpop.xlane.xlu0 %6400  ;;  %v7868_v17 = vld [vmem:[%s9539_s10 + $0x28] sm:$0xff]  }
 0xf8e   : > { %8015 = vrsqrt.f32 %v6425_v25  ;;  %v6426_v30 = vadd.f32 1e-05, %v6418_v13  ;;  %v6419_v26 = vmul.f32 0.03125, %v6401_v20  ;;  %v6414_v6 = vsel %vm443_vm0, %v6392_v19, 0.0 }
 0xf8f   : > { %6415 = vadd.xlane.f32.xlu1 %v6414_v6  ;;  %v6404_v61 = vpop.xlane.xlu1 %6403 }
 0xf90   : > { %8017 = vrsqrt.f32 %v6426_v30  ;;  %v6427_v36 = vadd.f32 1e-05, %v6419_v26  ;;  %v6420_v2 = vmul.f32 0.03125, %v6404_v61 }
 0xf92   : > { %8019 = vrsqrt.f32 %v6427_v36  ;;  %v6428_v37 = vadd.f32 1e-05, %v6420_v2  ;;  %v7869_v36 = vld [vmem:[%s9539_s10 + $0x30] sm:$0xff]  }
 0xf94   : > { %8021 = vrsqrt.f32 %v6428_v37 }
 0xf98   : > { %v8016_v60 = vpop.eup %8015 }
 0xf99   : > { %v6441_v40 = vmul.f32 %v8016_v60, %v9241_v8  ;;  %v7870_v60 = vld [vmem:[%s9539_s10 + $0x38] sm:$0xff]  }
 0xf9a   : > { %v8018_v31 = vpop.eup %8017 }
 0xf9b   : > { %v6442_v59 = vmul.f32 %v8018_v31, %v9252_v0  ;;  %v6455_v41 = vmul.f32 %v9314_v47, %v6441_v40 }
 0xf9c   : > { %v8020_v48 = vpop.eup %8019 }
 0xf9d   : > { %v6443_v44 = vmul.f32 %v8020_v48, %v9260_v21  ;;  %v6456_v50 = vmul.f32 %v9314_v47, %v6442_v59  ;;  %v6469_v58 = vadd.f32 %v9322_v42, %v6455_v41 }
 0xf9e   : > { %v8022_v38 = vpop.eup %8021 }
 0xf9f   : > { %v6457_v52 = vmul.f32 %v9314_v47, %v6443_v44  ;;  %v6444_v8 = vmul.f32 %v8022_v38, %v9267_v51  ;;  %v6470_v0 = vadd.f32 %v9322_v42, %v6456_v50  ;;  %v7863_v51 = vld [vmem:[%s9539_s10] sm:$0xff]  }
 0xfa0   : > { %7743 = vmatprep.subr.bf16.mxu1 %v7863_v51 }
 0xfa1   : > { %v6458_v62 = vmul.f32 %v9314_v47, %v6444_v8  ;;  %v6481_v54 = vpack.c.bf16 %v6470_v0, %v6469_v58  ;;  %v6471_v14 = vadd.f32 %v9322_v42, %v6457_v52  ;;  %7744 = vmatpush3.bf16.msra.mxu1 %v7863_v51 }
 0xfa2   : > { %7745 = vmatprep.subr.bf16.mxu1 %v7864_v29 }
 0xfa3   : > { %7735 = vmatprep.mubr.msk.bf16.mxu0 %vm443_vm0, %v6481_v54  ;;  %v6472_v21 = vadd.f32 %v9322_v42, %v6458_v62 }
 0xfa5   : > { %v6482_v15 = vpack.c.bf16 %v6472_v21, %v6471_v14  ;;  %7746 = vmatpush3.bf16.msra.mxu1 %v7864_v29 }
 0xfa6   : > { %7747 = vmatprep.subr.bf16.mxu1 %v7865_v27 }
 0xfa7   : > { %7736 = vmatmul.mubr.msk.bf16.vlgmr.msra.gmra.mrb[88].mxu0 %vm443_vm0, %v6482_v15 }
 0xfa9   : > { %7748 = vmatpush3.bf16.msra.mxu1 %v7865_v27 }
 0xfaa   : > { %7749 = vmatprep.subr.bf16.mxu1 %v7866_v9 }
 0xfad   : > { %7750 = vmatpush3.bf16.msra.mxu1 %v7866_v9 }
 0xfae   : > { %7751 = vmatprep.subr.bf16.mxu1 %v7867_v23 }
 0xfb1   : > { %7752 = vmatpush3.bf16.msra.mxu1 %v7867_v23 }
 0xfb2   : > { %7753 = vmatprep.subr.bf16.mxu1 %v7868_v17 }
 0xfb5   : > { %7754 = vmatpush3.bf16.msra.mxu1 %v7868_v17 }
 0xfb6   : > { %7755 = vmatprep.subr.bf16.mxu1 %v7869_v36 }
 0xfb9   : > { %7756 = vmatpush3.bf16.msra.mxu1 %v7869_v36 }
 0xfba   : > { %7757 = vmatprep.subr.bf16.mxu1 %v7870_v60 }
 0xfbd   : > { %7758 = vmatpush3.bf16.msra.mxu1 %v7870_v60 }
0x1016   : > { %v6407_v28 = vpop.xlane.xlu0 %6406 }
0x1017   : > { %v6421_v43 = vmul.f32 0.03125, %v6407_v28 }
0x1018   : > { %v6410_v53 = vpop.xlane.xlu1 %6409 }
0x1019   : > { %v6429_v55 = vadd.f32 1e-05, %v6421_v43  ;;  %v6422_v1 = vmul.f32 0.03125, %v6410_v53 }
0x101a   : > { %v6413_v39 = vpop.xlane.xlu0 %6412 }
0x101b   : > { %8023 = vrsqrt.f32 %v6429_v55  ;;  %v6430_v32 = vadd.f32 1e-05, %v6422_v1  ;;  %v6423_v10 = vmul.f32 0.03125, %v6413_v39 }
0x101c   : > { %v6416_v11 = vpop.xlane.xlu1 %6415 }
0x101d   : > { %8025 = vrsqrt.f32 %v6430_v32  ;;  %v6431_v34 = vadd.f32 1e-05, %v6423_v10  ;;  %v6424_v5 = vmul.f32 0.03125, %v6416_v11 }
0x101f   : > { %8027 = vrsqrt.f32 %v6431_v34  ;;  %v6432_v7 = vadd.f32 1e-05, %v6424_v5 }
0x1021   : > { %8029 = vrsqrt.f32 %v6432_v7 }
0x1025   : > { %v8024_v45 = vpop.eup %8023 }
0x1026   : > { %v6445_v16 = vmul.f32 %v8024_v45, %v9288_v56 }
0x1027   : > { %v8026_v12 = vpop.eup %8025 }
0x1028   : > { %v6446_v25 = vmul.f32 %v8026_v12, %v9291_v4  ;;  %v6459_v13 = vmul.f32 %v9314_v47, %v6445_v16 }
0x1029   : > { %v8028_v19 = vpop.eup %8027 }
0x102a   : > { %v6447_v20 = vmul.f32 %v8028_v19, %v9296_v33  ;;  %v6460_v30 = vmul.f32 %v9314_v47, %v6446_v25  ;;  %v6473_v6 = vadd.f32 %v9322_v42, %v6459_v13 }
0x102b   : > { %v8030_v26 = vpop.eup %8029 }
0x102c   : > { %v6448_v56 = vmul.f32 %v8030_v26, %v9302_v22  ;;  %v6474_v4 = vadd.f32 %v9322_v42, %v6460_v30  ;;  %v6461_v61 = vmul.f32 %v9314_v47, %v6447_v20 }
0x102e   : > { %v6483_v2 = vpack.c.bf16 %v6474_v4, %v6473_v6  ;;  %v6462_v33 = vmul.f32 %v9314_v47, %v6448_v56  ;;  %v6475_v37 = vadd.f32 %v9322_v42, %v6461_v61  ;;  %v9376_v47 = vld [vmem:[%s9538_s9] ss:$0 sm:$0xff] }
0x1030   : > { %7739 = vmatprep.mubr.msk.bf16.mxu0 %vm443_vm0, %v6483_v2  ;;  %v6476_v22 = vadd.f32 %v9322_v42, %v6462_v33 }
0x1032   : > { %v6484_v40 = vpack.c.bf16 %v6476_v22, %v6475_v37 }
0x1034   : > { %7740 = vmatmul.mubr.msk.bf16.gmra.mrb[92].mxu0 %vm443_vm0, %v6484_v40 }
0x107a   : > { %v7737_v31 = vpop.f32.mrb[88].mxu0 }
0x107b   : > { %v9379_v59 = vadd.f32 %v7737_v31, %v9376_v47  ;;  %v6550_v41 = vpop.f32.mrb[89].mxu0 }
0x107c   : > { %v9382_v48 = vadd.f32 %v9376_v47, %v6550_v41  ;;  %v7738_v42 = vpop.f32.mrb[90].mxu0 }
0x107d   : > { %v9385_v44 = vmul.f32 0.70710677, %v9379_v59  ;;  %v9388_v50 = vadd.f32 %v7738_v42, %v9376_v47  ;;  %v6553_v38 = vpop.f32.mrb[91].mxu0 }
0x107e   : > { %v9391_v52 = vmul.f32 0.70710677, %v9382_v48  ;;  %v9398_v0 = vadd.f32 %v9376_v47, %v6553_v38 }
0x107f   : > { %v6615_v8 = vand.u32 2147483647, %v9385_v44  ;;  %v9395_v58 = vmul.f32 0.70710677, %v9388_v50  ;;  %vm6599_vm4 = vcmp.ge.f32.partialorder %v9385_v44, 0.0 }
0x1080   : > { %v6613_v62 = vand.u32 2147483647, %v9391_v52  ;;  %v9403_v51 = vmul.f32 0.70710677, %v9398_v0  ;;  %vm6597_vm5 = vcmp.ge.f32.partialorder %v9391_v52, 0.0 }
0x1081   : > { %v6623_v54 = vmul.f32 0.3275911, %v6615_v8  ;;  %v6616_v21 = vand.u32 2147483647, %v9395_v58  ;;  %v6719_v39 = vsub.f32 0.0, %v6615_v8  ;;  %vm6600_vm6 = vcmp.ge.f32.partialorder %v9395_v58, 0.0 }
0x1082   : > { %v6621_v14 = vmul.f32 0.3275911, %v6613_v62  ;;  %v6614_v53 = vand.u32 2147483647, %v9403_v51  ;;  %v6717_v32 = vsub.f32 0.0, %v6613_v62  ;;  %vm6598_vm7 = vcmp.ge.f32.partialorder %v9403_v51, 0.0 }
0x1083   : > { %v6631_v15 = vadd.f32 1.0, %v6623_v54  ;;  %v6624_v43 = vmul.f32 0.3275911, %v6616_v21  ;;  %v6727_v11 = vmul.f32 %v6719_v39, %v6615_v8  ;;  %v6720_v27 = vsub.f32 0.0, %v6616_v21 }
0x1084   : > { %v6629_v28 = vadd.f32 1.0, %v6621_v14  ;;  %v6622_v55 = vmul.f32 0.3275911, %v6614_v53  ;;  %v6725_v7 = vmul.f32 %v6717_v32, %v6613_v62  ;;  %v6718_v23 = vsub.f32 0.0, %v6614_v53 }
0x1085   : > { %8031 = vrcp.f32 %v6631_v15  ;;  %v6632_v29 = vadd.f32 1.0, %v6624_v43  ;;  %v6737_v12 = vmul.f32 1.442695, %v6727_v11  ;;  %v6728_v13 = vmul.f32 %v6720_v27, %v6616_v21 }
0x1086   : > { %8033 = vrcp.f32 %v6629_v28  ;;  %v6630_v1 = vadd.f32 1.0, %v6622_v55  ;;  %v6733_v19 = vmul.f32 1.442695, %v6725_v7  ;;  %v6726_v56 = vmul.f32 %v6718_v23, %v6614_v53 }
0x1087   : > { %8035 = vrcp.f32 %v6632_v29  ;;  %v6739_v2 = vmul.f32 1.442695, %v6728_v13  ;;  %v6582_v51 = vmul.f32 0.5, %v9398_v0 }
0x1088   : > { %8037 = vrcp.f32 %v6630_v1  ;;  %v6735_v40 = vmul.f32 1.442695, %v6726_v56 }
0x1089   : > { %8039 = vpow2.f32 %v6737_v12 }
0x108a   : > { %8041 = vpow2.f32 %v6733_v19 }
0x108b   : > { %8043 = vpow2.f32 %v6739_v2 }
0x108c   : > { %8045 = vpow2.f32 %v6735_v40 }
0x108f   : > { %v8032_v10 = vpop.eup %8031 }
0x1090   : > { %v8034_v34 = vpop.eup %8033  ;;  %v6647_v5 = vmul.f32 1.0614054, %v8032_v10 }
0x1091   : > { %v6645_v9 = vmul.f32 1.0614054, %v8034_v34  ;;  %v8036_v16 = vpop.eup %8035 }
0x1092   : > { %v6655_v45 = vadd.f32 -1.4531521, %v6647_v5  ;;  %v6648_v20 = vmul.f32 1.0614054, %v8036_v16  ;;  %v8038_v30 = vpop.eup %8037 }
0x1093   : > { %v6653_v25 = vadd.f32 -1.4531521, %v6645_v9  ;;  %v6646_v61 = vmul.f32 1.0614054, %v8038_v30  ;;  %v8040_v1 = vpop.eup %8039 }
0x1094   : > { %v6663_v17 = vmul.f32 %v8032_v10, %v6655_v45  ;;  %v6656_v4 = vadd.f32 -1.4531521, %v6648_v20  ;;  %v8042_v32 = vpop.eup %8041 }
0x1095   : > { %v6661_v26 = vmul.f32 %v8034_v34, %v6653_v25  ;;  %v6654_v22 = vadd.f32 -1.4531521, %v6646_v61  ;;  %v8044_v12 = vpop.eup %8043  ;;  %v8185_v25 = vmov -1.0  }
0x1096   : > { %v6671_v6 = vadd.f32 1.4214138, %v6663_v17  ;;  %v6664_v37 = vmul.f32 %v8036_v16, %v6656_v4  ;;  %v8046_v44 = vpop.eup %8045  ;;  %v6605_v20 = vsel %vm6597_vm5, 1.0, %v8185_v25  ;;  %v6606_v2 = vsel %vm6598_vm7, 1.0, %v8185_v25 }
0x1097   : > { %v6669_v36 = vadd.f32 1.4214138, %v6661_v26  ;;  %v6662_v42 = vmul.f32 %v8038_v30, %v6654_v22  ;;  %v6581_v22 = vmul.f32 0.5, %v9382_v48 }
0x1098   : > { %v6679_v33 = vmul.f32 %v8032_v10, %v6671_v6  ;;  %v6672_v41 = vadd.f32 1.4214138, %v6664_v37 }
0x1099   : > { %v6677_v60 = vmul.f32 %v8034_v34, %v6669_v36  ;;  %v6670_v54 = vadd.f32 1.4214138, %v6662_v42  ;;  %v6583_v36 = vmul.f32 0.5, %v9379_v59 }
0x109a   : > { %v6687_v31 = vadd.f32 -0.28449672, %v6679_v33  ;;  %v6680_v62 = vmul.f32 %v8036_v16, %v6672_v41 }
0x109b   : > { %v6685_v38 = vadd.f32 -0.28449672, %v6677_v60  ;;  %v6678_v28 = vmul.f32 %v8038_v30, %v6670_v54 }
0x109c   : > { %v6695_v8 = vmul.f32 %v8032_v10, %v6687_v31  ;;  %v6688_v15 = vadd.f32 -0.28449672, %v6680_v62 }
0x109d   : > { %v6693_v14 = vmul.f32 %v8034_v34, %v6685_v38  ;;  %v6686_v55 = vadd.f32 -0.28449672, %v6678_v28 }
0x109e   : > { %v6703_v21 = vadd.f32 0.2548296, %v6695_v8  ;;  %v6696_v29 = vmul.f32 %v8036_v16, %v6688_v15 }
0x109f   : > { %v6701_v43 = vadd.f32 0.2548296, %v6693_v14  ;;  %v6694_v5 = vmul.f32 %v8038_v30, %v6686_v55 }
0x10a0   : > { %v6711_v53 = vmul.f32 %v8032_v10, %v6703_v21  ;;  %v6704_v27 = vadd.f32 0.2548296, %v6696_v29  ;;  %v6607_v10 = vsel %vm6599_vm4, 1.0, %v8185_v25 }
0x10a1   : > { %v6709_v39 = vmul.f32 %v8034_v34, %v6701_v43  ;;  %v6702_v45 = vadd.f32 0.2548296, %v6694_v5 }
0x10a2   : > { %v6751_v11 = vmul.f32 %v8040_v1, %v6711_v53  ;;  %v6712_v23 = vmul.f32 %v8036_v16, %v6704_v27  ;;  %v6608_v16 = vsel %vm6600_vm6, 1.0, %v8185_v25 }
0x10a3   : > { %v6749_v7 = vmul.f32 %v8042_v32, %v6709_v39  ;;  %v6710_v19 = vmul.f32 %v8038_v30, %v6702_v45  ;;  %v6584_v30 = vmul.f32 0.5, %v9388_v50 }
0x10a4   : > { %v6759_v9 = vsub.f32 1.0, %v6751_v11  ;;  %v6752_v34 = vmul.f32 %v8044_v12, %v6712_v23 }
0x10a5   : > { %v6757_v13 = vsub.f32 1.0, %v6749_v7  ;;  %v6750_v52 = vmul.f32 %v8046_v44, %v6710_v19 }
0x10a6   : > { %v6767_v17 = vmul.f32 %v6759_v9, %v6607_v10  ;;  %v6760_v56 = vsub.f32 1.0, %v6752_v34 }
0x10a7   : > { %v6765_v26 = vmul.f32 %v6757_v13, %v6605_v20  ;;  %v6758_v61 = vsub.f32 1.0, %v6750_v52 }
0x10a8   : > { %v6775_v6 = vadd.f32 1.0, %v6767_v17  ;;  %v6768_v4 = vmul.f32 %v6760_v56, %v6608_v16 }
0x10a9   : > { %v6773_v58 = vadd.f32 1.0, %v6765_v26  ;;  %v6766_v37 = vmul.f32 %v6758_v61, %v6606_v2 }
0x10aa   : > { %v6776_v33 = vadd.f32 1.0, %v6768_v4  ;;  %v6783_v60 = vmul.f32 %v6775_v6, %v6583_v36 }
0x10ab   : > { %v6774_v31 = vadd.f32 1.0, %v6766_v37  ;;  %v6781_v41 = vmul.f32 %v6773_v58, %v6581_v22 }
0x10ac   : > { %v6784_v40 = vmul.f32 %v6776_v33, %v6584_v30 }
0x10ad   : > { %v6782_v38 = vmul.f32 %v6774_v31, %v6582_v51 }
0x10ae   : > { %v6806_v42 = vpack.c.bf16 %v6784_v40, %v6783_v60 }
0x10af   : > { %v6805_v8 = vpack.c.bf16 %v6782_v38, %v6781_v41 }
0x10b1   : > { %7759 = vmatprep.mubr.bf16.mxu1 %v6805_v8 }
0x10b2   : > { %7760 = vmatmul.mubr.bf16.vlgmr.msra.gmra.mrb[68].mxu1 %v6806_v42 }
0x1107   : > { %v7741_v59 = vpop.f32.mrb[92].mxu0 }
0x1108   : > { %v9419_v62 = vadd.f32 %v7741_v59, %v9376_v47  ;;  %v6566_v50 = vpop.f32.mrb[93].mxu0 }
0x1109   : > { %v9422_v54 = vadd.f32 %v9376_v47, %v6566_v50  ;;  %v7742_v48 = vpop.f32.mrb[94].mxu0 }
0x110a   : > { %v9425_v14 = vmul.f32 0.70710677, %v9419_v62  ;;  %v9428_v0 = vadd.f32 %v7742_v48, %v9376_v47  ;;  %v6569_v21 = vpop.f32.mrb[95].mxu0 }
0x110b   : > { %v9431_v15 = vmul.f32 0.70710677, %v9422_v54  ;;  %v9438_v53 = vadd.f32 %v9376_v47, %v6569_v21 }
0x110c   : > { %v6619_v28 = vand.u32 2147483647, %v9425_v14  ;;  %v9435_v43 = vmul.f32 0.70710677, %v9428_v0  ;;  %vm6603_vm8 = vcmp.ge.f32.partialorder %v9425_v14, 0.0 }
0x110d   : > { %v6617_v29 = vand.u32 2147483647, %v9431_v15  ;;  %v9443_v11 = vmul.f32 0.70710677, %v9438_v53  ;;  %vm6601_vm9 = vcmp.ge.f32.partialorder %v9431_v15, 0.0 }
0x110e   : > { %v6627_v55 = vmul.f32 0.3275911, %v6619_v28  ;;  %v6620_v39 = vand.u32 2147483647, %v9435_v43  ;;  %v6723_v45 = vsub.f32 0.0, %v6619_v28  ;;  %vm6604_vm10 = vcmp.ge.f32.partialorder %v9435_v43, 0.0 }
0x110f   : > { %v6625_v1 = vmul.f32 0.3275911, %v6617_v29  ;;  %v6618_v7 = vand.u32 2147483647, %v9443_v11  ;;  %v6721_v12 = vsub.f32 0.0, %v6617_v29  ;;  %v6609_v14 = vsel %vm6601_vm9, 1.0, %v8185_v25 }
0x1110   : > { %v6635_v32 = vadd.f32 1.0, %v6627_v55  ;;  %v6628_v5 = vmul.f32 0.3275911, %v6620_v39  ;;  %v6731_v13 = vmul.f32 %v6723_v45, %v6619_v28  ;;  %v6724_v17 = vsub.f32 0.0, %v6620_v39 }
0x1111   : > { %v6633_v27 = vadd.f32 1.0, %v6625_v1  ;;  %v6626_v23 = vmul.f32 0.3275911, %v6618_v7  ;;  %v6729_v44 = vmul.f32 %v6721_v12, %v6617_v29  ;;  %v6722_v26 = vsub.f32 0.0, %v6618_v7 }
0x1112   : > { %8047 = vrcp.f32 %v6635_v32  ;;  %v6636_v9 = vadd.f32 1.0, %v6628_v5  ;;  %v6745_v16 = vmul.f32 1.442695, %v6731_v13  ;;  %v6732_v4 = vmul.f32 %v6724_v17, %v6620_v39 }
0x1113   : > { %8049 = vrcp.f32 %v6633_v27  ;;  %v6634_v47 = vadd.f32 1.0, %v6626_v23  ;;  %v6741_v36 = vmul.f32 1.442695, %v6729_v44  ;;  %v6730_v33 = vmul.f32 %v6722_v26, %v6618_v7 }
0x1114   : > { %8051 = vrcp.f32 %v6636_v9  ;;  %v6747_v51 = vmul.f32 1.442695, %v6732_v4  ;;  %vm6602_vm11 = vcmp.ge.f32.partialorder %v9443_v11, 0.0  ;;  %v6612_v15 = vsel %vm6604_vm10, 1.0, %v8185_v25 }
0x1115   : > { %8053 = vrcp.f32 %v6634_v47  ;;  %v6743_v8 = vmul.f32 1.442695, %v6730_v33  ;;  %v6586_v11 = vmul.f32 0.5, %v9438_v53 }
0x1116   : > { %8055 = vpow2.f32 %v6745_v16 }
0x1117   : > { %8057 = vpow2.f32 %v6741_v36 }
0x1118   : > { %8059 = vpow2.f32 %v6747_v51 }
0x1119   : > { %8061 = vpow2.f32 %v6743_v8 }
0x111c   : > { %v8048_v10 = vpop.eup %8047 }
0x111d   : > { %v8050_v34 = vpop.eup %8049  ;;  %v6651_v19 = vmul.f32 1.0614054, %v8048_v10 }
0x111e   : > { %v6649_v20 = vmul.f32 1.0614054, %v8050_v34  ;;  %v8052_v52 = vpop.eup %8051 }
0x111f   : > { %v6659_v56 = vadd.f32 -1.4531521, %v6651_v19  ;;  %v6652_v2 = vmul.f32 1.0614054, %v8052_v52  ;;  %v8054_v58 = vpop.eup %8053 }
0x1120   : > { %v6657_v6 = vadd.f32 -1.4531521, %v6649_v20  ;;  %v6650_v60 = vmul.f32 1.0614054, %v8054_v58  ;;  %v8056_v47 = vpop.eup %8055 }
0x1121   : > { %v6667_v61 = vmul.f32 %v8048_v10, %v6659_v56  ;;  %v6660_v22 = vadd.f32 -1.4531521, %v6652_v2  ;;  %v8058_v12 = vpop.eup %8057 }
0x1122   : > { %v6665_v30 = vmul.f32 %v8050_v34, %v6657_v6  ;;  %v6658_v42 = vadd.f32 -1.4531521, %v6650_v60  ;;  %v8060_v16 = vpop.eup %8059  ;;  %v6611_v6 = vsel %vm6603_vm8, 1.0, %v8185_v25  ;;  %v6587_v60 = vmul.f32 0.5, %v9419_v62 }
0x1123   : > { %v6675_v37 = vadd.f32 1.4214138, %v6667_v61  ;;  %v6668_v41 = vmul.f32 %v8052_v52, %v6660_v22  ;;  %v8062_v36 = vpop.eup %8061 }
0x1124   : > { %v6673_v40 = vadd.f32 1.4214138, %v6665_v30  ;;  %v6666_v48 = vmul.f32 %v8054_v58, %v6658_v42 }
0x1125   : > { %v6683_v31 = vmul.f32 %v8048_v10, %v6675_v37  ;;  %v6676_v50 = vadd.f32 1.4214138, %v6668_v41  ;;  %v6585_v41 = vmul.f32 0.5, %v9422_v54 }
0x1126   : > { %v6681_v38 = vmul.f32 %v8050_v34, %v6673_v40  ;;  %v6674_v55 = vadd.f32 1.4214138, %v6666_v48  ;;  %v6610_v40 = vsel %vm6602_vm11, 1.0, %v8185_v25  ;;  %v7171_v25 = vld [vmem:[%s9540_s11] ss:$0 sm:$0xff] }
0x1127   : > { %v6691_v59 = vadd.f32 -0.28449672, %v6683_v31  ;;  %v6684_v29 = vmul.f32 %v8052_v52, %v6676_v50 }
0x1128   : > { %v6689_v21 = vadd.f32 -0.28449672, %v6681_v38  ;;  %v6682_v27 = vmul.f32 %v8054_v58, %v6674_v55 }
0x1129   : > { %v6699_v28 = vmul.f32 %v8048_v10, %v6691_v59  ;;  %v6692_v32 = vadd.f32 -0.28449672, %v6684_v29 }
0x112a   : > { %v6697_v1 = vmul.f32 %v8050_v34, %v6689_v21  ;;  %v6690_v23 = vadd.f32 -0.28449672, %v6682_v27 }
0x112b   : > { %v6707_v39 = vadd.f32 0.2548296, %v6699_v28  ;;  %v6700_v9 = vmul.f32 %v8052_v52, %v6692_v32 }
0x112c   : > { %v6705_v5 = vadd.f32 0.2548296, %v6697_v1  ;;  %v6698_v19 = vmul.f32 %v8054_v58, %v6690_v23 }
0x112d   : > { %v6715_v7 = vmul.f32 %v8048_v10, %v6707_v39  ;;  %v6708_v17 = vadd.f32 0.2548296, %v6700_v9 }
0x112e   : > { %v6713_v45 = vmul.f32 %v8050_v34, %v6705_v5  ;;  %v6706_v56 = vadd.f32 0.2548296, %v6698_v19 }
0x112f   : > { %v6755_v13 = vmul.f32 %v8056_v47, %v6715_v7  ;;  %v6716_v26 = vmul.f32 %v8052_v52, %v6708_v17 }
0x1130   : > { %v6753_v44 = vmul.f32 %v8058_v12, %v6713_v45  ;;  %v6714_v61 = vmul.f32 %v8054_v58, %v6706_v56  ;;  %v6588_v58 = vmul.f32 0.5, %v9428_v0 }
0x1131   : > { %v6763_v20 = vsub.f32 1.0, %v6755_v13  ;;  %v6756_v34 = vmul.f32 %v8060_v16, %v6716_v26 }
0x1132   : > { %v6761_v10 = vsub.f32 1.0, %v6753_v44  ;;  %v6754_v33 = vmul.f32 %v8062_v36, %v6714_v61 }
0x1133   : > { %v6771_v4 = vmul.f32 %v6763_v20, %v6611_v6  ;;  %v6764_v30 = vsub.f32 1.0, %v6756_v34 }
0x1134   : > { %v6769_v2 = vmul.f32 %v6761_v10, %v6609_v14  ;;  %v6762_v22 = vsub.f32 1.0, %v6754_v33 }
0x1135   : > { %v6779_v52 = vadd.f32 1.0, %v6771_v4  ;;  %v6772_v37 = vmul.f32 %v6764_v30, %v6612_v15 }
0x1136   : > { %v6777_v43 = vadd.f32 1.0, %v6769_v2  ;;  %v6770_v31 = vmul.f32 %v6762_v22, %v6610_v40 }
0x1137   : > { %v6780_v51 = vadd.f32 1.0, %v6772_v37  ;;  %v6787_v42 = vmul.f32 %v6779_v52, %v6587_v60 }
0x1138   : > { %v6778_v8 = vadd.f32 1.0, %v6770_v31  ;;  %v6785_v59 = vmul.f32 %v6777_v43, %v6585_v41 }
0x1139   : > { %v6788_v38 = vmul.f32 %v6780_v51, %v6588_v58 }
0x113a   : > { %v6786_v50 = vmul.f32 %v6778_v8, %v6586_v11 }
0x113b   : > { %v6808_v48 = vpack.c.bf16 %v6788_v38, %v6787_v42 }
0x113c   : > { %v6807_v21 = vpack.c.bf16 %v6786_v50, %v6785_v59 }
0x113e   : > { %7763 = vmatprep.mubr.bf16.mxu1 %v6807_v21 }
0x113f   : > { %7764 = vmatmul.mubr.bf16.gmra.mrb[72].mxu1 %v6808_v48 }
0x1185   : > { %v7761_v62 = vpop.f32.mrb[68].mxu1 }
0x1186   : > { %v6907_v0 = vadd.f32 %v7761_v62, %v7171_v25  ;;  %v6898_v28 = vpop.f32.mrb[69].mxu1 }
0x1187   : > { %v6899_v54 = vadd.f32 %v7171_v25, %v6898_v28  ;;  %v7762_v29 = vpop.f32.mrb[70].mxu1 }
0x1188   : > { %v6931_v55 = vadd.f32 %v6907_v0, %v9217_v46  ;;  %v6910_v53 = vadd.f32 %v7762_v29, %v7171_v25  ;;  %v6901_v1 = vpop.f32.mrb[71].mxu1 }
0x1189   : > { %v6929_v39 = vadd.f32 %v6899_v54, %v9214_v57  ;;  %v6902_v32 = vadd.f32 %v7171_v25, %v6901_v1 }
0x118a   : > { %6939 = vst.msk [vmem:[%s431_s23 + $0x10] sm:$0xff] %vm443_vm0, %v6931_v55  ;;  %v6932_v27 = vadd.f32 %v6910_v53, %v9227_v3 }
0x118b   : > { %6937 = vst.msk [vmem:[%s431_s23] sm:$0xff] %vm443_vm0, %v6929_v39  ;;  %v6930_v5 = vadd.f32 %v6902_v32, %v9220_v18 }
0x118c   : > { %6940 = vst.msk [vmem:[%s431_s23 + $0x18] sm:$0xff] %vm443_vm0, %v6932_v27 }
0x118d   : > { %6938 = vst.msk [vmem:[%s431_s23 + $0x8] sm:$0xff] %vm443_vm0, %v6930_v5 }
0x1212   : > { %v7765_v46 = vpop.f32.mrb[72].mxu1 }
0x1213   : > { %v6923_v7 = vadd.f32 %v7765_v46, %v7171_v25  ;;  %v6914_v9 = vpop.f32.mrb[73].mxu1 }
0x1214   : > { %v6915_v23 = vadd.f32 %v7171_v25, %v6914_v9  ;;  %v7766_v57 = vpop.f32.mrb[74].mxu1 }
0x1215   : > { %v6935_v47 = vadd.f32 %v6923_v7, %v9244_v35  ;;  %v6926_v3 = vadd.f32 %v7766_v57, %v7171_v25  ;;  %v6917_v45 = vpop.f32.mrb[75].mxu1 }
0x1216   : > { %v6933_v12 = vadd.f32 %v6915_v23, %v9238_v24  ;;  %v6918_v18 = vadd.f32 %v7171_v25, %v6917_v45 }
0x1217   : > { %6943 = vst.msk [vmem:[%s431_s23 + $0x30] sm:$0xff] %vm443_vm0, %v6935_v47  ;;  %v6936_v13 = vadd.f32 %v6926_v3, %v9255_v63 }
0x1218   : > { %6941 = vst.msk [vmem:[%s431_s23 + $0x20] sm:$0xff] %vm443_vm0, %v6933_v12  ;;  %v6934_v35 = vadd.f32 %v6918_v18, %v9247_v49 }
0x1219   : > { %6944 = vst.msk [vmem:[%s431_s23 + $0x38] sm:$0xff] %vm443_vm0, %v6936_v13 }
0x121a   : > { %6942 = vst.msk [vmem:[%s431_s23 + $0x28] sm:$0xff] %vm443_vm0, %v6934_v35 }
0x121b   : > { %8114 = shalt.err (!%p8111_p2)
}
0x121c   : > { %s8115_s18 = scalar_lea.hbm %s9479_s14, 1024  ;;  %s8119_s13 = scalar_lea.hbm %s9541_s12, 2048 }
0x121d   : > { %p8116_p4 = scmp.ne.s32.totalorder %s9479_s14, %s8115_s18  ;;  %p8120_p9 = scmp.lt.u32.totalorder %s9479_s14, %s9541_s12 }
0x121e   : > { %p8121_p1 = scmp.lt.u32.totalorder %s8119_s13, %s8115_s18  ;;  %p8123_p6 = scmp.lt.u32.totalorder %s8115_s18, %s9479_s14 }
0x121f   : > { %p8117_p5 = pnand %p8116_p4, %p9554_p11 }
0x1220   : > { %p8122_p3 = por %p8121_p1, %p8120_p9 }
0x1221   : > { %p8118_p7 = pneg %p8117_p5 }
0x1222   : > { %p8124_p12 = por %p8123_p6, %p8122_p3 }
0x1224   : > { %p8125_p13 = pnand %p8124_p12, %p8118_p7 }
0x1226   : > { %8128 = shalt.err (!%p8125_p13)
}
0x1227   : > { %s8187_s29 = smov 128   ;;  %s8188_s20 = smov 8  }
0x1228   : > { %7797 = dma.vmem_to_hbm [thread:$0]  (%p9554_p11), %s9481_s17, 1024, %s9479_s14, %s6946_s25, %s8187_s29, %s8187_s29, %s8188_s20  }
0x1229 PF: > { %s6974_s19 = sand.u32 1, %s8155_s21   ;;  %p9555_p8 = scmp.ne.s32.totalorder %s9552_s16, 0 }
0x122a   : > { %p9556_p10 = scmp.ge.s32.totalorder %s8167_s24, 2  ;;  %s6975_s18 = scalar_lea.sflag [#allocation4], %s6974_s19 }
0x122c   : > { %p7804_p0 = pnand %p9556_p10, %p9555_p8 }
0x122e   : > { %8150 = dma.done.wait (!%p7804_p0), %s6975_s18, 1024  }
0x122f   : > { %8152 = vsyncadd (!%p7804_p0), %s6975_s18, 4294966272  ;;  %s9557_s24 = sld [smem:[#allocation9_spill]]  ;;  %s9558_s23 = sld [smem:[#allocation8_spill]] }
0x1230   : > { %s9559_s27 = sld [smem:[#allocation10_spill]]  ;;  %s9560_s21 = smov %s8159_s22 }
0x1235   : > { %p25_p2 = scmp.ge.s32.totalorder %s9557_s24, 4   ;;  %s9561_s22 = smov %s9558_s23 }
0x1236   : > { %s9562_s23 = smov %s9559_s27 }
0x1237   :  { %27 = sbr.rel (!%p25_p2) target bundleno = 5 (0x5), region = 113 }
0x123e   :  { %6980 = vsyncpa [#allocation3], 1 }
0x123f   :  { %6982 = vsyncpa [#allocation3 + $0x1], 1 }
0x1240   :  { %6983 = vsyncpa [#allocation4], 1 }
0x1241   :  { %6985 = vsyncpa [#allocation4 + $0x1], 1 }

</bundles_post_ra>
